<compile_context>
chip_gen: v6e
topology: v6e:2x2x1
jax: 0.10.0
libtpu: 0.0.40
codegen_flags: <defaults>
</compile_context>

<pallas_src>
import jax
import jax.numpy as jnp
from jax.experimental import pallas as pl
from jax.experimental.pallas import tpu as pltpu


def _round_up(x, m):
    return ((x + m - 1) // m) * m


def _extractor_head_kernel(xp_ref, w1_ref, b1_ref, w2_ref, b2_ref, out_ref):
    # xp_ref : (N, H+2, W+2, C_in)  bf16   zero-padded NHWC input
    # w1_ref : (K_PAD, C_out)       bf16   folded conv+BN weight (im2col layout, K zero-padded)
    # b1_ref : (1, C_out)           f32    folded BN bias
    # w2_ref : (C_out, NC_PAD)      bf16   head weight (out-dim zero-padded to 128)
    # b2_ref : (1, NC_PAD)          f32    head bias (zero-padded)
    # out_ref: (N, NC_PAD)          f32    lane-dense logits
    n, hp, wp, c_in = xp_ref.shape
    h, w = hp - 2, wp - 2
    hw = h * w
    k_pad, c_out = w1_ref.shape
    k = 9 * c_in

    # Build im2col patches in VMEM from the padded input (tap order: ky, kx,
    # channel-minor — matches the (2,3,1,0) weight transpose in make_params).
    taps = [xp_ref[:, dy:dy + h, dx:dx + w, :]
            for dy in range(3) for dx in range(3)]          # 9 x (N, H, W, C_in) bf16
    if k_pad > k:
        taps.append(jnp.zeros((n, h, w, k_pad - k), dtype=xp_ref.dtype))
    patches = jnp.concatenate(taps, axis=-1)                 # (N, H, W, K_PAD)
    patches = patches.reshape(n * hw, k_pad)                 # (N*HW, K_PAD) bf16

    # Conv-as-matmul on the MXU: bf16 operands, f32 accumulate (autocast analog).
    feat = jnp.dot(patches, w1_ref[...], preferred_element_type=jnp.float32)
    feat = jnp.maximum(feat + b1_ref[...], 0.0)              # + folded BN bias, ReLU

    # Global average pool (AdaptiveAvgPool2d(1) + flatten): f32 sum, scale by 1/HW.
    pooled = jnp.sum(feat.reshape(n, hw, c_out), axis=1) * (1.0 / hw)   # (N, C_out) f32

    # Linear head (bf16 operands / f32 accumulate), lane-dense padded output.
    logits = jnp.dot(pooled.astype(jnp.bfloat16), w2_ref[...],
                     preferred_element_type=jnp.float32) + b2_ref[...]  # (N, NC_PAD)
    out_ref[...] = logits


def extractor_head_forward(x_nchw, params):
    """x_nchw: (N, C_in, H, W) float32 -> logits (N, num_classes) float32."""
    w1, b1, w2, b2 = params["w1"], params["b1"], params["w2"], params["b2"]
    nc = params["num_classes"]
    n, c_in, h, w = x_nchw.shape
    hw = h * w
    k_pad, c_out = w1.shape
    nc_pad = w2.shape[1]

    # Glue: NCHW -> NHWC, zero pad=1, single bf16 cast (autocast analog; halves
    # the dominant HBM->VMEM stream). No im2col in HBM.
    x_nhwc = jnp.transpose(x_nchw, (0, 2, 3, 1))
    xp = jnp.pad(x_nhwc, ((0, 0), (1, 1), (1, 1), (0, 0))).astype(jnp.bfloat16)

    flops = 2 * n * hw * k_pad * c_out + 2 * n * c_out * nc_pad
    bytes_accessed = (xp.size * 2 + w1.size * 2 + w2.size * 2
                      + b1.size * 4 + b2.size * 4 + n * nc_pad * 4)

    out = pl.pallas_call(
        _extractor_head_kernel,
        out_shape=jax.ShapeDtypeStruct((n, nc_pad), jnp.float32),
        in_specs=[pl.BlockSpec(memory_space=pltpu.MemorySpace.VMEM)] * 5,
        out_specs=pl.BlockSpec(memory_space=pltpu.MemorySpace.VMEM),
        compiler_params=pltpu.CompilerParams(vmem_limit_bytes=32 * 1024 * 1024),
        cost_estimate=pl.CostEstimate(flops=flops, transcendentals=0,
                                      bytes_accessed=bytes_accessed),
    )(xp, w1, b1, w2, b2)

    return out[:, :nc]                                        # slice lane padding away


def make_params(key, c_in=4, c_out=32, num_classes=4):
    """Deterministic synthetic parameters; BN folded; weights padded + bf16."""
    k1, k2, k3, k4, k5, k6 = jax.random.split(key, 6)
    conv_w = 0.1 * jax.random.normal(k1, (c_out, c_in, 3, 3), jnp.float32)  # PyTorch layout
    gamma = 1.0 + 0.1 * jax.random.normal(k2, (c_out,), jnp.float32)
    beta = 0.1 * jax.random.normal(k3, (c_out,), jnp.float32)
    run_mean = 0.05 * jax.random.normal(k4, (c_out,), jnp.float32)
    run_var = jnp.abs(jax.random.normal(k5, (c_out,), jnp.float32)) + 0.5
    head_w = 0.1 * jax.random.normal(k6, (num_classes, c_out), jnp.float32)  # (out, in)
    head_b = 0.01 * jnp.arange(num_classes, dtype=jnp.float32)

    eps = 1e-5
    scale = gamma / jnp.sqrt(run_var + eps)                   # (c_out,)
    w_eff = conv_w * scale[:, None, None, None]               # fold BN scale
    b_eff = beta - run_mean * scale                           # fold BN shift

    k = 9 * c_in
    k_pad = _round_up(k, 128)                                 # lane-friendly contraction
    nc_pad = _round_up(num_classes, 128)                      # lane-dense output

    # im2col weight layout: (ky, kx, c_in, c_out) flattened to (9*c_in, c_out),
    # zero-padded to (k_pad, c_out); zero pads are numerically exact no-ops.
    w1 = jnp.transpose(w_eff, (2, 3, 1, 0)).reshape(k, c_out)
    w1 = jnp.pad(w1, ((0, k_pad - k), (0, 0))).astype(jnp.bfloat16)
    b1 = b_eff.reshape(1, c_out)                              # f32
    w2 = jnp.pad(head_w.T, ((0, 0), (0, nc_pad - num_classes))).astype(jnp.bfloat16)
    b2 = jnp.pad(head_b, (0, nc_pad - num_classes)).reshape(1, nc_pad)  # f32
    return {"w1": w1, "b1": b1, "w2": w2, "b2": b2, "num_classes": num_classes}


if __name__ == "__main__":
    key = jax.random.PRNGKey(0)
    k_param, k_x = jax.random.split(key)

    N, C_IN, H, W = 2, 4, 16, 16
    params = make_params(k_param, c_in=C_IN, c_out=32, num_classes=4)
    x = jax.random.normal(k_x, (N, C_IN, H, W), jnp.float32)  # NCHW like PyTorch

    logits = extractor_head_forward(x, params)
    jax.block_until_ready(logits)
    assert logits.shape == (N, 4)
    print("KERNEL_OK")
</pallas_src>

<mosaic_0001>
module attributes {stable_mosaic.version = 11 : i64} {
  func.func @_extractor_head_kernel(%arg0: memref<2x18x18x4xbf16, #tpu.memory_space<vmem>>, %arg1: memref<128x32xbf16, #tpu.memory_space<vmem>>, %arg2: memref<1x32xf32, #tpu.memory_space<vmem>>, %arg3: memref<32x128xbf16, #tpu.memory_space<vmem>>, %arg4: memref<1x128xf32, #tpu.memory_space<vmem>>, %arg5: memref<2x128xf32, #tpu.memory_space<vmem>>) attributes {dimension_semantics = [], scalar_prefetch = 0 : i64, scratch_operands = 0 : i64, tpu.core_type = #tpu.core_type<tc>} {
    %c0 = arith.constant 0 : index
    %c0_0 = arith.constant 0 : index
    %c0_1 = arith.constant 0 : index
    %c0_2 = arith.constant 0 : index
    %0 = vector.load %arg0[%c0, %c0_0, %c0_1, %c0_2] : memref<2x18x18x4xbf16, #tpu.memory_space<vmem>>, vector<2x16x16x4xbf16>
    %c0_3 = arith.constant 0 : index
    %c0_4 = arith.constant 0 : index
    %c1 = arith.constant 1 : index
    %c0_5 = arith.constant 0 : index
    %1 = vector.load %arg0[%c0_3, %c0_4, %c1, %c0_5] : memref<2x18x18x4xbf16, #tpu.memory_space<vmem>>, vector<2x16x16x4xbf16>
    %c0_6 = arith.constant 0 : index
    %c0_7 = arith.constant 0 : index
    %c2 = arith.constant 2 : index
    %c0_8 = arith.constant 0 : index
    %2 = vector.load %arg0[%c0_6, %c0_7, %c2, %c0_8] : memref<2x18x18x4xbf16, #tpu.memory_space<vmem>>, vector<2x16x16x4xbf16>
    %c0_9 = arith.constant 0 : index
    %c1_10 = arith.constant 1 : index
    %c0_11 = arith.constant 0 : index
    %c0_12 = arith.constant 0 : index
    %3 = vector.load %arg0[%c0_9, %c1_10, %c0_11, %c0_12] : memref<2x18x18x4xbf16, #tpu.memory_space<vmem>>, vector<2x16x16x4xbf16>
    %c0_13 = arith.constant 0 : index
    %c1_14 = arith.constant 1 : index
    %c1_15 = arith.constant 1 : index
    %c0_16 = arith.constant 0 : index
    %4 = vector.load %arg0[%c0_13, %c1_14, %c1_15, %c0_16] : memref<2x18x18x4xbf16, #tpu.memory_space<vmem>>, vector<2x16x16x4xbf16>
    %c0_17 = arith.constant 0 : index
    %c1_18 = arith.constant 1 : index
    %c2_19 = arith.constant 2 : index
    %c0_20 = arith.constant 0 : index
    %5 = vector.load %arg0[%c0_17, %c1_18, %c2_19, %c0_20] : memref<2x18x18x4xbf16, #tpu.memory_space<vmem>>, vector<2x16x16x4xbf16>
    %c0_21 = arith.constant 0 : index
    %c2_22 = arith.constant 2 : index
    %c0_23 = arith.constant 0 : index
    %c0_24 = arith.constant 0 : index
    %6 = vector.load %arg0[%c0_21, %c2_22, %c0_23, %c0_24] : memref<2x18x18x4xbf16, #tpu.memory_space<vmem>>, vector<2x16x16x4xbf16>
    %c0_25 = arith.constant 0 : index
    %c2_26 = arith.constant 2 : index
    %c1_27 = arith.constant 1 : index
    %c0_28 = arith.constant 0 : index
    %7 = vector.load %arg0[%c0_25, %c2_26, %c1_27, %c0_28] : memref<2x18x18x4xbf16, #tpu.memory_space<vmem>>, vector<2x16x16x4xbf16>
    %c0_29 = arith.constant 0 : index
    %c2_30 = arith.constant 2 : index
    %c2_31 = arith.constant 2 : index
    %c0_32 = arith.constant 0 : index
    %8 = vector.load %arg0[%c0_29, %c2_30, %c2_31, %c0_32] : memref<2x18x18x4xbf16, #tpu.memory_space<vmem>>, vector<2x16x16x4xbf16>
    %cst = arith.constant 0.000000e+00 : bf16
    %9 = vector.broadcast %cst : bf16 to vector<2x16x16x92xbf16>
    %10 = tpu.concatenate %0, %1, %2, %3, %4, %5, %6, %7, %8, %9 in 3 : vector<2x16x16x4xbf16>, vector<2x16x16x4xbf16>, vector<2x16x16x4xbf16>, vector<2x16x16x4xbf16>, vector<2x16x16x4xbf16>, vector<2x16x16x4xbf16>, vector<2x16x16x4xbf16>, vector<2x16x16x4xbf16>, vector<2x16x16x4xbf16>, vector<2x16x16x92xbf16> -> vector<2x16x16x128xbf16>
    %11 = vector.shape_cast %10 : vector<2x16x16x128xbf16> to vector<512x128xbf16>
    %c0_33 = arith.constant 0 : index
    %c0_34 = arith.constant 0 : index
    %12 = vector.load %arg1[%c0_33, %c0_34] : memref<128x32xbf16, #tpu.memory_space<vmem>>, vector<128x32xbf16>
    %cst_35 = arith.constant dense<0.000000e+00> : vector<512x32xf32>
    %13 = tpu.matmul %11, %12, %cst_35 {dimension_numbers = #tpu.dot_dimension_numbers<[1], [0], [0], [1], [0, 0, 1, 1], [], []>} : vector<512x128xbf16>, vector<128x32xbf16>, vector<512x32xf32> -> vector<512x32xf32>
    %c0_36 = arith.constant 0 : index
    %c0_37 = arith.constant 0 : index
    %14 = vector.load %arg2[%c0_36, %c0_37] : memref<1x32xf32, #tpu.memory_space<vmem>>, vector<1x32xf32>
    %15 = vector.broadcast %14 : vector<1x32xf32> to vector<512x32xf32>
    %16 = arith.addf %13, %15 : vector<512x32xf32>
    %cst_38 = arith.constant 0.000000e+00 : f32
    %17 = vector.broadcast %cst_38 : f32 to vector<512x32xf32>
    %18 = arith.maximumf %16, %17 : vector<512x32xf32>
    %19 = vector.shape_cast %18 : vector<512x32xf32> to vector<2x256x32xf32>
    %cst_39 = arith.constant dense<0.000000e+00> : vector<2x32xf32>
    %20 = vector.multi_reduction <add>, %19, %cst_39 [1] : vector<2x256x32xf32> to vector<2x32xf32>
    %cst_40 = arith.constant 3.906250e-03 : f32
    %21 = vector.broadcast %cst_40 : f32 to vector<2x32xf32>
    %22 = arith.mulf %20, %21 : vector<2x32xf32>
    %23 = arith.truncf %22 : vector<2x32xf32> to vector<2x32xbf16>
    %c0_41 = arith.constant 0 : index
    %c0_42 = arith.constant 0 : index
    %24 = vector.load %arg3[%c0_41, %c0_42] : memref<32x128xbf16, #tpu.memory_space<vmem>>, vector<32x128xbf16>
    %cst_43 = arith.constant dense<0.000000e+00> : vector<2x128xf32>
    %25 = tpu.matmul %23, %24, %cst_43 {dimension_numbers = #tpu.dot_dimension_numbers<[1], [0], [0], [1], [0, 0, 1, 1], [], []>} : vector<2x32xbf16>, vector<32x128xbf16>, vector<2x128xf32> -> vector<2x128xf32>
    %c0_44 = arith.constant 0 : index
    %c0_45 = arith.constant 0 : index
    %26 = vector.load %arg4[%c0_44, %c0_45] : memref<1x128xf32, #tpu.memory_space<vmem>>, vector<1x128xf32>
    %27 = vector.broadcast %26 : vector<1x128xf32> to vector<2x128xf32>
    %28 = arith.addf %25, %27 : vector<2x128xf32>
    %c0_46 = arith.constant 0 : index
    %c0_47 = arith.constant 0 : index
    %29 = vector.load %arg5[%c0_46, %c0_47] : memref<2x128xf32, #tpu.memory_space<vmem>>, vector<2x128xf32>
    tpu.vector_store %arg5[%c0_46, %c0_47], %28 {strides = array<i32>} : memref<2x128xf32, #tpu.memory_space<vmem>>, vector<2x128xf32>,
    return
  }
}

</mosaic_0001>

<bundles_post_ra>
// kernel: tpu_custom_call.1
= control target key start
LH: loop header
LB: loop body
LE: loop exit
PB: predicated region body
PF: predicated region fallthrough
CT: control target
= control target key end

     0   :  { %s5727_s28 = smov 12   ;;  %vm1209_vm0 = vcmask 1046528   ;;  %vm664_vm1 = vsmask.f32 7424  ;;  %s5728_s20 = smov 8   ;;  %vm3418_vm2 = vcmask 31744   ;;  %s9206_s0 = inlined_call_operand.vmem [shape: bf16[2,18,18,4], index: 0, kind: input, shape index: {}]   ;;  %s9207_s1 = inlined_call_operand.vmem [shape: bf16[128,32], index: 1, kind: input, shape index: {}]   ;;  %s9208_s2 = inlined_call_operand.vmem [shape: f32[1,32], index: 2, kind: input, shape index: {}]   ;;  %s9209_s3 = inlined_call_operand.vmem [shape: bf16[32,128], index: 3, kind: input, shape index: {}]   ;;  %s9210_s4 = inlined_call_operand.vmem [shape: f32[1,128], index: 4, kind: input, shape index: {}]   ;;  %s9211_s5 = inlined_call_operand.hbm [shape: f32[2,128], index: 5, kind: output, shape index: {}]  }
   0x1   :  { %v4658_v0 = vld [vmem:[%s9206_s0 + $0xc] sm:$0xf]  ;;  %v5774_v1 = vld [vmem:[%s9206_s0 + $0x10] sm:$0xf]  ;;  %v23_v3 = vld [vmem:[%s9206_s0 + $0x4] sm:$0xf] }
   0x2   :  { %v5777_v2 = vcombine.low %v4658_v0, %v5774_v1  ;;  %v118_v4 = vld [vmem:[%s9206_s0] sm:$0xe]  ;;  %v5407_v5 = vld [vmem:[%s9206_s0 + $0x8] ss:$0 sps:$4 sm:$0x11]   ;;  %s5729_s7 = smov 4  }
   0x3   :  { %v4978_v6 = vcombine.low %v118_v4, %v23_v3  ;;  %v22_v7 = vld [vmem:[%s9206_s0] sm:$0xf]  ;;  %v24_v8 = vld [vmem:[%s9206_s0 + $0xc] sm:$0xf]  ;;  %v1211_v9 = vrot.slane %v5407_v5, 1  ;;  %v673_v12 = vshll.u32 %v5407_v5, 16 }
   0x4   :  { %1530 = vrot.lane.b32.xlu0 %v5777_v2, %s5727_s28  ;;  %v5796_v10 = vcombine.low %v22_v7, %v23_v3  ;;  %v25_v11 = vld [vmem:[%s9206_s0 + $0x10] sm:$0xf]  ;;  %v119_v14 = vld [vmem:[%s9206_s0 + $0xc] sm:$0xe]  ;;  %v1693_v17 = vshll.u32 %v5777_v2, 16  ;;  %v1691_v47 = vshrl.u32 %v5777_v2, 16 }
   0x5   :  { %v1210_v13 = vrot.slane %v4978_v6, 1  ;;  %v5804_v15 = vcombine.low %v24_v8, %v25_v11  ;;  %v5411_v16 = vld [vmem:[%s9206_s0 + $0x14] ss:$0 sps:$4 sm:$0x11]   ;;  %v4979_v18 = vcombine.low %v119_v14, %v25_v11  ;;  %v4660_v21 = vld [vmem:[%s9206_s0 + $0x18] sm:$0xf] }
   0x6   :  { %v666_v19 = vshrl.u32 %v5796_v10, 16  ;;  %v668_v20 = vshll.u32 %v5796_v10, 16  ;;  %v1214_v23 = vrot.slane %v5411_v16, 1  ;;  %v675_v24 = vrot.slane %v673_v12, 1  ;;  %v4661_v25 = vld [vmem:[%s9206_s0 + $0x1c] sm:$0xf] }
   0x7   :  { %v1212_v22 = vsel %vm1209_vm0, %v1210_v13, %v1211_v9  ;;  %v4754_v26 = vld [vmem:[%s9206_s0 + $0xc] sm:$0xe]  ;;  %v1213_v27 = vrot.slane %v4979_v18, 1  ;;  %v4755_v29 = vld [vmem:[%s9206_s0 + $0x18] sm:$0xe]  ;;  %v5011_v30 = vcombine.low %v4660_v21, %v4661_v25  ;;  %v678_v31 = vshrl.u32 %v5804_v15, 16 }
   0x8   :  { %1306 = vrot.lane.b32.xlu1 %v1212_v22, %s5728_s20  ;;  %v670_v28 = vrot.slane %v668_v20, 1  ;;  %v680_v32 = vshll.u32 %v5804_v15, 16  ;;  %v685_v33 = vshll.u32 %v5411_v16, 16  ;;  %v5415_v34 = vld [vmem:[%s9206_s0 + $0x20] ss:$0 sps:$4 sm:$0x11]   ;;  %v5075_v40 = vcombine.low %v4755_v29, %v4661_v25 }
   0x9   :  { %v1215_v35 = vsel %vm1209_vm0, %v1213_v27, %v1214_v23  ;;  %v1705_v37 = vshll.u32 %v5011_v30, 16  ;;  %v1703_v38 = vshrl.u32 %v5011_v30, 16  ;;  %v4788_v39 = vld [vmem:[%s9206_s0 + $0x24] sm:$0xf]  ;;  %v1710_v43 = vshll.u32 %v5415_v34, 16  ;;  %v5471_v13 = vld [vmem:[%s9207_s1 + $0x38] sm:$0xff]  }
   0xa   :  { %v671_v36 = vor.u32 %v670_v28, %v666_v19  ;;  %v682_v41 = vrot.slane %v680_v32, 1  ;;  %v687_v42 = vrot.slane %v685_v33, 1  ;;  %v5416_v44 = vld [vmem:[%s9206_s0 + $0x14] ss:$0 sps:$4 sm:$0x11]   ;;  %v1695_v48 = vrot.slane %v1693_v17, 1  ;;  %5290 = vmatprep.subr.bf16.mxu0 %v5471_v13  ;;  %5378 = vmatprep.subr.bf16.mxu1 %v5471_v13 }
   0xb   :  { %v1707_v46 = vrot.slane %v1705_v37, 1  ;;  %v5844_v49 = vld [vmem:[%s9206_s0 + $0x28] sm:$0xf]  ;;  %v5074_v50 = vcombine.low %v4754_v26, %v5774_v1  ;;  %v1712_v52 = vrot.slane %v1710_v43, 1  ;;  %v1698_v53 = vshll.u32 %v5416_v44, 16  ;;  %s5730_s25 = smov 16   ;;  %5291 = vmatpush3.bf16.msra.mxu0 %v5471_v13  ;;  %5386 = vmatpush3.bf16.msra.mxu1 %v5471_v13 }
   0xc   :  { %1308 = vrot.lane.b32.xlu1 %v1215_v35, %s5728_s20  ;;  %v676_v45 = vsel %vm664_vm1, %v671_v36, %v675_v24  ;;  %v683_v51 = vor.u32 %v682_v41, %v678_v31  ;;  %v1696_v55 = vor.u32 %v1695_v48, %v1691_v47  ;;  %v4786_v56 = vld [vmem:[%s9206_s0 + $0x18] sm:$0xf]  ;;  %v4787_v57 = vld [vmem:[%s9206_s0 + $0x1c] sm:$0xf]  ;;  %v2237_v60 = vrot.slane %v5075_v40, 1  ;;  %v5476_v23 = vld [vmem:[%s9207_s1 + $0x30] sm:$0xff]  }
   0xd   :  { %1049 = vrot.lane.b32.xlu0 %v676_v45, %s5729_s7  ;;  %v1708_v54 = vor.u32 %v1707_v46, %v1703_v38  ;;  %v1700_v59 = vrot.slane %v1698_v53, 1  ;;  %v5107_v61 = vcombine.low %v4788_v39, %v5844_v49  ;;  %v2238_v62 = vrot.slane %v5415_v34, 1  ;;  %v5862_v0 = vld [vmem:[%s9206_s0 + $0x2c] ss:$0 sps:$4 sm:$0x11]   ;;  %5292 = vmatprep.subr.bf16.mxu0 %v5476_v23  ;;  %s5731_s13 = smov 20  }
   0xe   :  { %v688_v58 = vsel %vm664_vm1, %v683_v51, %v687_v42  ;;  %v5857_v63 = vcombine.low %v4786_v56, %v4787_v57  ;;  %v2234_v2 = vrot.slane %v5074_v50, 1  ;;  %v2235_v3 = vrot.slane %v5416_v44, 1  ;;  %v26_v5 = vld [vmem:[%s9206_s0 + $0x18] sm:$0xf]  ;;  %v5879_v9 = vld [vmem:[%s9206_s0 + $0x1c] sm:$0xf]  ;;  %5379 = vmatprep.subr.bf16.mxu1 %v5476_v23 }
   0xf   :  { %v1713_v1 = vsel %vm664_vm1, %v1708_v54, %v1712_v52  ;;  %v2729_v4 = vshll.u32 %v5107_v61, 16  ;;  %v1701_v6 = vsel %vm664_vm1, %v1696_v55, %v1700_v59  ;;  %v5874_v8 = vld [vmem:[%s9206_s0 + $0x20] ss:$0 sps:$4 sm:$0x11]   ;;  %v4882_v11 = vld [vmem:[%s9206_s0 + $0x18] sm:$0xe]  ;;  %v5885_v12 = vcombine.low %v26_v5, %v5879_v9  ;;  %5293 = vmatpush3.bf16.msra.mxu0 %v5476_v23  ;;  %5387 = vmatpush3.bf16.msra.mxu1 %v5476_v23 }
  0x10   :  { %1532 = vrot.lane.b32.xlu1 %v5011_v30, %s5727_s28  ;;  %v2717_v7 = vshll.u32 %v5857_v63, 16  ;;  %v2727_v14 = vshrl.u32 %v5107_v61, 16  ;;  %v2734_v17 = vshll.u32 %v5862_v0, 16  ;;  %v5895_v18 = vld [vmem:[%s9206_s0 + $0x20] ss:$0 sps:$4 sm:$0x11]   ;;  %v2239_v19 = vsel %vm1209_vm0, %v2237_v60, %v2238_v62 }
  0x11   :  { %1051 = vrot.lane.b32.xlu0 %v688_v58, %s5729_s7  ;;  %v2731_v16 = vrot.slane %v2729_v4, 1  ;;  %v2715_v20 = vshrl.u32 %v5857_v63, 16  ;;  %v692_v21 = vshll.u32 %v5885_v12, 16  ;;  %v28_v22 = vld [vmem:[%s9206_s0 + $0x24] sm:$0xf]  ;;  %v2236_v24 = vsel %vm1209_vm0, %v2234_v2, %v2235_v3  ;;  %v5479_v30 = vld [vmem:[%s9207_s1 + $0x28] sm:$0xff]  }
  0x12   :  { %v2719_v25 = vrot.slane %v2717_v7, 1  ;;  %v2722_v26 = vshll.u32 %v5874_v8, 16  ;;  %v5912_v27 = vld [vmem:[%s9206_s0 + $0x28] sm:$0xf]  ;;  %v5170_v28 = vcombine.low %v4882_v11, %v4787_v57  ;;  %v2736_v32 = vrot.slane %v2734_v17, 1  ;;  %5294 = vmatprep.subr.bf16.mxu0 %v5479_v30  ;;  %v5482_v42 = vld [vmem:[%s9207_s1 + $0x20] sm:$0xff]   ;;  %5380 = vmatprep.subr.bf16.mxu1 %v5479_v30 }
  0x13   :  { %v5915_v29 = vcombine.low %v28_v22, %v5912_v27  ;;  %v2732_v31 = vor.u32 %v2731_v16, %v2727_v14  ;;  %v697_v33 = vshll.u32 %v5895_v18, 16  ;;  %v690_v34 = vshrl.u32 %v5885_v12, 16  ;;  %v5927_v36 = vld [vmem:[%s9206_s0 + $0x2c] ss:$0 sps:$4 sm:$0x11]   ;;  %s5732_s21 = smov 24   ;;  %5295 = vmatpush3.bf16.msra.mxu0 %v5479_v30  ;;  %5388 = vmatpush3.bf16.msra.mxu1 %v5479_v30 }
  0x14   :  { %2076 = vrot.lane.b32.xlu1 %v1713_v1, %s5730_s25  ;;  %v694_v35 = vrot.slane %v692_v21, 1  ;;  %v2720_v38 = vor.u32 %v2719_v25, %v2715_v20  ;;  %v2724_v39 = vrot.slane %v2722_v26, 1  ;;  %v4883_v40 = vld [vmem:[%s9206_s0 + $0x24] sm:$0xe]  ;;  %v3258_v41 = vrot.slane %v5170_v28, 1  ;;  %5296 = vmatprep.subr.bf16.mxu0 %v5482_v42  ;;  %v5485_v58 = vld [vmem:[%s9207_s1 + $0x18] sm:$0xff]  }
  0x15   :  { %2074 = vrot.lane.b32.xlu0 %v1701_v6, %s5730_s25  ;;  %v704_v37 = vshll.u32 %v5915_v29, 16  ;;  %v2737_v43 = vsel %vm664_vm1, %v2732_v31, %v2736_v32  ;;  %v699_v44 = vrot.slane %v697_v33, 1  ;;  %v3259_v45 = vrot.slane %v5874_v8, 1  ;;  %v121_v46 = vld [vmem:[%s9206_s0 + $0x24] sm:$0xe]  ;;  %s5733_s15 = smov 28   ;;  %5381 = vmatprep.subr.bf16.mxu1 %v5482_v42 }
  0x16   :  { %v695_v47 = vor.u32 %v694_v35, %v690_v34  ;;  %v702_v48 = vshrl.u32 %v5915_v29, 16  ;;  %v709_v51 = vshll.u32 %v5927_v36, 16  ;;  %v120_v52 = vld [vmem:[%s9206_s0 + $0x18] sm:$0xe]  ;;  %v5171_v53 = vcombine.low %v4883_v40, %v5844_v49  ;;  %v4664_v55 = vld [vmem:[%s9206_s0 + $0x30] sm:$0xf] }
  0x17   :  { %v706_v50 = vrot.slane %v704_v37, 1  ;;  %v2725_v54 = vsel %vm664_vm1, %v2720_v38, %v2724_v39  ;;  %v5957_v56 = vld [vmem:[%s9206_s0 + $0x34] sm:$0xf]  ;;  %v4662_v57 = vld [vmem:[%s9206_s0 + $0x24] sm:$0xf]  ;;  %v3260_v59 = vsel %vm1209_vm0, %v3258_v41, %v3259_v45  ;;  %v4981_v60 = vcombine.low %v121_v46, %v5912_v27  ;;  %5297 = vmatpush3.bf16.msra.mxu0 %v5482_v42  ;;  %5389 = vmatpush3.bf16.msra.mxu1 %v5482_v42  ;;  %s5734_s18 = smov 32  }
  0x18   :  { %2332 = vrot.lane.b32.xlu1 %v2239_v19, %s5731_s13  ;;  %v5965_v49 = vld [vmem:[%s9206_s0 + $0x28] sm:$0xf]  ;;  %v5976_v1 = vcombine.low %v4664_v55, %v5957_v56  ;;  %v3261_v2 = vrot.slane %v5171_v53, 1  ;;  %v3262_v3 = vrot.slane %v5862_v0, 1  ;;  %v4980_v4 = vcombine.low %v120_v52, %v5879_v9  ;;  %5298 = vmatprep.subr.bf16.mxu0 %v5485_v58  ;;  %v5488_v6 = vld [vmem:[%s9207_s1 + $0x10] sm:$0xff]   ;;  %v5496_v35 = vld [vmem:[%s9207_s1] sm:$0xff]  }
  0x19   :  { %2330 = vrot.lane.b32.xlu0 %v2236_v24, %s5731_s13  ;;  %v707_v62 = vor.u32 %v706_v50, %v702_v48  ;;  %v5981_v5 = vcombine.low %v4662_v57, %v5965_v49  ;;  %v1219_v0 = vrot.slane %v4981_v60, 1  ;;  %v1220_v8 = vrot.slane %v5927_v36, 1  ;;  %v5994_v11 = vld [vmem:[%s9206_s0 + $0x38] ss:$0 sps:$4 sm:$0x11]   ;;  %5382 = vmatprep.subr.bf16.mxu1 %v5485_v58  ;;  %v5493_v20 = vld [vmem:[%s9207_s1 + $0x8] sm:$0xff]  }
  0x1a   :  { %v1729_v9 = vshll.u32 %v5976_v1, 16  ;;  %v3263_v13 = vsel %vm1209_vm0, %v3261_v2, %v3262_v3  ;;  %v1216_v14 = vrot.slane %v4980_v4, 1  ;;  %v1217_v16 = vrot.slane %v5895_v18, 1  ;;  %v6002_v19 = vld [vmem:[%s9206_s0 + $0x2c] ss:$0 sps:$4 sm:$0x11]  }
  0x1b   :  { %v1717_v17 = vshll.u32 %v5981_v5, 16  ;;  %5299 = vmatpush3.bf16.msra.mxu0 %v5485_v58  ;;  %v4757_v21 = vld [vmem:[%s9206_s0 + $0x30] sm:$0xe]  ;;  %v4756_v18 = vld [vmem:[%s9206_s0 + $0x24] sm:$0xe]  ;;  %v1727_v22 = vshrl.u32 %v5976_v1, 16  ;;  %5390 = vmatpush3.bf16.msra.mxu1 %v5485_v58  ;;  %v1221_v23 = vsel %vm1209_vm0, %v1219_v0, %v1220_v8 }
  0x1c   :  { %2556 = vrot.lane.b32.xlu1 %v5107_v61, %s5732_s21  ;;  %v700_v61 = vsel %vm664_vm1, %v695_v47, %v699_v44  ;;  %5300 = vmatprep.subr.bf16.mxu0 %v5488_v6  ;;  %v1731_v24 = vrot.slane %v1729_v9, 1  ;;  %v1734_v25 = vshll.u32 %v5994_v11, 16  ;;  %v1715_v26 = vshrl.u32 %v5981_v5, 16  ;;  %v4792_v27 = vld [vmem:[%s9206_s0 + $0x3c] sm:$0xf] }
  0x1d   :  { %2554 = vrot.lane.b32.xlu0 %v5857_v63, %s5732_s21  ;;  %v711_v63 = vrot.slane %v709_v51, 1  ;;  %5383 = vmatprep.subr.bf16.mxu1 %v5488_v6  ;;  %v1218_v28 = vsel %vm1209_vm0, %v1216_v14, %v1217_v16  ;;  %v1719_v30 = vrot.slane %v1717_v17, 1  ;;  %v1722_v31 = vshll.u32 %v6002_v19, 16  ;;  %v6027_v32 = vld [vmem:[%s9206_s0 + $0x40] sm:$0xf] }
  0x1e   :  { %v4790_v33 = vld [vmem:[%s9206_s0 + $0x30] sm:$0xf]  ;;  %v6035_v34 = vld [vmem:[%s9206_s0 + $0x34] sm:$0xf]  ;;  %v5077_v36 = vcombine.low %v4757_v21, %v5957_v56  ;;  %v5076_v37 = vcombine.low %v4756_v18, %v5965_v49  ;;  %v1732_v38 = vor.u32 %v1731_v24, %v1727_v22  ;;  %v1736_v39 = vrot.slane %v1734_v25, 1 }
  0x1f   :  { %v712_v7 = vsel %vm664_vm1, %v707_v62, %v711_v63  ;;  %5301 = vmatpush3.bf16.msra.mxu0 %v5488_v6  ;;  %5391 = vmatpush3.bf16.msra.mxu1 %v5488_v6  ;;  %v5109_v40 = vcombine.low %v4792_v27, %v6027_v32  ;;  %v1720_v41 = vor.u32 %v1719_v30, %v1715_v26  ;;  %v1724_v42 = vrot.slane %v1722_v31, 1  ;;  %v30_v44 = vld [vmem:[%s9206_s0 + $0x30] sm:$0xf]  ;;  %v6052_v45 = vld [vmem:[%s9206_s0 + $0x34] sm:$0xf] }
  0x20   :  { %3100 = vrot.lane.b32.xlu1 %v2737_v43, %s5733_s15  ;;  %5302 = vmatprep.subr.bf16.mxu0 %v5493_v20  ;;  %v5108_v43 = vcombine.low %v4790_v33, %v6035_v34  ;;  %v6057_v46 = vld [vmem:[%s9206_s0 + $0x44] ss:$0 sps:$4 sm:$0x11]   ;;  %v2243_v47 = vrot.slane %v5077_v36, 1  ;;  %v2244_v48 = vrot.slane %v5994_v11, 1  ;;  %v1737_v50 = vsel %vm664_vm1, %v1732_v38, %v1736_v39 }
  0x21   :  { %3098 = vrot.lane.b32.xlu0 %v2725_v54, %s5733_s15  ;;  %5384 = vmatprep.subr.bf16.mxu1 %v5493_v20  ;;  %v2240_v51 = vrot.slane %v5076_v37, 1  ;;  %v2753_v52 = vshll.u32 %v5109_v40, 16  ;;  %v6068_v53 = vld [vmem:[%s9206_s0 + $0x38] ss:$0 sps:$4 sm:$0x11]   ;;  %v6071_v54 = vcombine.low %v30_v44, %v6052_v45  ;;  %v1725_v55 = vsel %vm664_vm1, %v1720_v41, %v1724_v42 }
  0x22   :  { %v2241_v56 = vrot.slane %v6002_v19, 1  ;;  %v2741_v57 = vshll.u32 %v5108_v43, 16  ;;  %v32_v49 = vld [vmem:[%s9206_s0 + $0x3c] sm:$0xf]  ;;  %v6081_v58 = vld [vmem:[%s9206_s0 + $0x40] sm:$0xf] }
  0x23   :  { %5303 = vmatpush3.bf16.msra.mxu0 %v5493_v20  ;;  %5392 = vmatpush3.bf16.msra.mxu1 %v5493_v20  ;;  %v2758_v60 = vshll.u32 %v6057_v46, 16  ;;  %v2751_v62 = vshrl.u32 %v5109_v40, 16  ;;  %v2755_v63 = vrot.slane %v2753_v52, 1  ;;  %v6094_v2 = vcombine.low %v32_v49, %v6081_v58  ;;  %v5444_v14 = vld [vmem:[%s9206_s0 + $0x44] ss:$0 sps:$4 sm:$0x11]  }
  0x24   :  { %1053 = vrot.lane.b32.xlu1 %v700_v61, %s5729_s7  ;;  %5304 = vmatprep.subr.bf16.mxu0 %v5496_v35  ;;  %v6089_v61 = vld [vmem:[%s9206_s0 + $0x38] ss:$0 sps:$4 sm:$0x11]   ;;  %v2242_v3 = vsel %vm1209_vm0, %v2240_v51, %v2241_v56  ;;  %v2739_v4 = vshrl.u32 %v5108_v43, 16  ;;  %v2746_v6 = vshll.u32 %v6068_v53, 16  ;;  %v714_v11 = vshrl.u32 %v6071_v54, 16 }
  0x25   :  { %3354 = vrot.lane.b32.xlu0 %v3260_v59, %s5734_s18  ;;  %5385 = vmatprep.subr.bf16.mxu1 %v5496_v35  ;;  %v2245_v59 = vsel %vm1209_vm0, %v2243_v47, %v2244_v48  ;;  %v2760_v0 = vrot.slane %v2758_v60, 1  ;;  %v721_v8 = vshll.u32 %v6089_v61, 16  ;;  %v2756_v9 = vor.u32 %v2755_v63, %v2751_v62  ;;  %v4885_v21 = vld [vmem:[%s9206_s0 + $0x3c] sm:$0xe]  ;;  %v4668_v24 = vld [vmem:[%s9206_s0 + $0x48] sm:$0xf] }
  0x26   :  { %v728_v16 = vshll.u32 %v6094_v2, 16  ;;  %v2748_v20 = vrot.slane %v2746_v6, 1  ;;  %v726_v22 = vshrl.u32 %v6094_v2, 16  ;;  %v4669_v30 = vld [vmem:[%s9206_s0 + $0x4c] sm:$0xf]  ;;  %v5173_v31 = vcombine.low %v4885_v21, %v6027_v32 }
  0x27   :  { %5305 = vmatpush3.bf16.msra.mxu0 %v5496_v35  ;;  %5393 = vmatpush3.bf16.msra.mxu1 %v5496_v35  ;;  %v723_v18 = vrot.slane %v721_v8, 1  ;;  %v2761_v25 = vsel %vm664_vm1, %v2756_v9, %v2760_v0  ;;  %v3265_v35 = vrot.slane %v6068_v53, 1  ;;  %v4666_v36 = vld [vmem:[%s9206_s0 + $0x3c] sm:$0xf]  ;;  %v4667_v37 = vld [vmem:[%s9206_s0 + $0x40] sm:$0xf]  ;;  %v5015_v39 = vcombine.low %v4668_v24, %v4669_v30 }
  0x28   :  { %1055 = vrot.lane.b32.xlu1 %v712_v7, %s5729_s7  ;;  %v4884_v7 = vld [vmem:[%s9206_s0 + $0x30] sm:$0xe]  ;;  %v730_v27 = vrot.slane %v728_v16, 1  ;;  %v3267_v47 = vrot.slane %v5173_v31, 1  ;;  %v3268_v48 = vrot.slane %v6057_v46, 1  ;;  %v1226_v56 = vrot.slane %v5444_v14, 1 }
  0x29   :  { %3356 = vrot.lane.b32.xlu0 %v3263_v13, %s5734_s18  ;;  %v5172_v17 = vcombine.low %v4884_v7, %v6035_v34  ;;  %v122_v38 = vld [vmem:[%s9206_s0 + $0x30] sm:$0xe]  ;;  %v1753_v51 = vshll.u32 %v5015_v39, 16  ;;  %v5451_v52 = vld [vmem:[%s9206_s0 + $0x50] ss:$0 sps:$4 sm:$0x11]  }
  0x2a   :  { %v731_v41 = vor.u32 %v730_v27, %v726_v22  ;;  %v5452_v46 = vld [vmem:[%s9206_s0 + $0x44] ss:$0 sps:$4 sm:$0x11]   ;;  %v4758_v60 = vld [vmem:[%s9206_s0 + $0x3c] sm:$0xe]  ;;  %v1751_v62 = vshrl.u32 %v5015_v39, 16 }
  0x2b   :  { %v3264_v34 = vrot.slane %v5172_v17, 1  ;;  %v1755_v63 = vrot.slane %v1753_v51, 1  ;;  %v1746_v6 = vshll.u32 %v5452_v46, 16  ;;  %v6171_v7 = vld [vmem:[%s9206_s0 + $0x58] sm:$0xf]  ;;  %v2250_v24 = vrot.slane %v5451_v52, 1 }
  0x2c   :  { %1312 = vrot.lane.b32.xlu1 %v1221_v23, %s5728_s20  ;;  %v123_v23 = vld [vmem:[%s9206_s0 + $0x3c] sm:$0xe]  ;;  %v4794_v0 = vld [vmem:[%s9206_s0 + $0x48] sm:$0xf]  ;;  %v4795_v9 = vld [vmem:[%s9206_s0 + $0x4c] sm:$0xf] }
  0x2d   :  { %1310 = vrot.lane.b32.xlu0 %v1218_v28, %s5728_s20  ;;  %v733_v28 = vshll.u32 %v5444_v14, 16  ;;  %v4983_v32 = vcombine.low %v123_v23, %v6081_v58  ;;  %v3266_v44 = vsel %vm1209_vm0, %v3264_v34, %v3265_v35  ;;  %v1223_v58 = vrot.slane %v6089_v61, 1  ;;  %v6189_v22 = vld [vmem:[%s9206_s0 + $0x4c] sm:$0xf] }
  0x2e   :  { %v1756_v16 = vor.u32 %v1755_v63, %v1751_v62  ;;  %vm3483_vm3 = vcmask 64512   ;;  %vm3548_vm4 = vcmask 97280   ;;  %vm3613_vm5 = vcmask 130048  }
  0x2f   :  { %v735_v42 = vrot.slane %v733_v28, 1  ;;  %v6195_v28 = vld [vmem:[%s9206_s0 + $0x5c] ss:$0 sps:$4 sm:$0x11]   ;;  %vm3678_vm6 = vcmask 162816   ;;  %vm3743_vm7 = vcmask 195584  }
  0x30   :  { %1536 = vrot.lane.b32.xlu1 %v5976_v1, %s5727_s28  ;;  %v716_v1 = vshll.u32 %v6071_v54, 16  ;;  %vm3808_vm8 = vcmask 228352   ;;  %vm3873_vm9 = vcmask 261120   ;;  %vm3938_vm10 = vcmask 293888  }
  0x31   :  { %1534 = vrot.lane.b32.xlu0 %v5981_v5, %s5727_s28  ;;  %v2743_v5 = vrot.slane %v2741_v57, 1  ;;  %v736_v53 = vsel %vm664_vm1, %v731_v41, %v735_v42  ;;  %v6220_v41 = vld [vmem:[%s9206_s0 + $0x50] ss:$0 sps:$4 sm:$0x11]  }
  0x32   :  { %v718_v13 = vrot.slane %v716_v1, 1  ;;  %v1758_v1 = vshll.u32 %v5451_v52, 16 }
  0x33   :  { %v2744_v19 = vor.u32 %v2743_v5, %v2739_v4  ;;  %v4796_v4 = vld [vmem:[%s9206_s0 + $0x54] sm:$0xf] }
  0x34   :  { %2080 = vrot.lane.b32.xlu1 %v1737_v50, %s5730_s25  ;;  %v719_v26 = vor.u32 %v718_v13, %v714_v11  ;;  %v4982_v50 = vcombine.low %v122_v38, %v6052_v45  ;;  %v3269_v45 = vsel %vm1209_vm0, %v3267_v47, %v3268_v48  ;;  %v5078_v13 = vcombine.low %v4758_v60, %v4667_v37  ;;  %v4886_v38 = vld [vmem:[%s9206_s0 + $0x48] sm:$0xe] }
  0x35   :  { %2078 = vrot.lane.b32.xlu0 %v1725_v55, %s5730_s25  ;;  %v2749_v33 = vsel %vm664_vm1, %v2744_v19, %v2748_v20  ;;  %v1225_v55 = vrot.slane %v4983_v32, 1  ;;  %v5111_v14 = vcombine.low %v4796_v4, %v6171_v7  ;;  %v1760_v17 = vrot.slane %v1758_v1, 1  ;;  %v125_v4 = vld [vmem:[%s9206_s0 + $0x54] sm:$0xe] }
  0x36   :  { %v1222_v49 = vrot.slane %v4982_v50, 1  ;;  %v1748_v19 = vrot.slane %v1746_v6, 1  ;;  %v5110_v20 = vcombine.low %v4794_v0, %v4795_v9  ;;  %v5174_v52 = vcombine.low %v4886_v38, %v4795_v9 }
  0x37   :  { %v1227_v61 = vsel %vm1209_vm0, %v1225_v55, %v1226_v56  ;;  %v2777_v27 = vshll.u32 %v5111_v14, 16  ;;  %v2775_v32 = vshrl.u32 %v5111_v14, 16  ;;  %v745_v56 = vshll.u32 %v6220_v41, 16 }
  0x38   :  { %2336 = vrot.lane.b32.xlu1 %v2245_v59, %s5731_s13  ;;  %v4759_v59 = vld [vmem:[%s9206_s0 + $0x48] sm:$0xe]  ;;  %v1224_v8 = vsel %vm1209_vm0, %v1222_v49, %v1223_v58  ;;  %v2765_v31 = vshll.u32 %v5110_v20, 16  ;;  %v2763_v48 = vshrl.u32 %v5110_v20, 16  ;;  %v4887_v58 = vld [vmem:[%s9206_s0 + $0x54] sm:$0xe] }
  0x39   :  { %2334 = vrot.lane.b32.xlu0 %v2242_v3, %s5731_s13  ;;  %v5079_v11 = vcombine.low %v4759_v59, %v4669_v30  ;;  %v1761_v30 = vsel %vm664_vm1, %v1756_v16, %v1760_v17  ;;  %v3270_v62 = vrot.slane %v5174_v52, 1  ;;  %v747_v1 = vrot.slane %v745_v56, 1  ;;  %v4670_v16 = vld [vmem:[%s9206_s0 + $0x54] sm:$0xf]  ;;  %v4671_v17 = vld [vmem:[%s9206_s0 + $0x58] sm:$0xf] }
  0x3a   :  { %v2767_v50 = vrot.slane %v2765_v31, 1  ;;  %v5175_v9 = vcombine.low %v4887_v58, %v6171_v7  ;;  %v4798_v56 = vld [vmem:[%s9206_s0 + $0x60] sm:$0xf] }
  0x3b   :  { %v2249_v23 = vrot.slane %v5079_v11, 1 }
  0x3c   :  { %2560 = vrot.lane.b32.xlu1 %v5109_v40, %s5732_s21  ;;  %v724_v40 = vsel %vm664_vm1, %v719_v26, %v723_v18  ;;  %v34_v18 = vld [vmem:[%s9206_s0 + $0x48] sm:$0xf]  ;;  %v2247_v26 = vrot.slane %v5452_v46, 1  ;;  %v2768_v59 = vor.u32 %v2767_v50, %v2763_v48  ;;  %v4800_v50 = vld [vmem:[%s9206_s0 + $0x6c] sm:$0xf] }
  0x3d   :  { %2558 = vrot.lane.b32.xlu0 %v5108_v43, %s5732_s21  ;;  %v5014_v43 = vcombine.low %v4666_v36, %v4667_v37  ;;  %v6203_v34 = vcombine.low %v34_v18, %v6189_v22  ;;  %v36_v36 = vld [vmem:[%s9206_s0 + $0x54] sm:$0xf]  ;;  %v37_v37 = vld [vmem:[%s9206_s0 + $0x58] sm:$0xf]  ;;  %v2251_v42 = vsel %vm1209_vm0, %v2249_v23, %v2250_v24  ;;  %v3273_v24 = vrot.slane %v5175_v9, 1 }
  0x3e   :  { %v6329_v9 = vld [vmem:[%s9206_s0 + $0x68] ss:$0 sps:$4 sm:$0x11]  }
  0x3f   :  { %v1741_v57 = vshll.u32 %v5014_v43, 16  ;;  %v1739_v3 = vshrl.u32 %v5014_v43, 16 }
  0x40   :  { %3104 = vrot.lane.b32.xlu1 %v2761_v25, %s5733_s15  ;;  %v2246_v25 = vrot.slane %v5078_v13, 1  ;;  %v4672_v13 = vld [vmem:[%s9206_s0 + $0x60] sm:$0xf] }
  0x41   :  { %3102 = vrot.lane.b32.xlu0 %v2749_v33, %s5733_s15  ;;  %v1743_v5 = vrot.slane %v1741_v57, 1  ;;  %v5458_v33 = vld [vmem:[%s9206_s0 + $0x50] ss:$0 sps:$4 sm:$0x11]   ;;  %v738_v57 = vshrl.u32 %v6203_v34, 16 }
  0x42   :  { %v2248_v47 = vsel %vm1209_vm0, %v2246_v25, %v2247_v26  ;;  %v2770_v51 = vshll.u32 %v5458_v33, 16  ;;  %v3274_v25 = vrot.slane %v6195_v28, 1 }
  0x43   :  { %v1744_v21 = vor.u32 %v1743_v5, %v1739_v3  ;;  %v3271_v3 = vrot.slane %v5458_v33, 1 }
  0x44   :  { %1057 = vrot.lane.b32.xlu1 %v724_v40, %s5729_s7  ;;  %v2782_v40 = vshll.u32 %v6195_v28, 16  ;;  %v2772_v60 = vrot.slane %v2770_v51, 1  ;;  %v1229_v28 = vrot.slane %v6220_v41, 1 }
  0x45   :  { %3358 = vrot.lane.b32.xlu0 %v3266_v44, %s5734_s18  ;;  %v1749_v35 = vsel %vm664_vm1, %v1744_v21, %v1748_v19  ;;  %v6225_v44 = vcombine.low %v36_v36, %v37_v37  ;;  %v3272_v7 = vsel %vm1209_vm0, %v3270_v62, %v3271_v3  ;;  %v4985_v19 = vcombine.low %v125_v4, %v37_v37  ;;  %v5469_v36 = vld [vmem:[%s9206_s0 + $0x68] ss:$0 sps:$4 sm:$0x11]   ;;  %v6316_v3 = vld [vmem:[%s9206_s0 + $0x64] sm:$0xf] }
  0x46   :  { %v2784_v55 = vrot.slane %v2782_v40, 1  ;;  %v2773_v11 = vsel %vm664_vm1, %v2768_v59, %v2772_v60  ;;  %v3275_v37 = vsel %vm1209_vm0, %v3273_v24, %v3274_v25  ;;  %v4761_v40 = vld [vmem:[%s9206_s0 + $0x60] sm:$0xe]  ;;  %v6321_v4 = vld [vmem:[%s9206_s0 + $0x74] ss:$0 sps:$4 sm:$0x11]  }
  0x47   :  { %v752_v49 = vshll.u32 %v6225_v44, 16  ;;  %v750_v5 = vshrl.u32 %v6225_v44, 16 }
  0x48   :  { %1059 = vrot.lane.b32.xlu1 %v736_v53, %s5729_s7 }
  0x49   :  { %3360 = vrot.lane.b32.xlu0 %v3269_v45, %s5734_s18  ;;  %v5462_v45 = vld [vmem:[%s9206_s0 + $0x5c] ss:$0 sps:$4 sm:$0x11]   ;;  %v754_v6 = vrot.slane %v752_v49, 1 }
  0x4a   :  { %v757_v0 = vshll.u32 %v5462_v45, 16  ;;  %v1232_v31 = vrot.slane %v5462_v45, 1 }
  0x4b   :  { %v755_v21 = vor.u32 %v754_v6, %v750_v5  ;;  %v2256_v5 = vrot.slane %v5469_v36, 1 }
  0x4c   :  { %1316 = vrot.lane.b32.xlu1 %v1227_v61, %s5728_s20  ;;  %v759_v18 = vrot.slane %v757_v0, 1 }
  0x4d   :  { %1314 = vrot.lane.b32.xlu0 %v1224_v8, %s5728_s20  ;;  %v124_v8 = vld [vmem:[%s9206_s0 + $0x48] sm:$0xe] }
  0x4e   :  { %v4984_v26 = vcombine.low %v124_v8, %v6189_v22  ;;  %v760_v33 = vsel %vm664_vm1, %v755_v21, %v759_v18  ;;  %v6349_v21 = vld [vmem:[%s9206_s0 + $0x68] ss:$0 sps:$4 sm:$0x11]  }
  0x50   :  { %1540 = vrot.lane.b32.xlu1 %v5015_v39, %s5727_s28  ;;  %v2779_v39 = vrot.slane %v2777_v27, 1  ;;  %v5016_v27 = vcombine.low %v4670_v16, %v4671_v17  ;;  %v1228_v38 = vrot.slane %v4984_v26, 1 }
  0x51   :  { %1538 = vrot.lane.b32.xlu0 %v5014_v43, %s5727_s28  ;;  %v740_v43 = vshll.u32 %v6203_v34, 16 }
  0x52   :  { %v2780_v53 = vor.u32 %v2779_v39, %v2775_v32  ;;  %v1765_v22 = vshll.u32 %v5016_v27, 16  ;;  %v5470_v32 = vld [vmem:[%s9206_s0 + $0x5c] ss:$0 sps:$4 sm:$0x11]   ;;  %v1763_v48 = vshrl.u32 %v5016_v27, 16  ;;  %v1230_v51 = vsel %vm1209_vm0, %v1228_v38, %v1229_v28 }
  0x53   :  { %v742_v46 = vrot.slane %v740_v43, 1 }
  0x54   :  { %2084 = vrot.lane.b32.xlu1 %v1761_v30, %s5730_s25  ;;  %v2785_v63 = vsel %vm664_vm1, %v2780_v53, %v2784_v55  ;;  %v1231_v30 = vrot.slane %v4985_v19, 1  ;;  %v1767_v52 = vrot.slane %v1765_v22, 1  ;;  %v1770_v53 = vshll.u32 %v5470_v32, 16  ;;  %v6296_v55 = vld [vmem:[%s9206_s0 + $0x70] sm:$0xf] }
  0x55   :  { %2082 = vrot.lane.b32.xlu0 %v1749_v35, %s5730_s25  ;;  %v743_v61 = vor.u32 %v742_v46, %v738_v57  ;;  %v6304_v57 = vld [vmem:[%s9206_s0 + $0x64] sm:$0xf]  ;;  %v5113_v59 = vcombine.low %v4800_v50, %v6296_v55 }
  0x56   :  { %v1233_v39 = vsel %vm1209_vm0, %v1231_v30, %v1232_v31  ;;  %v1768_v60 = vor.u32 %v1767_v52, %v1763_v48  ;;  %v1772_v62 = vrot.slane %v1770_v53, 1  ;;  %v2794_v31 = vshll.u32 %v6329_v9, 16 }
  0x57   :  { %v2801_v8 = vshll.u32 %v5113_v59, 16  ;;  %v2799_v18 = vshrl.u32 %v5113_v59, 16 }
  0x58   :  { %2340 = vrot.lane.b32.xlu1 %v2251_v42, %s5731_s13  ;;  %v4760_v42 = vld [vmem:[%s9206_s0 + $0x54] sm:$0xe] }
  0x59   :  { %2338 = vrot.lane.b32.xlu0 %v2248_v47, %s5731_s13  ;;  %v1782_v47 = vshll.u32 %v5469_v36, 16  ;;  %v5080_v45 = vcombine.low %v4760_v42, %v4671_v17  ;;  %v40_v17 = vld [vmem:[%s9206_s0 + $0x6c] sm:$0xf] }
  0x5b   :  { %v1784_v58 = vrot.slane %v1782_v47, 1  ;;  %v2252_v0 = vrot.slane %v5080_v45, 1  ;;  %v2796_v47 = vrot.slane %v2794_v31, 1 }
  0x5c   :  { %2564 = vrot.lane.b32.xlu1 %v5111_v14, %s5732_s21  ;;  %v4673_v14 = vld [vmem:[%s9206_s0 + $0x64] sm:$0xf] }
  0x5d   :  { %2562 = vrot.lane.b32.xlu0 %v5110_v20, %s5732_s21  ;;  %v748_v20 = vsel %vm664_vm1, %v743_v61, %v747_v1  ;;  %v5017_v23 = vcombine.low %v4672_v13, %v4673_v14  ;;  %v5081_v46 = vcombine.low %v4761_v40, %v4673_v14  ;;  %v38_v1 = vld [vmem:[%s9206_s0 + $0x60] sm:$0xf]  ;;  %v1773_v13 = vsel %vm664_vm1, %v1768_v60, %v1772_v62  ;;  %v6398_v60 = vld [vmem:[%s9206_s0 + $0x7c] sm:$0xf] }
  0x5e   :  { %v2253_v14 = vrot.slane %v5470_v32, 1 }
  0x5f   :  { %v1777_v35 = vshll.u32 %v5017_v23, 16  ;;  %v1775_v41 = vshrl.u32 %v5017_v23, 16  ;;  %v2255_v61 = vrot.slane %v5081_v46, 1 }
  0x60   :  { %3108 = vrot.lane.b32.xlu1 %v2785_v63, %s5733_s15  ;;  %v5112_v63 = vcombine.low %v4798_v56, %v6304_v57  ;;  %v2254_v26 = vsel %vm1209_vm0, %v2252_v0, %v2253_v14 }
  0x61   :  { %3106 = vrot.lane.b32.xlu0 %v2773_v11, %s5733_s15  ;;  %v1779_v43 = vrot.slane %v1777_v35, 1  ;;  %v6332_v11 = vcombine.low %v38_v1, %v6316_v3  ;;  %v2257_v19 = vsel %vm1209_vm0, %v2255_v61, %v2256_v5  ;;  %v4889_v35 = vld [vmem:[%s9206_s0 + $0x6c] sm:$0xe]  ;;  %v6409_v61 = vld [vmem:[%s9206_s0 + $0x70] sm:$0xf] }
  0x62   :  { %v2789_v16 = vshll.u32 %v5112_v63, 16  ;;  %v5177_v48 = vcombine.low %v4889_v35, %v6296_v55  ;;  %v4674_v1 = vld [vmem:[%s9206_s0 + $0x6c] sm:$0xf] }
  0x63   :  { %v1780_v49 = vor.u32 %v1779_v43, %v1775_v41  ;;  %v764_v24 = vshll.u32 %v6332_v11, 16  ;;  %v762_v22 = vshrl.u32 %v6332_v11, 16 }
  0x64   :  { %1061 = vrot.lane.b32.xlu1 %v748_v20, %s5729_s7  ;;  %v2806_v20 = vshll.u32 %v6321_v4, 16  ;;  %v2791_v30 = vrot.slane %v2789_v16, 1  ;;  %v3279_v5 = vrot.slane %v5177_v48, 1 }
  0x65   :  { %3362 = vrot.lane.b32.xlu0 %v3272_v7, %s5734_s18  ;;  %v1785_v6 = vsel %vm664_vm1, %v1780_v49, %v1784_v58  ;;  %v6341_v7 = vld [vmem:[%s9206_s0 + $0x70] sm:$0xf]  ;;  %v766_v32 = vrot.slane %v764_v24, 1  ;;  %v3277_v58 = vrot.slane %v6329_v9, 1 }
  0x66   :  { %v6354_v25 = vcombine.low %v40_v17, %v6341_v7  ;;  %v2808_v36 = vrot.slane %v2806_v20, 1  ;;  %v3280_v17 = vrot.slane %v6321_v4, 1  ;;  %v6424_v20 = vcombine.low %v4674_v1, %v6409_v61 }
  0x67   :  { %v767_v53 = vor.u32 %v766_v32, %v762_v22  ;;  %v6462_v32 = vld [vmem:[%s9206_s0 + $0x88] sm:$0xf] }
  0x68   :  { %1063 = vrot.lane.b32.xlu1 %v760_v33, %s5729_s7  ;;  %v4888_v33 = vld [vmem:[%s9206_s0 + $0x60] sm:$0xe]  ;;  %v776_v40 = vshll.u32 %v6354_v25, 16  ;;  %v1789_v35 = vshll.u32 %v6424_v20, 16 }
  0x69   :  { %3364 = vrot.lane.b32.xlu0 %v3275_v37, %s5734_s18  ;;  %v769_v37 = vshll.u32 %v6349_v21, 16  ;;  %v5176_v41 = vcombine.low %v4888_v33, %v6304_v57  ;;  %v127_v57 = vld [vmem:[%s9206_s0 + $0x6c] sm:$0xe]  ;;  %v1235_v33 = vrot.slane %v6349_v21, 1  ;;  %v4804_v21 = vld [vmem:[%s9206_s0 + $0x84] sm:$0xf] }
  0x6a   :  { %v778_v56 = vrot.slane %v776_v40, 1 }
  0x6b   :  { %v771_v50 = vrot.slane %v769_v37, 1  ;;  %v3276_v49 = vrot.slane %v5176_v41, 1 }
  0x6c   :  { %1320 = vrot.lane.b32.xlu1 %v1233_v39, %s5728_s20  ;;  %v6373_v39 = vld [vmem:[%s9206_s0 + $0x74] ss:$0 sps:$4 sm:$0x11]  }
  0x6d   :  { %1318 = vrot.lane.b32.xlu0 %v1230_v51, %s5728_s20  ;;  %v774_v51 = vshrl.u32 %v6354_v25, 16  ;;  %v781_v46 = vshll.u32 %v6373_v39, 16  ;;  %v772_v0 = vsel %vm664_vm1, %v767_v53, %v771_v50  ;;  %v3278_v16 = vsel %vm1209_vm0, %v3276_v49, %v3277_v58 }
  0x6e   :  { %v1787_v50 = vshrl.u32 %v6424_v20, 16 }
  0x6f   :  { %v783_v9 = vrot.slane %v781_v46, 1  ;;  %v6475_v46 = vcombine.low %v4804_v21, %v6462_v32 }
  0x70   :  { %1544 = vrot.lane.b32.xlu1 %v5017_v23, %s5727_s28  ;;  %v2803_v23 = vrot.slane %v2801_v8, 1  ;;  %v779_v8 = vor.u32 %v778_v56, %v774_v51  ;;  %v1791_v51 = vrot.slane %v1789_v35, 1 }
  0x71   :  { %1542 = vrot.lane.b32.xlu0 %v5016_v27, %s5727_s28  ;;  %v2787_v27 = vshrl.u32 %v5112_v63, 16 }
  0x72   :  { %v2804_v28 = vor.u32 %v2803_v23, %v2799_v18  ;;  %v1238_v23 = vrot.slane %v6373_v39, 1  ;;  %v784_v24 = vsel %vm664_vm1, %v779_v8, %v783_v9  ;;  %v1792_v1 = vor.u32 %v1791_v51, %v1787_v50 }
  0x73   :  { %v2792_v43 = vor.u32 %v2791_v30, %v2787_v27  ;;  %v3281_v30 = vsel %vm1209_vm0, %v3279_v5, %v3280_v17 }
  0x74   :  { %2088 = vrot.lane.b32.xlu1 %v1785_v6, %s5730_s25  ;;  %v2809_v52 = vsel %vm664_vm1, %v2804_v28, %v2808_v36  ;;  %v4987_v6 = vcombine.low %v127_v57, %v6341_v7  ;;  %v6447_v36 = vld [vmem:[%s9206_s0 + $0x74] ss:$0 sps:$4 sm:$0x11]   ;;  %v4762_v28 = vld [vmem:[%s9206_s0 + $0x6c] sm:$0xe] }
  0x75   :  { %2086 = vrot.lane.b32.xlu0 %v1773_v13, %s5730_s25  ;;  %v2797_v55 = vsel %vm664_vm1, %v2792_v43, %v2796_v47  ;;  %v5082_v56 = vcombine.low %v4762_v28, %v6409_v61  ;;  %v4802_v57 = vld [vmem:[%s9206_s0 + $0x78] sm:$0xf] }
  0x76   :  { %v6367_v38 = vpop.permute.xlu0 %1530  ;;  %v1237_v18 = vrot.slane %v4987_v6, 1 }
  0x77   :  { %v2258_v9 = vrot.slane %v5082_v56, 1 }
  0x78   :  { %2344 = vrot.lane.b32.xlu1 %v2257_v19, %s5731_s13  ;;  %v1239_v39 = vsel %vm1209_vm0, %v1237_v18, %v1238_v23  ;;  %v6514_v18 = vld [vmem:[%s9206_s0 + $0x8c] ss:$0 sps:$4 sm:$0x11]  }
  0x79   :  { %2342 = vrot.lane.b32.xlu0 %v2254_v26, %s5731_s13  ;;  %v4763_v26 = vld [vmem:[%s9206_s0 + $0x78] sm:$0xe]  ;;  %v2830_v28 = vshll.u32 %v6514_v18, 16 }
  0x7a   :  { %v6376_v42 = vpop.permute.xlu1 %1306  ;;  %v5083_v22 = vcombine.low %v4763_v26, %v6398_v60 }
  0x7c   :  { %2568 = vrot.lane.b32.xlu1 %v5113_v59, %s5732_s21  ;;  %v4676_v59 = vld [vmem:[%s9206_s0 + $0x78] sm:$0xf] }
  0x7d   :  { %2566 = vrot.lane.b32.xlu0 %v5112_v63, %s5732_s21  ;;  %v126_v63 = vld [vmem:[%s9206_s0 + $0x60] sm:$0xe]  ;;  %v6416_v13 = vcombine.low %v4676_v59, %v6398_v60  ;;  %v2261_v60 = vrot.slane %v5083_v22, 1  ;;  %v6551_v22 = vld [vmem:[%s9206_s0 + $0x80] ss:$0 sps:$4 sm:$0x11]  }
  0x7e   :  { %v6388_v45 = vpop.permute.xlu1 %1308  ;;  %v4986_v19 = vcombine.low %v126_v63, %v6316_v3  ;;  %v6437_v3 = vld [vmem:[%s9206_s0 + $0x80] ss:$0 sps:$4 sm:$0x11]  }
  0x7f   :  { %v1050_v62 = vpop.permute.xlu0 %1049  ;;  %v1801_v4 = vshll.u32 %v6416_v13, 16  ;;  %v1799_v40 = vshrl.u32 %v6416_v13, 16  ;;  %v1806_v43 = vshll.u32 %v6437_v3, 16  ;;  %v2262_v5 = vrot.slane %v6437_v3, 1  ;;  %v6538_v3 = vld [vmem:[%s9206_s0 + $0x88] sm:$0xf] }
  0x80   :  { %3112 = vrot.lane.b32.xlu1 %v2809_v52, %s5733_s15  ;;  %v1234_v31 = vrot.slane %v4986_v19, 1  ;;  %v1794_v52 = vshll.u32 %v6447_v36, 16  ;;  %v3420_v49 = vsel %vm3418_vm2, %v5796_v10, %v1050_v62  ;;  %v6501_v10 = vld [vmem:[%s9206_s0 + $0x7c] sm:$0xf]  ;;  %v2259_v19 = vrot.slane %v6447_v36, 1 }
  0x81   :  { %3110 = vrot.lane.b32.xlu0 %v2797_v55, %s5733_s15  ;;  %v1803_v41 = vrot.slane %v1801_v4, 1  ;;  %v6483_v55 = vld [vmem:[%s9206_s0 + $0x7c] sm:$0xf]  ;;  %v1808_v59 = vrot.slane %v1806_v43, 1  ;;  %v3485_v17 = vsel %vm3483_vm3, %v3420_v49, %v6376_v42  ;;  %v2263_v26 = vsel %vm1209_vm0, %v2261_v60, %v2262_v5  ;;  %v44_v4 = vld [vmem:[%s9206_s0 + $0x84] sm:$0xf] }
  0x82   :  { %v6418_v14 = vpop.permute.xlu1 %1532  ;;  %v1236_v48 = vsel %vm1209_vm0, %v1234_v31, %v1235_v33  ;;  %v1796_v61 = vrot.slane %v1794_v52, 1  ;;  %v6493_v6 = vcombine.low %v4802_v57, %v6483_v55  ;;  %v6522_v42 = vld [vmem:[%s9206_s0 + $0x80] ss:$0 sps:$4 sm:$0x11]   ;;  %v2823_v31 = vshrl.u32 %v6475_v46, 16 }
  0x83   :  { %v1052_v7 = vpop.permute.xlu0 %1051  ;;  %v1804_v58 = vor.u32 %v1803_v41, %v1799_v40  ;;  %v2260_v36 = vsel %vm1209_vm0, %v2258_v9, %v2259_v19  ;;  %v2818_v50 = vshll.u32 %v6522_v42, 16  ;;  %v4890_v52 = vld [vmem:[%s9206_s0 + $0x78] sm:$0xe]  ;;  %v4891_v49 = vld [vmem:[%s9206_s0 + $0x84] sm:$0xe] }
  0x84   :  { %1065 = vrot.lane.b32.xlu1 %v772_v0, %s5729_s7  ;;  %v42_v0 = vld [vmem:[%s9206_s0 + $0x78] sm:$0xf]  ;;  %v3422_v62 = vsel %vm3418_vm2, %v5804_v15, %v1052_v7  ;;  %v2811_v43 = vshrl.u32 %v6493_v6, 16 }
  0x85   :  { %3366 = vrot.lane.b32.xlu0 %v3278_v16, %s5734_s18  ;;  %v2825_v16 = vshll.u32 %v6475_v46, 16  ;;  %v1809_v15 = vsel %vm664_vm1, %v1804_v58, %v1808_v59  ;;  %v3487_v7 = vsel %vm3483_vm3, %v3422_v62, %v6388_v45  ;;  %v2832_v58 = vrot.slane %v2830_v28, 1 }
  0x86   :  { %v6439_v27 = vpop.permute.xlu1 %2076  ;;  %v793_v59 = vshll.u32 %v6551_v22, 16  ;;  %v2820_v9 = vrot.slane %v2818_v50, 1  ;;  %v3286_v50 = vrot.slane %v6514_v18, 1  ;;  %v6653_v18 = vld [vmem:[%s9206_s0 + $0x98] ss:$0 sps:$4 sm:$0x11]  }
  0x87   :  { %v6449_v37 = vpop.permute.xlu0 %2074  ;;  %v2827_v33 = vrot.slane %v2825_v16, 1 }
  0x88   :  { %1067 = vrot.lane.b32.xlu1 %v784_v24, %s5729_s7  ;;  %v1797_v24 = vsel %vm664_vm1, %v1792_v1, %v1796_v61  ;;  %v6586_v61 = vld [vmem:[%s9206_s0 + $0x8c] ss:$0 sps:$4 sm:$0x11]  }
  0x89   :  { %3368 = vrot.lane.b32.xlu0 %v3281_v30, %s5734_s18  ;;  %v3550_v30 = vsel %vm3548_vm4, %v3485_v17, %v6367_v38  ;;  %v3552_v38 = vsel %vm3548_vm4, %v3487_v7, %v6418_v14 }
  0x8a   :  { %v6468_v47 = vpop.permute.xlu1 %2332  ;;  %v3615_v35 = vsel %vm3613_vm5, %v3550_v30, %v6449_v37  ;;  %v3617_v56 = vsel %vm3613_vm5, %v3552_v38, %v6439_v27  ;;  %v3283_v30 = vrot.slane %v6522_v42, 1  ;;  %v6631_v42 = vld [vmem:[%s9206_s0 + $0x88] sm:$0xf] }
  0x8b   :  { %v2331_v53 = vpop.permute.xlu0 %2330  ;;  %v3682_v60 = vsel %vm3678_vm6, %v3617_v56, %v6468_v47  ;;  %v5178_v47 = vcombine.low %v4890_v52, %v6483_v55  ;;  %v1244_v56 = vrot.slane %v6586_v61, 1 }
  0x8c   :  { %1324 = vrot.lane.b32.xlu1 %v1239_v39, %s5728_s20  ;;  %v3680_v21 = vsel %vm3678_vm6, %v3615_v35, %v2331_v53  ;;  %v6559_v39 = vcombine.low %v44_v4, %v6538_v3  ;;  %v2828_v53 = vor.u32 %v2827_v33, %v2823_v31  ;;  %v128_v33 = vld [vmem:[%s9206_s0 + $0x78] sm:$0xe]  ;;  %v4678_v35 = vld [vmem:[%s9206_s0 + $0x84] sm:$0xf] }
  0x8d   :  { %1322 = vrot.lane.b32.xlu0 %v1236_v48, %s5728_s20  ;;  %v3282_v4 = vrot.slane %v5178_v47, 1  ;;  %v4764_v47 = vld [vmem:[%s9206_s0 + $0x84] sm:$0xe] }
  0x8e   :  { %v6489_v63 = vpop.permute.xlu1 %2556  ;;  %v800_v5 = vshll.u32 %v6559_v39, 16  ;;  %v2833_v7 = vsel %vm664_vm1, %v2828_v53, %v2832_v58 }
  0x8f   :  { %v2555_v8 = vpop.permute.xlu0 %2554 }
  0x90   :  { %1548 = vrot.lane.b32.xlu1 %v6416_v13, %s5727_s28  ;;  %v6525_v13 = vcombine.low %v42_v0, %v6501_v10  ;;  %v3745_v40 = vsel %vm3743_vm7, %v3680_v21, %v2555_v8  ;;  %v3747_v0 = vsel %vm3743_vm7, %v3682_v60, %v6489_v63  ;;  %v129_v63 = vld [vmem:[%s9206_s0 + $0x84] sm:$0xe] }
  0x91   :  { %1546 = vrot.lane.b32.xlu0 %v6424_v20, %s5727_s28  ;;  %v2813_v20 = vshll.u32 %v6493_v6, 16  ;;  %v4989_v28 = vcombine.low %v129_v63, %v6538_v3 }
  0x92   :  { %v3101_v23 = vpop.permute.xlu1 %3100  ;;  %v788_v37 = vshll.u32 %v6525_v13, 16  ;;  %v786_v27 = vshrl.u32 %v6525_v13, 16 }
  0x93   :  { %v3099_v45 = vpop.permute.xlu0 %3098  ;;  %v2815_v48 = vrot.slane %v2813_v20, 1  ;;  %v3812_v16 = vsel %vm3808_vm8, %v3747_v0, %v3101_v23  ;;  %v798_v23 = vshrl.u32 %v6559_v39, 16  ;;  %v1243_v53 = vrot.slane %v4989_v28, 1  ;;  %v46_v28 = vld [vmem:[%s9206_s0 + $0x90] sm:$0xf] }
  0x94   :  { %2092 = vrot.lane.b32.xlu1 %v1809_v15, %s5730_s25  ;;  %v3810_v14 = vsel %vm3808_vm8, %v3745_v40, %v3099_v45  ;;  %v790_v1 = vrot.slane %v788_v37, 1  ;;  %v5179_v15 = vcombine.low %v4891_v49, %v6462_v32  ;;  %v805_v32 = vshll.u32 %v6586_v61, 16  ;;  %v4680_v45 = vld [vmem:[%s9206_s0 + $0x90] sm:$0xf] }
  0x95   :  { %2090 = vrot.lane.b32.xlu0 %v1797_v24, %s5730_s25  ;;  %v2816_v8 = vor.u32 %v2815_v48, %v2811_v43  ;;  %v795_v24 = vrot.slane %v793_v59, 1  ;;  %v3284_v48 = vsel %vm1209_vm0, %v3282_v4, %v3283_v30  ;;  %v1241_v59 = vrot.slane %v6551_v22, 1  ;;  %v4765_v61 = vld [vmem:[%s9206_s0 + $0x90] sm:$0xe]  ;;  %v6674_v22 = vld [vmem:[%s9206_s0 + $0xa0] sm:$0xf] }
  0x96   :  { %v6562_v41 = vpop.permute.xlu1 %1053  ;;  %v791_v55 = vor.u32 %v790_v1, %v786_v27  ;;  %v807_v37 = vrot.slane %v805_v32, 1  ;;  %v6662_v27 = vld [vmem:[%s9206_s0 + $0x8c] ss:$0 sps:$4 sm:$0x11]   ;;  %v1245_v0 = vsel %vm1209_vm0, %v1243_v53, %v1244_v56 }
  0x97   :  { %v3355_v51 = vpop.permute.xlu0 %3354  ;;  %v6731_v56 = vld [vmem:[%s9206_s0 + $0x98] ss:$0 sps:$4 sm:$0x11]  }
  0x98   :  { %2348 = vrot.lane.b32.xlu1 %v2263_v26, %s5731_s13  ;;  %v3875_v57 = vsel %vm3873_vm9, %v3810_v14, %v3355_v51  ;;  %v802_v26 = vrot.slane %v800_v5, 1  ;;  %v796_v38 = vsel %vm664_vm1, %v791_v55, %v795_v24  ;;  %v4988_v14 = vcombine.low %v128_v33, %v6501_v10  ;;  %v4808_v5 = vld [vmem:[%s9206_s0 + $0x9c] sm:$0xf] }
  0x99   :  { %2346 = vrot.lane.b32.xlu0 %v2260_v36, %s5731_s13  ;;  %5306 = vmatprep.mubr.msk.bf16.mxu0 %vm3938_vm10, %v3875_v57  ;;  %v3285_v36 = vrot.slane %v5179_v15, 1  ;;  %v5020_v51 = vcombine.low %v4678_v35, %v6631_v42  ;;  %v1818_v24 = vshll.u32 %v6662_v27, 16  ;;  %v6687_v55 = vcombine.low %v4808_v5, %v6674_v22 }
  0x9a   :  { %v6591_v62 = vpop.permute.xlu1 %1055  ;;  %v803_v21 = vor.u32 %v802_v26, %v798_v23  ;;  %v1240_v58 = vrot.slane %v4988_v14, 1  ;;  %v4806_v23 = vld [vmem:[%s9206_s0 + $0x90] sm:$0xf]  ;;  %v6695_v26 = vld [vmem:[%s9206_s0 + $0x94] sm:$0xf]  ;;  %v2265_v14 = vrot.slane %v6662_v27, 1 }
  0x9b   :  { %v3357_v17 = vpop.permute.xlu0 %3356  ;;  %v3287_v49 = vsel %vm1209_vm0, %v3285_v36, %v3286_v50  ;;  %v1813_v60 = vshll.u32 %v5020_v51, 16  ;;  %v1811_v15 = vshrl.u32 %v5020_v51, 16  ;;  %v1820_v35 = vrot.slane %v1818_v24, 1 }
  0x9c   :  { %v3877_v19 = vsel %vm3873_vm9, %v3812_v16, %v3357_v17  ;;  %2572 = vrot.lane.b32.xlu1 %v6475_v46, %s5732_s21  ;;  %v2821_v46 = vsel %vm664_vm1, %v2816_v8, %v2820_v9  ;;  %v808_v3 = vsel %vm664_vm1, %v803_v21, %v807_v37  ;;  %v1830_v16 = vshll.u32 %v6653_v18, 16  ;;  %v6718_v21 = vld [vmem:[%s9206_s0 + $0xa4] ss:$0 sps:$4 sm:$0x11]  }
  0x9d   :  { %2570 = vrot.lane.b32.xlu0 %v6493_v6, %s5732_s21  ;;  %5307 = vmatmul.mubr.msk.bf16.vlgmr.msra.gmra.mxu0 %vm3938_vm10, %v3877_v19  ;;  %v6618_v6 = vld [vmem:[%s9206_s0 + $0x94] sm:$0xf]  ;;  %v1242_v19 = vsel %vm1209_vm0, %v1240_v58, %v1241_v59  ;;  %v6704_v36 = vcombine.low %v4806_v23, %v6695_v26 }
  0x9e   :  { %v6608_v20 = vpop.permute.xlu1 %1312  ;;  %v5021_v40 = vcombine.low %v4680_v45, %v6618_v6  ;;  %v5085_v32 = vcombine.low %v4765_v61, %v6618_v6  ;;  %v1832_v30 = vrot.slane %v1830_v16, 1  ;;  %v6712_v6 = vld [vmem:[%s9206_s0 + $0x94] sm:$0xf]  ;;  %v2854_v61 = vshll.u32 %v6718_v21, 16 }
  0x9f   :  { %v6620_v31 = vpop.permute.xlu0 %1310 }
  0xa0   :  { %3116 = vrot.lane.b32.xlu1 %v2833_v7, %s5733_s15  ;;  %v1825_v57 = vshll.u32 %v5021_v40, 16  ;;  %v1823_v8 = vshrl.u32 %v5021_v40, 16  ;;  %v1815_v7 = vrot.slane %v1813_v60, 1  ;;  %v2267_v37 = vrot.slane %v5085_v32, 1 }
  0xa1   :  { %3114 = vrot.lane.b32.xlu0 %v2821_v46, %s5733_s15  ;;  %v5084_v46 = vcombine.low %v4764_v47, %v6631_v42  ;;  %v2847_v60 = vshrl.u32 %v6687_v55, 16  ;;  %v2842_v32 = vshll.u32 %v6731_v56, 16 }
  0xa2   :  { %v6638_v43 = vpop.permute.xlu1 %1536  ;;  %v1827_v9 = vrot.slane %v1825_v57, 1  ;;  %v1816_v33 = vor.u32 %v1815_v7, %v1811_v15 }
  0xa3   :  { %v6644_v52 = vpop.permute.xlu0 %1534  ;;  %v2264_v50 = vrot.slane %v5084_v46, 1 }
  0xa4   :  { %1069 = vrot.lane.b32.xlu1 %v796_v38, %s5729_s7  ;;  %v1828_v4 = vor.u32 %v1827_v9, %v1823_v8  ;;  %v2849_v38 = vshll.u32 %v6687_v55, 16  ;;  %v6763_v8 = vld [vmem:[%s9206_s0 + $0x98] ss:$0 sps:$4 sm:$0x11]   ;;  %v3426_v9 = vsel %vm3418_vm2, %v5915_v29, %v6591_v62 }
  0xa5   :  { %3370 = vrot.lane.b32.xlu0 %v3284_v48, %s5734_s18  ;;  %v2268_v48 = vrot.slane %v6653_v18, 1  ;;  %v2266_v47 = vsel %vm1209_vm0, %v2264_v50, %v2265_v14  ;;  %v3491_v15 = vsel %vm3483_vm3, %v3426_v9, %v6608_v20  ;;  %v2844_v50 = vrot.slane %v2842_v32, 1 }
  0xa6   :  { %v6655_v10 = vpop.permute.xlu1 %2080  ;;  %v1833_v53 = vsel %vm664_vm1, %v1828_v4, %v1832_v30  ;;  %v2851_v27 = vrot.slane %v2849_v38, 1  ;;  %v3556_v29 = vsel %vm3548_vm4, %v3491_v15, %v6638_v43  ;;  %v6792_v43 = vld [vmem:[%s9206_s0 + $0xa4] ss:$0 sps:$4 sm:$0x11]   ;;  %v3292_v32 = vrot.slane %v6718_v21, 1 }
  0xa7   :  { %v2079_v1 = vpop.permute.xlu0 %2078  ;;  %v3621_v30 = vsel %vm3613_vm5, %v3556_v29, %v6655_v10  ;;  %v1250_v21 = vrot.slane %v6792_v43, 1 }
  0xa8   :  { %1071 = vrot.lane.b32.xlu1 %v808_v3, %s5729_s7  ;;  %v3424_v3 = vsel %vm3418_vm2, %v5885_v12, %v6562_v41  ;;  %v2837_v12 = vshll.u32 %v6704_v36, 16  ;;  %v48_v41 = vld [vmem:[%s9206_s0 + $0x9c] sm:$0xf]  ;;  %v2852_v4 = vor.u32 %v2851_v27, %v2847_v60  ;;  %v6831_v27 = vld [vmem:[%s9206_s0 + $0xac] sm:$0xf] }
  0xa9   :  { %3372 = vrot.lane.b32.xlu0 %v3287_v49, %s5734_s18  ;;  %v3489_v57 = vsel %vm3483_vm3, %v3424_v3, %v6620_v31  ;;  %v1821_v49 = vsel %vm664_vm1, %v1816_v33, %v1820_v35  ;;  %v4892_v31 = vld [vmem:[%s9206_s0 + $0x90] sm:$0xe]  ;;  %v2856_v33 = vrot.slane %v2854_v61, 1  ;;  %v817_v35 = vshll.u32 %v6763_v8, 16 }
  0xaa   :  { %v6682_v17 = vpop.permute.xlu1 %2336  ;;  %v3554_v58 = vsel %vm3548_vm4, %v3489_v57, %v6644_v52  ;;  %v2835_v52 = vshrl.u32 %v6704_v36, 16  ;;  %v2839_v23 = vrot.slane %v2837_v12, 1  ;;  %v5180_v46 = vcombine.low %v4892_v31, %v6695_v26 }
  0xab   :  { %v2335_v63 = vpop.permute.xlu0 %2334  ;;  %v3619_v5 = vsel %vm3613_vm5, %v3554_v58, %v2079_v1  ;;  %v3289_v12 = vrot.slane %v6731_v56, 1 }
  0xac   :  { %1328 = vrot.lane.b32.xlu1 %v1245_v0, %s5728_s20  ;;  %v2269_v0 = vsel %vm1209_vm0, %v2267_v37, %v2268_v48  ;;  %v3684_v16 = vsel %vm3678_vm6, %v3619_v5, %v2335_v63  ;;  %v2840_v48 = vor.u32 %v2839_v23, %v2835_v52  ;;  %v130_v5 = vld [vmem:[%s9206_s0 + $0x90] sm:$0xe] }
  0xad   :  { %1326 = vrot.lane.b32.xlu0 %v1242_v19, %s5728_s20  ;;  %v4990_v29 = vcombine.low %v130_v5, %v6712_v6 }
  0xae   :  { %v6701_v45 = vpop.permute.xlu1 %2560  ;;  %v2845_v56 = vsel %vm664_vm1, %v2840_v48, %v2844_v50  ;;  %v4812_v48 = vld [vmem:[%s9206_s0 + $0xb4] sm:$0xf]  ;;  %v6891_v50 = vld [vmem:[%s9206_s0 + $0xb8] sm:$0xf] }
  0xaf   :  { %v2559_v42 = vpop.permute.xlu0 %2558 }
  0xb0   :  { %1552 = vrot.lane.b32.xlu1 %v5021_v40, %s5727_s28  ;;  %v6734_v40 = vcombine.low %v46_v28, %v6712_v6  ;;  %v3749_v7 = vsel %vm3743_vm7, %v3684_v16, %v2559_v42  ;;  %v3686_v28 = vsel %vm3678_vm6, %v3621_v30, %v6682_v17  ;;  %v4893_v17 = vld [vmem:[%s9206_s0 + $0x9c] sm:$0xe] }
  0xb1   :  { %1550 = vrot.lane.b32.xlu0 %v5020_v51, %s5727_s28  ;;  %v6746_v51 = vld [vmem:[%s9206_s0 + $0xa0] sm:$0xf]  ;;  %v3751_v38 = vsel %vm3743_vm7, %v3686_v28, %v6701_v45  ;;  %v819_v45 = vrot.slane %v817_v35, 1  ;;  %v5181_v31 = vcombine.low %v4893_v17, %v6674_v22  ;;  %v4682_v22 = vld [vmem:[%s9206_s0 + $0x9c] sm:$0xf]  ;;  %v1247_v35 = vrot.slane %v6763_v8, 1 }
  0xb2   :  { %v3105_v18 = vpop.permute.xlu1 %3104  ;;  %v812_v1 = vshll.u32 %v6734_v40, 16  ;;  %v6772_v19 = vcombine.low %v48_v41, %v6746_v51  ;;  %v810_v10 = vshrl.u32 %v6734_v40, 16  ;;  %v6875_v28 = vld [vmem:[%s9206_s0 + $0xa4] ss:$0 sps:$4 sm:$0x11]  }
  0xb3   :  { %v3103_v59 = vpop.permute.xlu0 %3102  ;;  %v3816_v14 = vsel %vm3808_vm8, %v3751_v38, %v3105_v18  ;;  %v3291_v23 = vrot.slane %v5181_v31, 1 }
  0xb4   :  { %2096 = vrot.lane.b32.xlu1 %v1833_v53, %s5730_s25  ;;  %v3814_v62 = vsel %vm3808_vm8, %v3749_v7, %v3103_v59  ;;  %v814_v26 = vrot.slane %v812_v1, 1  ;;  %v824_v42 = vshll.u32 %v6772_v19, 16  ;;  %v3288_v53 = vrot.slane %v5180_v46, 1 }
  0xb5   :  { %2094 = vrot.lane.b32.xlu0 %v1821_v49, %s5730_s25  ;;  %v2857_v49 = vsel %vm664_vm1, %v2852_v4, %v2856_v33  ;;  %v822_v41 = vshrl.u32 %v6772_v19, 16  ;;  %v829_v59 = vshll.u32 %v6792_v43, 16  ;;  %v1246_v33 = vrot.slane %v4990_v29, 1  ;;  %v4766_v43 = vld [vmem:[%s9206_s0 + $0x9c] sm:$0xe] }
  0xb6   :  { %v6777_v24 = vpop.permute.xlu1 %1057  ;;  %v815_v18 = vor.u32 %v814_v26, %v810_v10  ;;  %v826_v58 = vrot.slane %v824_v42, 1  ;;  %v4767_v42 = vld [vmem:[%s9206_s0 + $0xa8] sm:$0xe] }
  0xb7   :  { %v3359_v63 = vpop.permute.xlu0 %3358  ;;  %v831_v1 = vrot.slane %v829_v59, 1 }
  0xb8   :  { %v3879_v20 = vsel %vm3873_vm9, %v3814_v62, %v3359_v63  ;;  %2352 = vrot.lane.b32.xlu1 %v2269_v0, %s5731_s13  ;;  %v6844_v0 = vld [vmem:[%s9206_s0 + $0xa0] sm:$0xf]  ;;  %v820_v9 = vsel %vm664_vm1, %v815_v18, %v819_v45  ;;  %v827_v16 = vor.u32 %v826_v58, %v822_v41  ;;  %v1248_v45 = vsel %vm1209_vm0, %v1246_v33, %v1247_v35 }
  0xb9   :  { %2350 = vrot.lane.b32.xlu0 %v2266_v47, %s5731_s13  ;;  %5310 = vmatprep.mubr.msk.bf16.mxu0 %vm3938_vm10, %v3879_v20  ;;  %v3290_v47 = vsel %vm1209_vm0, %v3288_v53, %v3289_v12  ;;  %v5022_v62 = vcombine.low %v4682_v22, %v6844_v0  ;;  %v3293_v20 = vsel %vm1209_vm0, %v3291_v23, %v3292_v32  ;;  %v4810_v53 = vld [vmem:[%s9206_s0 + $0xa8] sm:$0xf]  ;;  %v1842_v18 = vshll.u32 %v6875_v28, 16  ;;  %v6932_v23 = vld [vmem:[%s9206_s0 + $0xbc] ss:$0 sps:$4 sm:$0x11]  }
  0xba   :  { %v6802_v37 = vpop.permute.xlu1 %1059  ;;  %v832_v46 = vsel %vm664_vm1, %v827_v16, %v831_v1  ;;  %v5087_v58 = vcombine.low %v4767_v42, %v6831_v27  ;;  %v5086_v59 = vcombine.low %v4766_v43, %v6844_v0  ;;  %v6925_v0 = vld [vmem:[%s9206_s0 + $0xac] sm:$0xf]  ;;  %v2271_v1 = vrot.slane %v6875_v28, 1 }
  0xbb   :  { %v3361_v3 = vpop.permute.xlu0 %3360  ;;  %v1837_v10 = vshll.u32 %v5022_v62, 16  ;;  %v1835_v17 = vshrl.u32 %v5022_v62, 16  ;;  %v2878_v42 = vshll.u32 %v6932_v23, 16 }
  0xbc   :  { %v3881_v57 = vsel %vm3873_vm9, %v3816_v14, %v3361_v3  ;;  %2576 = vrot.lane.b32.xlu1 %v6687_v55, %s5732_s21  ;;  %v131_v55 = vld [vmem:[%s9206_s0 + $0x9c] sm:$0xe]  ;;  %v2270_v32 = vrot.slane %v5086_v59, 1 }
  0xbd   :  { %2574 = vrot.lane.b32.xlu0 %v6704_v36, %s5732_s21  ;;  %5311 = vmatmul.mubr.msk.bf16.gmra.mxu0 %vm3938_vm10, %v3881_v57  ;;  %v4684_v36 = vld [vmem:[%s9206_s0 + $0xa8] sm:$0xf]  ;;  %v4991_v52 = vcombine.low %v131_v55, %v6746_v51  ;;  %v6863_v51 = vld [vmem:[%s9206_s0 + $0xb0] ss:$0 sps:$4 sm:$0x11]   ;;  %v1839_v12 = vrot.slane %v1837_v10, 1  ;;  %v6911_v55 = vcombine.low %v4812_v48, %v6891_v50 }
  0xbe   :  { %v6822_v60 = vpop.permute.xlu1 %1316  ;;  %v5023_v15 = vcombine.low %v4684_v36, %v6831_v27  ;;  %v1854_v8 = vshll.u32 %v6863_v51, 16  ;;  %v6901_v57 = vld [vmem:[%s9206_s0 + $0xac] sm:$0xf]  ;;  %v50_v27 = vld [vmem:[%s9206_s0 + $0xa8] sm:$0xf]  ;;  %v2274_v16 = vrot.slane %v6863_v51, 1  ;;  %v3428_v51 = vsel %vm3418_vm2, %v6071_v54, %v6777_v24 }
  0xbf   :  { %v6833_v61 = vpop.permute.xlu0 %1314  ;;  %v1249_v4 = vrot.slane %v4991_v52, 1  ;;  %v6915_v36 = vcombine.low %v4810_v53, %v6901_v57  ;;  %v1840_v22 = vor.u32 %v1839_v12, %v1835_v17  ;;  %v2873_v29 = vshll.u32 %v6911_v55, 16  ;;  %v6959_v54 = vld [vmem:[%s9206_s0 + $0xb8] sm:$0xf]  ;;  %v4894_v48 = vld [vmem:[%s9206_s0 + $0xa8] sm:$0xe] }
  0xc0   :  { %3120 = vrot.lane.b32.xlu1 %v2857_v49, %s5733_s15  ;;  %v1849_v30 = vshll.u32 %v5023_v15, 16  ;;  %v1847_v38 = vshrl.u32 %v5023_v15, 16  ;;  %v2871_v10 = vshrl.u32 %v6911_v55, 16  ;;  %v2880_v59 = vrot.slane %v2878_v42, 1  ;;  %v4688_v42 = vld [vmem:[%s9206_s0 + $0xc0] sm:$0xf] }
  0xc1   :  { %3118 = vrot.lane.b32.xlu0 %v2845_v56, %s5733_s15  ;;  %v1251_v14 = vsel %vm1209_vm0, %v1249_v4, %v1250_v21  ;;  %v1856_v56 = vrot.slane %v1854_v8, 1  ;;  %v2861_v21 = vshll.u32 %v6915_v36, 16  ;;  %v2875_v8 = vrot.slane %v2873_v29, 1 }
  0xc2   :  { %v6852_v7 = vpop.permute.xlu1 %1540  ;;  %v1851_v3 = vrot.slane %v1849_v30, 1  ;;  %v52_v30 = vld [vmem:[%s9206_s0 + $0xb4] sm:$0xf] }
  0xc3   :  { %v6857_v63 = vpop.permute.xlu0 %1538  ;;  %v6985_v17 = vcombine.low %v52_v30, %v6959_v54 }
  0xc4   :  { %1073 = vrot.lane.b32.xlu1 %v820_v9, %s5729_s7  ;;  %v1852_v31 = vor.u32 %v1851_v3, %v1847_v38  ;;  %v2273_v9 = vrot.slane %v5087_v58, 1  ;;  %v2272_v38 = vsel %vm1209_vm0, %v2270_v32, %v2271_v1 }
  0xc5   :  { %3374 = vrot.lane.b32.xlu0 %v3290_v47, %s5734_s18  ;;  %v1844_v47 = vrot.slane %v1842_v18, 1  ;;  %v2863_v18 = vrot.slane %v2861_v21, 1 }
  0xc6   :  { %v6868_v6 = vpop.permute.xlu1 %2084  ;;  %v1857_v4 = vsel %vm664_vm1, %v1852_v31, %v1856_v56  ;;  %v2275_v28 = vsel %vm1209_vm0, %v2273_v9, %v2274_v16  ;;  %v848_v9 = vshll.u32 %v6985_v17, 16 }
  0xc7   :  { %v2083_v26 = vpop.permute.xlu0 %2082  ;;  %v1845_v35 = vsel %vm664_vm1, %v1840_v22, %v1844_v47  ;;  %v2876_v22 = vor.u32 %v2875_v8, %v2871_v10  ;;  %v5182_v47 = vcombine.low %v4894_v48, %v6901_v57  ;;  %v4686_v8 = vld [vmem:[%s9206_s0 + $0xb4] sm:$0xf] }
  0xc8   :  { %1075 = vrot.lane.b32.xlu1 %v832_v46, %s5729_s7  ;;  %v6939_v46 = vld [vmem:[%s9206_s0 + $0xb0] ss:$0 sps:$4 sm:$0x11]  }
  0xc9   :  { %3376 = vrot.lane.b32.xlu0 %v3293_v20, %s5734_s18  ;;  %v3493_v20 = vsel %vm3483_vm3, %v3428_v51, %v6833_v61  ;;  %v6969_v61 = vld [vmem:[%s9206_s0 + $0xb0] ss:$0 sps:$4 sm:$0x11]   ;;  %v2866_v58 = vshll.u32 %v6939_v46, 16  ;;  %v2881_v30 = vsel %vm664_vm1, %v2876_v22, %v2880_v59 }
  0xca   :  { %v6903_v49 = vpop.permute.xlu1 %2340  ;;  %v3558_v24 = vsel %vm3548_vm4, %v3493_v20, %v6857_v63  ;;  %v2859_v63 = vshrl.u32 %v6915_v36, 16  ;;  %v841_v31 = vshll.u32 %v6969_v61, 16  ;;  %v3295_v20 = vrot.slane %v6939_v46, 1  ;;  %v7080_v59 = vld [vmem:[%s9206_s0 + $0xbc] ss:$0 sps:$4 sm:$0x11]  }
  0xcb   :  { %v2339_v41 = vpop.permute.xlu0 %2338  ;;  %v3623_v43 = vsel %vm3613_vm5, %v3558_v24, %v2083_v26  ;;  %v2868_v1 = vrot.slane %v2866_v58, 1  ;;  %v846_v24 = vshrl.u32 %v6985_v17, 16  ;;  %v3298_v58 = vrot.slane %v6932_v23, 1 }
  0xcc   :  { %1332 = vrot.lane.b32.xlu1 %v1251_v14, %s5728_s20  ;;  %v3430_v14 = vsel %vm3418_vm2, %v6094_v2, %v6802_v37  ;;  %v3688_v3 = vsel %vm3678_vm6, %v3623_v43, %v2339_v41  ;;  %v843_v51 = vrot.slane %v841_v31, 1 }
  0xcd   :  { %1330 = vrot.lane.b32.xlu0 %v1248_v45, %s5728_s20  ;;  %v3495_v53 = vsel %vm3483_vm3, %v3430_v14, %v6822_v60 }
  0xce   :  { %v6917_v5 = vpop.permute.xlu1 %2564  ;;  %v3560_v2 = vsel %vm3548_vm4, %v3495_v53, %v6852_v7 }
  0xcf   :  { %v2563_v52 = vpop.permute.xlu0 %2562  ;;  %v3625_v56 = vsel %vm3613_vm5, %v3560_v2, %v6868_v6  ;;  %v7010_v6 = vld [vmem:[%s9206_s0 + $0xbc] ss:$0 sps:$4 sm:$0x11]  }
  0xd0   :  { %1556 = vrot.lane.b32.xlu1 %v5023_v15, %s5727_s28  ;;  %v6948_v15 = vcombine.low %v50_v27, %v6925_v0  ;;  %v3753_v45 = vsel %vm3743_vm7, %v3688_v3, %v2563_v52  ;;  %v3690_v27 = vsel %vm3678_vm6, %v3625_v56, %v6903_v49  ;;  %v2864_v49 = vor.u32 %v2863_v18, %v2859_v63 }
  0xd1   :  { %1554 = vrot.lane.b32.xlu0 %v5022_v62, %s5727_s28  ;;  %v3755_v57 = vsel %vm3743_vm7, %v3690_v27, %v6917_v5  ;;  %v3294_v5 = vrot.slane %v5182_v47, 1  ;;  %v1256_v23 = vrot.slane %v7010_v6, 1  ;;  %v1253_v56 = vrot.slane %v6969_v61, 1  ;;  %v4816_v61 = vld [vmem:[%s9206_s0 + $0xcc] sm:$0xf] }
  0xd2   :  { %v3109_v33 = vpop.permute.xlu1 %3108  ;;  %v836_v26 = vshll.u32 %v6948_v15, 16  ;;  %v834_v7 = vshrl.u32 %v6948_v15, 16  ;;  %v2869_v10 = vsel %vm664_vm1, %v2864_v49, %v2868_v1  ;;  %v1866_v1 = vshll.u32 %v7080_v59, 16 }
  0xd3   :  { %v3107_v62 = vpop.permute.xlu0 %3106  ;;  %v3820_v32 = vsel %vm3808_vm8, %v3755_v57, %v3109_v33  ;;  %v133_v33 = vld [vmem:[%s9206_s0 + $0xb4] sm:$0xe]  ;;  %v3296_v63 = vsel %vm1209_vm0, %v3294_v5, %v3295_v20  ;;  %v7102_v57 = vld [vmem:[%s9206_s0 + $0xd0] sm:$0xf] }
  0xd4   :  { %2100 = vrot.lane.b32.xlu1 %v1857_v4, %s5730_s25  ;;  %v3818_v37 = vsel %vm3808_vm8, %v3753_v45, %v3107_v62  ;;  %v838_v52 = vrot.slane %v836_v26, 1  ;;  %v4895_v4 = vld [vmem:[%s9206_s0 + $0xb4] sm:$0xe]  ;;  %v850_v62 = vrot.slane %v848_v9, 1  ;;  %v4993_v48 = vcombine.low %v133_v33, %v6959_v54 }
  0xd5   :  { %2098 = vrot.lane.b32.xlu0 %v1845_v35, %s5730_s25  ;;  %v5183_v46 = vcombine.low %v4895_v4, %v6891_v50  ;;  %v7057_v50 = vld [vmem:[%s9206_s0 + $0xb8] sm:$0xf]  ;;  %v7075_v54 = vld [vmem:[%s9206_s0 + $0xc8] ss:$0 sps:$4 sm:$0x11]  }
  0xd6   :  { %v6990_v12 = vpop.permute.xlu1 %1061  ;;  %v839_v35 = vor.u32 %v838_v52, %v834_v7  ;;  %v851_v3 = vor.u32 %v850_v62, %v846_v24  ;;  %v1255_v31 = vrot.slane %v4993_v48, 1  ;;  %v4769_v52 = vld [vmem:[%s9206_s0 + $0xc0] sm:$0xe]  ;;  %v1878_v49 = vshll.u32 %v7075_v54, 16  ;;  %v7119_v24 = vld [vmem:[%s9206_s0 + $0xc4] sm:$0xf] }
  0xd7   :  { %v3363_v41 = vpop.permute.xlu0 %3362  ;;  %v3297_v18 = vrot.slane %v5183_v46, 1  ;;  %v7124_v46 = vcombine.low %v4816_v61, %v7102_v57  ;;  %v7143_v48 = vld [vmem:[%s9206_s0 + $0xdc] sm:$0xf] }
  0xd8   :  { %v3883_v60 = vsel %vm3873_vm9, %v3818_v37, %v3363_v41  ;;  %2356 = vrot.lane.b32.xlu1 %v2275_v28, %s5731_s13  ;;  %v844_v14 = vsel %vm664_vm1, %v839_v35, %v843_v51  ;;  %v5024_v37 = vcombine.low %v4686_v8, %v7057_v50  ;;  %v4814_v35 = vld [vmem:[%s9206_s0 + $0xc0] sm:$0xf]  ;;  %v1880_v62 = vrot.slane %v1878_v49, 1 }
  0xd9   :  { %2354 = vrot.lane.b32.xlu0 %v2272_v38, %s5731_s13  ;;  %5314 = vmatprep.mubr.msk.bf16.mxu0 %vm3938_vm10, %v3883_v60  ;;  %v132_v38 = vld [vmem:[%s9206_s0 + $0xa8] sm:$0xe]  ;;  %v3299_v47 = vsel %vm1209_vm0, %v3297_v18, %v3298_v58  ;;  %v2277_v58 = vrot.slane %v7080_v59, 1  ;;  %v56_v59 = vld [vmem:[%s9206_s0 + $0xe4] sm:$0xf] }
  0xda   :  { %v7015_v16 = vpop.permute.xlu1 %1063  ;;  %v4992_v2 = vcombine.low %v132_v38, %v6925_v0  ;;  %v1861_v7 = vshll.u32 %v5024_v37, 16 }
  0xdb   :  { %v3365_v29 = vpop.permute.xlu0 %3364 }
  0xdc   :  { %v3885_v21 = vsel %vm3873_vm9, %v3820_v32, %v3365_v29  ;;  %2580 = vrot.lane.b32.xlu1 %v6911_v55, %s5732_s21  ;;  %v853_v55 = vshll.u32 %v7010_v6, 16  ;;  %v1252_v27 = vrot.slane %v4992_v2, 1  ;;  %v4768_v6 = vld [vmem:[%s9206_s0 + $0xb4] sm:$0xe]  ;;  %v1257_v32 = vsel %vm1209_vm0, %v1255_v31, %v1256_v23 }
  0xdd   :  { %2578 = vrot.lane.b32.xlu0 %v6915_v36, %s5732_s21  ;;  %5315 = vmatmul.mubr.msk.bf16.gmra.mxu0 %vm3938_vm10, %v3885_v21  ;;  %v7044_v36 = vld [vmem:[%s9206_s0 + $0xc4] sm:$0xf]  ;;  %v1863_v5 = vrot.slane %v1861_v7, 1  ;;  %v2897_v2 = vshll.u32 %v7124_v46, 16  ;;  %v3432_v23 = vsel %vm3418_vm2, %v6203_v34, %v6990_v12  ;;  %v2895_v7 = vshrl.u32 %v7124_v46, 16 }
  0xde   :  { %v7034_v28 = vpop.permute.xlu1 %1320  ;;  %v855_v26 = vrot.slane %v853_v55, 1  ;;  %v5025_v53 = vcombine.low %v4688_v42, %v7044_v36  ;;  %v1254_v21 = vsel %vm1209_vm0, %v1252_v27, %v1253_v56  ;;  %v5089_v33 = vcombine.low %v4769_v52, %v7044_v36  ;;  %v7130_v36 = vld [vmem:[%s9206_s0 + $0xd4] ss:$0 sps:$4 sm:$0x11]  }
  0xdf   :  { %v7046_v43 = vpop.permute.xlu0 %1318  ;;  %v1868_v55 = vrot.slane %v1866_v1, 1  ;;  %v7152_v31 = vld [vmem:[%s9206_s0 + $0xc8] ss:$0 sps:$4 sm:$0x11]   ;;  %v2902_v52 = vshll.u32 %v7130_v36, 16  ;;  %v2899_v49 = vrot.slane %v2897_v2, 1 }
  0xe0   :  { %3124 = vrot.lane.b32.xlu1 %v2881_v30, %s5733_s15  ;;  %v856_v0 = vsel %vm664_vm1, %v851_v3, %v855_v26  ;;  %v1873_v60 = vshll.u32 %v5025_v53, 16  ;;  %v1871_v29 = vshrl.u32 %v5025_v53, 16  ;;  %v1859_v30 = vshrl.u32 %v5024_v37, 16 }
  0xe1   :  { %3122 = vrot.lane.b32.xlu0 %v2869_v10, %s5733_s15  ;;  %v5088_v10 = vcombine.low %v4768_v6, %v7057_v50  ;;  %v54_v50 = vld [vmem:[%s9206_s0 + $0xd8] sm:$0xf]  ;;  %v2279_v3 = vrot.slane %v5089_v33, 1  ;;  %v2280_v26 = vrot.slane %v7075_v54, 1  ;;  %v3497_v56 = vsel %vm3483_vm3, %v3432_v23, %v7046_v43 }
  0xe2   :  { %v7065_v45 = vpop.permute.xlu1 %1544  ;;  %v1875_v51 = vrot.slane %v1873_v60, 1  ;;  %v1864_v8 = vor.u32 %v1863_v5, %v1859_v30  ;;  %v7182_v6 = vld [vmem:[%s9206_s0 + $0xe0] ss:$0 sps:$4 sm:$0x11]  }
  0xe3   :  { %v7070_v41 = vpop.permute.xlu0 %1542  ;;  %v2276_v18 = vrot.slane %v5088_v10, 1  ;;  %v2281_v27 = vsel %vm1209_vm0, %v2279_v3, %v2280_v26 }
  0xe4   :  { %1077 = vrot.lane.b32.xlu1 %v844_v14, %s5729_s7  ;;  %v1876_v42 = vor.u32 %v1875_v51, %v1871_v29  ;;  %v1869_v12 = vsel %vm664_vm1, %v1864_v8, %v1868_v55  ;;  %v3562_v60 = vsel %vm3548_vm4, %v3497_v56, %v7070_v41 }
  0xe5   :  { %3378 = vrot.lane.b32.xlu0 %v3296_v63, %s5734_s18  ;;  %v7135_v63 = vcombine.low %v4814_v35, %v7119_v24  ;;  %v2278_v61 = vsel %vm1209_vm0, %v2276_v18, %v2277_v58 }
  0xe6   :  { %v7087_v22 = vpop.permute.xlu1 %2088  ;;  %v1881_v54 = vsel %vm664_vm1, %v1876_v42, %v1880_v62 }
  0xe7   :  { %v2087_v9 = vpop.permute.xlu0 %2086  ;;  %v2883_v41 = vshrl.u32 %v7135_v63, 16 }
  0xe8   :  { %1079 = vrot.lane.b32.xlu1 %v856_v0, %s5729_s7  ;;  %v7168_v0 = vld [vmem:[%s9206_s0 + $0xe8] sm:$0xf]  ;;  %v3627_v43 = vsel %vm3613_vm5, %v3562_v60, %v2087_v9 }
  0xe9   :  { %3380 = vrot.lane.b32.xlu0 %v3299_v47, %s5734_s18 }
  0xea   :  { %v7109_v4 = vpop.permute.xlu1 %2344 }
  0xeb   :  { %v2343_v20 = vpop.permute.xlu0 %2342 }
  0xec   :  { %1336 = vrot.lane.b32.xlu1 %v1257_v32, %s5728_s20 }
  0xed   :  { %1334 = vrot.lane.b32.xlu0 %v1254_v21, %s5728_s20 }
  0xee   :  { %v7132_v38 = vpop.permute.xlu1 %2568 }
  0xef   :  { %v2567_v14 = vpop.permute.xlu0 %2566 }
  0xf0   :  { %1560 = vrot.lane.b32.xlu1 %v5025_v53, %s5727_s28  ;;  %v7160_v53 = vcombine.low %v54_v50, %v7143_v48 }
  0xf1   :  { %1558 = vrot.lane.b32.xlu0 %v5024_v37, %s5727_s28  ;;  %v2885_v37 = vshll.u32 %v7135_v63, 16 }
  0xf2   :  { %v3113_v34 = vpop.permute.xlu1 %3112 }
  0xf3   :  { %v3111_v47 = vpop.permute.xlu0 %3110 }
  0xf4   :  { %2104 = vrot.lane.b32.xlu1 %v1881_v54, %s5730_s25 }
  0xf5   :  { %10 = vsyncpa [#allocation3], 0  ;;  %v3434_v1 = vsel %vm3418_vm2, %v6225_v44, %v7015_v16  ;;  %v3692_v32 = vsel %vm3678_vm6, %v3627_v43, %v2343_v20  ;;  %2102 = vrot.lane.b32.xlu0 %v1869_v12, %s5730_s25  ;;  %v860_v29 = vshll.u32 %v7160_v53, 16  ;;  %v4896_v9 = vld [vmem:[%s9206_s0 + $0xc0] sm:$0xe]  ;;  %v7198_v51 = vcombine.low %v56_v59, %v7168_v0  ;;  %s5737_s19 = smov [#allocation2]  }
  0xf6   :  { %v3499_v21 = vsel %vm3483_vm3, %v3434_v1, %v7034_v28  ;;  %v3757_v30 = vsel %vm3743_vm7, %v3692_v32, %v2567_v14  ;;  %v7203_v5 = vpop.permute.xlu1 %1065  ;;  %v2887_v44 = vrot.slane %v2885_v37, 1  ;;  %v2890_v16 = vshll.u32 %v7152_v31, 16  ;;  %v4897_v54 = vld [vmem:[%s9206_s0 + $0xcc] sm:$0xe]  ;;  %s4650_s22 = sshll.u32 %s5737_s19, 4  ;;  %s4651_s22 = int_to_ptr.vmem [resolvable:$true] %s4650_s22 }
  0xf7   :  { %v3564_v20 = vsel %vm3548_vm4, %v3499_v21, %v7065_v45  ;;  %v3822_v33 = vsel %vm3808_vm8, %v3757_v30, %v3111_v47  ;;  %v3367_v35 = vpop.permute.xlu0 %3366  ;;  %v2904_v62 = vrot.slane %v2902_v52, 1  ;;  %v865_v55 = vshll.u32 %v7182_v6, 16  ;;  %v7218_v45 = vld [vmem:[%s9206_s0 + $0xec] ss:$0 sps:$4 sm:$0x11]   ;;  %s5705_s23 = scalar_lea.vmem %s4651_s22, 32  ;;  %p5710_p1 = scmp.lt.s32.totalorder %s4651_s22, %s4651_s22 }
  0xf8   :  { %v3629_v10 = vsel %vm3613_vm5, %v3564_v20, %v7087_v22  ;;  %v3887_v28 = vsel %vm3873_vm9, %v3822_v33, %v3367_v35  ;;  %2360 = vrot.lane.b32.xlu1 %v2281_v27, %s5731_s13  ;;  %v2900_v42 = vor.u32 %v2899_v49, %v2895_v7  ;;  %v5184_v8 = vcombine.low %v4896_v9, %v7119_v24  ;;  %v7257_v52 = vld [vmem:[%s9206_s0 + $0xf4] sm:$0xf]  ;;  %v7270_v49 = vld [vmem:[%s9206_s0 + $0xe8] sm:$0xf]  ;;  %p5706_p0 = scmp.ne.s32.totalorder %s4651_s22, %s5705_s23  ;;  %p5711_p2 = scmp.lt.s32.totalorder %s5705_s23, %s5705_s23 }
  0xf9   :  { %v3694_v50 = vsel %vm3678_vm6, %v3629_v10, %v7109_v4  ;;  %2358 = vrot.lane.b32.xlu0 %v2278_v61, %s5731_s13  ;;  %5318 = vmatprep.mubr.msk.bf16.mxu0 %vm3938_vm10, %v3887_v28  ;;  %v858_v22 = vshrl.u32 %v7160_v53, 16  ;;  %v862_v14 = vrot.slane %v860_v29, 1  ;;  %v872_v3 = vshll.u32 %v7198_v51, 16  ;;  %v134_v61 = vld [vmem:[%s9206_s0 + $0xd8] sm:$0xe] }
  0xfa   :  { %v3759_v24 = vsel %vm3743_vm7, %v3694_v50, %v7132_v38  ;;  %v7228_v26 = vpop.permute.xlu1 %1067  ;;  %v2888_v18 = vor.u32 %v2887_v44, %v2883_v41  ;;  %v2892_v58 = vrot.slane %v2890_v16, 1  ;;  %v867_v4 = vrot.slane %v865_v55, 1  ;;  %v7292_v10 = vld [vmem:[%s9206_s0 + $0xf8] ss:$0 sps:$4 sm:$0x11]   ;;  %p5712_p3 = por %p5711_p2, %p5710_p1 }
  0xfb   :  { %v3824_v2 = vsel %vm3808_vm8, %v3759_v24, %v3113_v34  ;;  %v3369_v23 = vpop.permute.xlu0 %3368  ;;  %v3300_v56 = vrot.slane %v5184_v8, 1  ;;  %v3301_v38 = vrot.slane %v7152_v31, 1  ;;  %v877_v12 = vshll.u32 %v7218_v45, 16  ;;  %v135_v31 = vld [vmem:[%s9206_s0 + $0xe4] sm:$0xe] }
  0xfc   :  { %v3889_v59 = vsel %vm3873_vm9, %v3824_v2, %v3369_v23  ;;  %2584 = vrot.lane.b32.xlu1 %v7124_v46, %s5732_s21  ;;  %v2905_v34 = vsel %vm664_vm1, %v2900_v42, %v2904_v62  ;;  %v863_v37 = vor.u32 %v862_v14, %v858_v22  ;;  %v870_v60 = vshrl.u32 %v7198_v51, 16  ;;  %v5566_v50 = vld [vmem:[%s9206_s0 + $0xec] ss:$0 sps:$4 sm:$0x11]   ;;  %v7317_v23 = vld [vmem:[%s9206_s0 + $0x100] sm:$0xf]  ;;  %p5713_p4 = pnand %p5712_p3, %p5706_p0 }
  0xfd   :  { %2582 = vrot.lane.b32.xlu0 %v7135_v63, %s5732_s21  ;;  %5319 = vmatmul.mubr.msk.bf16.gmra.mxu0 %vm3938_vm10, %v3889_v59  ;;  %v874_v47 = vrot.slane %v872_v3, 1  ;;  %v2893_v46 = vsel %vm664_vm1, %v2888_v18, %v2892_v58  ;;  %v5185_v7 = vcombine.low %v4897_v54, %v7102_v57  ;;  %v4692_v63 = vld [vmem:[%s9206_s0 + $0xf0] sm:$0xf]  ;;  %v4690_v57 = vld [vmem:[%s9206_s0 + $0xe4] sm:$0xf]  ;;  %v3302_v41 = vsel %vm1209_vm0, %v3300_v56, %v3301_v38 }
  0xfe   :  { %v7244_v27 = vpop.permute.xlu1 %1324  ;;  %v879_v1 = vrot.slane %v877_v12, 1  ;;  %v868_v32 = vsel %vm664_vm1, %v863_v37, %v867_v4  ;;  %v4995_v9 = vcombine.low %v135_v31, %v7168_v0  ;;  %v5027_v21 = vcombine.low %v4692_v63, %v7257_v52  ;;  %v4770_v3 = vld [vmem:[%s9206_s0 + $0xe4] sm:$0xe]  ;;  %v7340_v63 = vld [vmem:[%s9206_s0 + $0x104] ss:$0 sps:$4 sm:$0x11]  }
  0xff   :  { %v7259_v43 = vpop.permute.xlu0 %1322  ;;  %v875_v29 = vor.u32 %v874_v47, %v870_v60  ;;  %v3303_v44 = vrot.slane %v5185_v7, 1  ;;  %v3304_v16 = vrot.slane %v7130_v36, 1  ;;  %v4994_v20 = vcombine.low %v134_v61, %v7143_v48  ;;  %v4818_v60 = vld [vmem:[%s9206_s0 + $0xf0] sm:$0xf]  ;;  %v7330_v47 = vld [vmem:[%s9206_s0 + $0xf4] sm:$0xf] }
 0x100   :  { %3128 = vrot.lane.b32.xlu1 %v2905_v34, %s5733_s15  ;;  %v5026_v33 = vcombine.low %v4690_v57, %v7270_v49  ;;  %v1261_v0 = vrot.slane %v4995_v9, 1  ;;  %v1262_v55 = vrot.slane %v7218_v45, 1  ;;  %v1897_v36 = vshll.u32 %v5027_v21, 16  ;;  %v4771_v45 = vld [vmem:[%s9206_s0 + $0xf0] sm:$0xe] }
 0x101   :  { %3126 = vrot.lane.b32.xlu0 %v2893_v46, %s5733_s15  ;;  %v880_v62 = vsel %vm664_vm1, %v875_v29, %v879_v1  ;;  %v3305_v28 = vsel %vm1209_vm0, %v3303_v44, %v3304_v16  ;;  %v1258_v42 = vrot.slane %v4994_v20, 1  ;;  %v1259_v8 = vrot.slane %v7182_v6, 1  ;;  %v4820_v6 = vld [vmem:[%s9206_s0 + $0xfc] sm:$0xf]  ;;  %v7353_v1 = vld [vmem:[%s9206_s0 + $0xf4] sm:$0xf] }
 0x102   :  { %v7278_v30 = vpop.permute.xlu1 %1548  ;;  %v1885_v22 = vshll.u32 %v5026_v33, 16  ;;  %v1263_v24 = vsel %vm1209_vm0, %v1261_v0, %v1262_v55  ;;  %v1895_v18 = vshrl.u32 %v5027_v21, 16  ;;  %v1899_v58 = vrot.slane %v1897_v36, 1  ;;  %v7366_v55 = vld [vmem:[%s9206_s0 + $0xf8] ss:$0 sps:$4 sm:$0x11]  }
 0x103   :  { %v7283_v35 = vpop.permute.xlu0 %1546  ;;  %v1902_v2 = vshll.u32 %v7292_v10, 16  ;;  %v1260_v54 = vsel %vm1209_vm0, %v1258_v42, %v1259_v8  ;;  %v1883_v59 = vshrl.u32 %v5026_v33, 16  ;;  %v1890_v38 = vshll.u32 %v5566_v50, 16 }
 0x104   :  { %1081 = vrot.lane.b32.xlu1 %v868_v32, %s5729_s7  ;;  %v1887_v56 = vrot.slane %v1885_v22, 1  ;;  %v5091_v34 = vcombine.low %v4771_v45, %v7257_v52  ;;  %v5090_v37 = vcombine.low %v4770_v3, %v7270_v49  ;;  %v7334_v46 = vcombine.low %v4820_v6, %v7317_v23  ;;  %v7391_v45 = vld [vmem:[%s9206_s0 + $0xf8] ss:$0 sps:$4 sm:$0x11]  }
 0x105   :  { %3382 = vrot.lane.b32.xlu0 %v3302_v41, %s5734_s18  ;;  %v1900_v7 = vor.u32 %v1899_v58, %v1895_v18  ;;  %v1904_v31 = vrot.slane %v1902_v2, 1  ;;  %v1892_v57 = vrot.slane %v1890_v38, 1  ;;  %v7345_v49 = vcombine.low %v4818_v60, %v7330_v47  ;;  %v58_v41 = vld [vmem:[%s9206_s0 + $0xf0] sm:$0xf] }
 0x106   :  { %v7294_v48 = vpop.permute.xlu1 %2092  ;;  %v1888_v61 = vor.u32 %v1887_v56, %v1883_v59  ;;  %v2285_v29 = vrot.slane %v5091_v34, 1  ;;  %v2286_v9 = vrot.slane %v7292_v10, 1  ;;  %v2282_v44 = vrot.slane %v5090_v37, 1 }
 0x107   :  { %v2091_v14 = vpop.permute.xlu0 %2090  ;;  %v2283_v16 = vrot.slane %v5566_v50, 1  ;;  %v2921_v20 = vshll.u32 %v7334_v46, 16  ;;  %v1905_v0 = vsel %vm664_vm1, %v1900_v7, %v1904_v31  ;;  %v7369_v10 = vcombine.low %v58_v41, %v7353_v1 }
 0x108   :  { %1083 = vrot.lane.b32.xlu1 %v880_v62, %s5729_s7  ;;  %v3436_v62 = vsel %vm3418_vm2, %v6332_v11, %v7203_v5  ;;  %v2909_v11 = vshll.u32 %v7345_v49, 16  ;;  %v60_v5 = vld [vmem:[%s9206_s0 + $0xfc] sm:$0xf]  ;;  %v2926_v22 = vshll.u32 %v7340_v63, 16  ;;  %v2919_v6 = vshrl.u32 %v7334_v46, 16 }
 0x109   :  { %3384 = vrot.lane.b32.xlu0 %v3305_v28, %s5734_s18  ;;  %v1893_v28 = vsel %vm664_vm1, %v1888_v61, %v1892_v57  ;;  %v2284_v50 = vsel %vm1209_vm0, %v2282_v44, %v2283_v16  ;;  %v3438_v18 = vsel %vm3418_vm2, %v6354_v25, %v7228_v26  ;;  %v884_v2 = vshll.u32 %v7369_v10, 16 }
 0x10a   :  { %v7319_v4 = vpop.permute.xlu1 %2348  ;;  %v3503_v59 = vsel %vm3483_vm3, %v3438_v18, %v7244_v27  ;;  %v2911_v25 = vrot.slane %v2909_v11, 1  ;;  %v2914_v26 = vshll.u32 %v7366_v55, 16  ;;  %v2928_v60 = vrot.slane %v2926_v22, 1  ;;  %v7466_v22 = vld [vmem:[%s9206_s0 + $0x10c] sm:$0xf] }
 0x10b   :  { %v2347_v12 = vpop.permute.xlu0 %2346  ;;  %v889_v7 = vshll.u32 %v7391_v45, 16  ;;  %vm5736_vm11 = vmmov 0   ;;  %vm4585_vm12 = vcmask 1041409  }
 0x10c   :  { %1340 = vrot.lane.b32.xlu1 %v1263_v24, %s5728_s20  ;;  %v2923_v24 = vrot.slane %v2921_v20, 1  ;;  %v2916_v16 = vrot.slane %v2914_v26, 1  ;;  %v3310_v26 = vrot.slane %v7340_v63, 1 }
 0x10d   :  { %1338 = vrot.lane.b32.xlu0 %v1260_v54, %s5728_s20 }
 0x10e   :  { %v7342_v52 = vpop.permute.xlu1 %2572  ;;  %v2924_v61 = vor.u32 %v2923_v24, %v2919_v6  ;;  %v136_v6 = vld [vmem:[%s9206_s0 + $0xf0] sm:$0xe]  ;;  %v7479_v24 = vld [vmem:[%s9206_s0 + $0x100] sm:$0xf] }
 0x10f   :  { %v2571_v32 = vpop.permute.xlu0 %2570 }
 0x110   :  { %1564 = vrot.lane.b32.xlu1 %v5027_v21, %s5727_s28  ;;  %v3501_v21 = vsel %vm3483_vm3, %v3436_v62, %v7259_v43  ;;  %v2287_v43 = vsel %vm1209_vm0, %v2285_v29, %v2286_v9 }
 0x111   :  { %1562 = vrot.lane.b32.xlu0 %v5026_v33, %s5727_s28  ;;  %v7381_v33 = vld [vmem:[%s9206_s0 + $0x100] sm:$0xf]  ;;  %v3566_v42 = vsel %vm3548_vm4, %v3501_v21, %v7283_v35  ;;  %v2907_v35 = vshrl.u32 %v7345_v49, 16 }
 0x112   :  { %v3117_v36 = vpop.permute.xlu1 %3116  ;;  %v3631_v3 = vsel %vm3613_vm5, %v3566_v42, %v2091_v14  ;;  %v4898_v14 = vld [vmem:[%s9206_s0 + $0xf0] sm:$0xe]  ;;  %v7407_v54 = vcombine.low %v60_v5, %v7381_v33 }
 0x113   :  { %v3115_v8 = vpop.permute.xlu0 %3114  ;;  %v3696_v58 = vsel %vm3678_vm6, %v3631_v3, %v2347_v12  ;;  %v3568_v12 = vsel %vm3548_vm4, %v3503_v59, %v7278_v30  ;;  %v5186_v57 = vcombine.low %v4898_v14, %v7330_v47  ;;  %v7427_v30 = vld [vmem:[%s9206_s0 + $0x104] ss:$0 sps:$4 sm:$0x11]   ;;  %v2912_v44 = vor.u32 %v2911_v25, %v2907_v35 }
 0x114   :  { %2108 = vrot.lane.b32.xlu1 %v1905_v0, %s5730_s25  ;;  %v3761_v56 = vsel %vm3743_vm7, %v3696_v58, %v2571_v32  ;;  %v3633_v31 = vsel %vm3613_vm5, %v3568_v12, %v7294_v48  ;;  %v882_v48 = vshrl.u32 %v7369_v10, 16  ;;  %v886_v32 = vrot.slane %v884_v2, 1  ;;  %v4899_v0 = vld [vmem:[%s9206_s0 + $0xfc] sm:$0xe] }
 0x115   :  { %2106 = vrot.lane.b32.xlu0 %v1893_v28, %s5730_s25  ;;  %v3826_v34 = vsel %vm3808_vm8, %v3761_v56, %v3115_v8  ;;  %v3698_v41 = vsel %vm3678_vm6, %v3633_v31, %v7319_v4  ;;  %v896_v29 = vshll.u32 %v7407_v54, 16  ;;  %v3307_v4 = vrot.slane %v7366_v55, 1  ;;  %v7501_v31 = vld [vmem:[%s9206_s0 + $0x110] ss:$0 sps:$4 sm:$0x11]  }
 0x116   :  { %v7412_v38 = vpop.permute.xlu1 %1069  ;;  %v3763_v47 = vsel %vm3743_vm7, %v3698_v41, %v7342_v52  ;;  %v891_v28 = vrot.slane %v889_v7, 1  ;;  %v3306_v52 = vrot.slane %v5186_v57, 1  ;;  %v901_v11 = vshll.u32 %v7427_v30, 16  ;;  %v7510_v41 = vld [vmem:[%s9206_s0 + $0x104] ss:$0 sps:$4 sm:$0x11]  }
 0x117   :  { %v3371_v37 = vpop.permute.xlu0 %3370  ;;  %v3828_v20 = vsel %vm3808_vm8, %v3763_v47, %v3117_v36  ;;  %v2929_v55 = vsel %vm664_vm1, %v2924_v61, %v2928_v60  ;;  %v887_v36 = vor.u32 %v886_v32, %v882_v48  ;;  %v894_v5 = vshrl.u32 %v7407_v54, 16  ;;  %v4773_v32 = vld [vmem:[%s9206_s0 + $0x108] sm:$0xe] }
 0x118   :  { %v3891_v27 = vsel %vm3873_vm9, %v3826_v34, %v3371_v37  ;;  %2364 = vrot.lane.b32.xlu1 %v2287_v43, %s5731_s13  ;;  %v898_v42 = vrot.slane %v896_v29, 1  ;;  %v2917_v43 = vsel %vm664_vm1, %v2912_v44, %v2916_v16  ;;  %v3308_v35 = vsel %vm1209_vm0, %v3306_v52, %v3307_v4  ;;  %v4772_v29 = vld [vmem:[%s9206_s0 + $0xfc] sm:$0xe] }
 0x119   :  { %2362 = vrot.lane.b32.xlu0 %v2284_v50, %s5731_s13  ;;  %5322 = vmatprep.mubr.msk.bf16.mxu0 %vm3938_vm10, %v3891_v27  ;;  %v137_v50 = vld [vmem:[%s9206_s0 + $0xfc] sm:$0xe]  ;;  %v903_v18 = vrot.slane %v901_v11, 1  ;;  %v892_v58 = vsel %vm664_vm1, %v887_v36, %v891_v28  ;;  %v4996_v12 = vcombine.low %v136_v6, %v7353_v1  ;;  %v1268_v7 = vrot.slane %v7427_v30, 1  ;;  %v4822_v36 = vld [vmem:[%s9206_s0 + $0x108] sm:$0xf] }
 0x11a   :  { %v7437_v9 = vpop.permute.xlu1 %1071  ;;  %v899_v2 = vor.u32 %v898_v42, %v894_v5  ;;  %v4997_v14 = vcombine.low %v137_v50, %v7381_v33  ;;  %v1265_v57 = vrot.slane %v7391_v45, 1  ;;  %v4824_v45 = vld [vmem:[%s9206_s0 + $0x114] sm:$0xf]  ;;  %v1914_v52 = vshll.u32 %v7510_v41, 16  ;;  %v7541_v5 = vld [vmem:[%s9206_s0 + $0x10c] sm:$0xf] }
 0x11b   :  { %v3373_v62 = vpop.permute.xlu0 %3372  ;;  %v1264_v61 = vrot.slane %v4996_v12, 1  ;;  %v5092_v42 = vcombine.low %v4772_v29, %v7479_v24  ;;  %v2289_v12 = vrot.slane %v7510_v41, 1 }
 0x11c   :  { %v3893_v21 = vsel %vm3873_vm9, %v3828_v20, %v3373_v62  ;;  %2588 = vrot.lane.b32.xlu1 %v7334_v46, %s5732_s21  ;;  %v5187_v46 = vcombine.low %v4899_v0, %v7317_v23  ;;  %v4694_v23 = vld [vmem:[%s9206_s0 + $0xfc] sm:$0xf]  ;;  %v904_v60 = vsel %vm664_vm1, %v899_v2, %v903_v18  ;;  %v1267_v33 = vrot.slane %v4997_v14, 1  ;;  %v7528_v62 = vld [vmem:[%s9206_s0 + $0x118] sm:$0xf] }
 0x11d   :  { %2586 = vrot.lane.b32.xlu0 %v7345_v49, %s5732_s21  ;;  %5323 = vmatmul.mubr.msk.bf16.gmra.mxu0 %vm3938_vm10, %v3893_v21  ;;  %v4696_v49 = vld [vmem:[%s9206_s0 + $0x108] sm:$0xf]  ;;  %v5028_v34 = vcombine.low %v4694_v23, %v7479_v24  ;;  %v1926_v20 = vshll.u32 %v7501_v31, 16  ;;  %v1266_v0 = vsel %vm1209_vm0, %v1264_v61, %v1265_v57  ;;  %v1916_v23 = vrot.slane %v1914_v52, 1  ;;  %v7565_v18 = vld [vmem:[%s9206_s0 + $0x10c] sm:$0xf] }
 0x11e   :  { %v7453_v8 = vpop.permute.xlu1 %1328  ;;  %v5029_v59 = vcombine.low %v4696_v49, %v7466_v22  ;;  %v3309_v25 = vrot.slane %v5187_v46, 1  ;;  %v1269_v47 = vsel %vm1209_vm0, %v1267_v33, %v1268_v7  ;;  %v7552_v49 = vld [vmem:[%s9206_s0 + $0x11c] ss:$0 sps:$4 sm:$0x11]   ;;  %v62_v24 = vld [vmem:[%s9206_s0 + $0x108] sm:$0xf]  ;;  %v3440_v33 = vsel %vm3418_vm2, %v6525_v13, %v7412_v38 }
 0x11f   :  { %v7468_v3 = vpop.permute.xlu0 %1326  ;;  %v1909_v48 = vshll.u32 %v5028_v34, 16  ;;  %v1907_v21 = vshrl.u32 %v5028_v34, 16  ;;  %v1928_v50 = vrot.slane %v1926_v20, 1  ;;  %v2292_v14 = vrot.slane %v7501_v31, 1  ;;  %v64_v57 = vld [vmem:[%s9206_s0 + $0x114] sm:$0xf] }
 0x120   :  { %3132 = vrot.lane.b32.xlu1 %v2929_v55, %s5733_s15  ;;  %v1921_v63 = vshll.u32 %v5029_v59, 16  ;;  %v3311_v27 = vsel %vm1209_vm0, %v3309_v25, %v3310_v26  ;;  %v1919_v44 = vshrl.u32 %v5029_v59, 16  ;;  %v5093_v55 = vcombine.low %v4773_v32, %v7466_v22  ;;  %v7571_v25 = vld [vmem:[%s9206_s0 + $0x110] ss:$0 sps:$4 sm:$0x11]  }
 0x121   :  { %3130 = vrot.lane.b32.xlu0 %v2917_v43, %s5733_s15  ;;  %v1911_v28 = vrot.slane %v1909_v48, 1  ;;  %v7546_v43 = vcombine.low %v4824_v45, %v7528_v62  ;;  %v2288_v26 = vrot.slane %v5092_v42, 1  ;;  %v7582_v31 = vcombine.low %v62_v24, %v7565_v18  ;;  %v7594_v13 = vld [vmem:[%s9206_s0 + $0x118] sm:$0xf] }
 0x122   :  { %v7487_v56 = vpop.permute.xlu1 %1552  ;;  %v1923_v16 = vrot.slane %v1921_v63, 1  ;;  %v2291_v2 = vrot.slane %v5093_v55, 1  ;;  %v3505_v63 = vsel %vm3483_vm3, %v3440_v33, %v7468_v3  ;;  %v2950_v41 = vshll.u32 %v7552_v49, 16  ;;  %v7604_v32 = vld [vmem:[%s9206_s0 + $0x110] ss:$0 sps:$4 sm:$0x11]  }
 0x123   :  { %v7492_v37 = vpop.permute.xlu0 %1550  ;;  %v1912_v6 = vor.u32 %v1911_v28, %v1907_v21  ;;  %v2938_v48 = vshll.u32 %v7571_v25, 16  ;;  %v2290_v45 = vsel %vm1209_vm0, %v2288_v26, %v2289_v12  ;;  %v908_v20 = vshll.u32 %v7582_v31, 16 }
 0x124   :  { %1085 = vrot.lane.b32.xlu1 %v892_v58, %s5729_s7  ;;  %v1924_v46 = vor.u32 %v1923_v16, %v1919_v44  ;;  %v3570_v38 = vsel %vm3548_vm4, %v3505_v63, %v7492_v37  ;;  %v2293_v3 = vsel %vm1209_vm0, %v2291_v2, %v2292_v14  ;;  %v2943_v37 = vshrl.u32 %v7546_v43, 16 }
 0x125   :  { %3386 = vrot.lane.b32.xlu0 %v3308_v35, %s5734_s18  ;;  %v7557_v35 = vcombine.low %v4822_v36, %v7541_v5  ;;  %v3442_v44 = vsel %vm3418_vm2, %v6559_v39, %v7437_v9  ;;  %v2952_v42 = vrot.slane %v2950_v41, 1  ;;  %v2940_v12 = vrot.slane %v2938_v48, 1  ;;  %v139_v41 = vld [vmem:[%s9206_s0 + $0x114] sm:$0xe]  ;;  %v7679_v48 = vld [vmem:[%s9206_s0 + $0x124] sm:$0xf] }
 0x126   :  { %v7503_v1 = vpop.permute.xlu1 %2096  ;;  %v1929_v7 = vsel %vm664_vm1, %v1924_v46, %v1928_v50  ;;  %v3507_v21 = vsel %vm3483_vm3, %v3442_v44, %v7453_v8  ;;  %v913_v46 = vshll.u32 %v7604_v32, 16 }
 0x127   :  { %v2095_v30 = vpop.permute.xlu0 %2094  ;;  %v2933_v61 = vshll.u32 %v7557_v35, 16  ;;  %v2931_v39 = vshrl.u32 %v7557_v35, 16 }
 0x128   :  { %1087 = vrot.lane.b32.xlu1 %v904_v60, %s5729_s7  ;;  %v2945_v60 = vshll.u32 %v7546_v43, 16  ;;  %v3635_v29 = vsel %vm3613_vm5, %v3570_v38, %v2095_v30  ;;  %v4900_v30 = vld [vmem:[%s9206_s0 + $0x108] sm:$0xe] }
 0x129   :  { %3388 = vrot.lane.b32.xlu0 %v3311_v27, %s5734_s18  ;;  %v1917_v27 = vsel %vm664_vm1, %v1912_v6, %v1916_v23  ;;  %v2935_v9 = vrot.slane %v2933_v61, 1  ;;  %v906_v6 = vshrl.u32 %v7582_v31, 16  ;;  %v5188_v23 = vcombine.low %v4900_v30, %v7541_v5 }
 0x12a   :  { %v7530_v4 = vpop.permute.xlu1 %2352  ;;  %v4999_v30 = vcombine.low %v139_v41, %v7594_v13 }
 0x12b   :  { %v2351_v11 = vpop.permute.xlu0 %2350  ;;  %v2936_v26 = vor.u32 %v2935_v9, %v2931_v39  ;;  %v3316_v9 = vrot.slane %v7552_v49, 1 }
 0x12c   :  { %1344 = vrot.lane.b32.xlu1 %v1269_v47, %s5728_s20  ;;  %v2947_v47 = vrot.slane %v2945_v60, 1  ;;  %v3700_v16 = vsel %vm3678_vm6, %v3635_v29, %v2351_v11  ;;  %v3572_v11 = vsel %vm3548_vm4, %v3507_v21, %v7487_v56  ;;  %v7641_v56 = vld [vmem:[%s9206_s0 + $0x11c] ss:$0 sps:$4 sm:$0x11]  }
 0x12d   :  { %1342 = vrot.lane.b32.xlu0 %v1266_v0, %s5728_s20  ;;  %v7620_v0 = vcombine.low %v64_v57, %v7594_v13  ;;  %v3637_v50 = vsel %vm3613_vm5, %v3572_v11, %v7503_v1  ;;  %v925_v61 = vshll.u32 %v7641_v56, 16  ;;  %v1273_v13 = vrot.slane %v4999_v30, 1  ;;  %v7776_v30 = vld [vmem:[%s9206_s0 + $0x134] ss:$0 sps:$4 sm:$0x11]  }
 0x12e   :  { %v7554_v22 = vpop.permute.xlu1 %2576  ;;  %v3702_v24 = vsel %vm3678_vm6, %v3637_v50, %v7530_v4  ;;  %v2948_v1 = vor.u32 %v2947_v47, %v2943_v37  ;;  %v3313_v4 = vrot.slane %v7571_v25, 1  ;;  %v7692_v37 = vld [vmem:[%s9206_s0 + $0x118] sm:$0xf]  ;;  %v7714_v50 = vld [vmem:[%s9206_s0 + $0x128] ss:$0 sps:$4 sm:$0x11]  }
 0x12f   :  { %v2575_v58 = vpop.permute.xlu0 %2574  ;;  %v920_v2 = vshll.u32 %v7620_v0, 16  ;;  %v3767_v14 = vsel %vm3743_vm7, %v3702_v24, %v7554_v22  ;;  %v3312_v22 = vrot.slane %v5188_v23, 1  ;;  %v918_v57 = vshrl.u32 %v7620_v0, 16  ;;  %v5602_v24 = vld [vmem:[%s9206_s0 + $0x11c] ss:$0 sps:$4 sm:$0x11]  }
 0x130   :  { %1568 = vrot.lane.b32.xlu1 %v5029_v59, %s5727_s28  ;;  %v3765_v28 = vsel %vm3743_vm7, %v3700_v16, %v2575_v58  ;;  %v910_v58 = vrot.slane %v908_v20, 1  ;;  %v2953_v25 = vsel %vm664_vm1, %v2948_v1, %v2952_v42  ;;  %v927_v44 = vrot.slane %v925_v61, 1 }
 0x131   :  { %1566 = vrot.lane.b32.xlu0 %v5028_v34, %s5727_s28  ;;  %v922_v38 = vrot.slane %v920_v2, 1  ;;  %v3314_v47 = vsel %vm1209_vm0, %v3312_v22, %v3313_v4  ;;  %v1271_v23 = vrot.slane %v7604_v32, 1  ;;  %v4774_v2 = vld [vmem:[%s9206_s0 + $0x114] sm:$0xe]  ;;  %v4828_v32 = vld [vmem:[%s9206_s0 + $0x12c] sm:$0xf] }
 0x132   :  { %v3121_v59 = vpop.permute.xlu1 %3120  ;;  %v1938_v22 = vshll.u32 %v5602_v24, 16 }
 0x133   :  { %v3119_v34 = vpop.permute.xlu0 %3118  ;;  %v3832_v60 = vsel %vm3808_vm8, %v3767_v14, %v3121_v59  ;;  %v911_v59 = vor.u32 %v910_v58, %v906_v6  ;;  %v923_v20 = vor.u32 %v922_v38, %v918_v57  ;;  %v7751_v57 = vld [vmem:[%s9206_s0 + $0x124] sm:$0xf]  ;;  %v5094_v38 = vcombine.low %v4774_v2, %v7692_v37 }
 0x134   :  { %2112 = vrot.lane.b32.xlu1 %v1929_v7, %s5730_s25  ;;  %v3830_v55 = vsel %vm3808_vm8, %v3765_v28, %v3119_v34  ;;  %v4901_v7 = vld [vmem:[%s9206_s0 + $0x114] sm:$0xe] }
 0x135   :  { %2110 = vrot.lane.b32.xlu0 %v1917_v27, %s5730_s25  ;;  %v915_v27 = vrot.slane %v913_v46, 1  ;;  %v928_v42 = vsel %vm664_vm1, %v923_v20, %v927_v44  ;;  %v1274_v46 = vrot.slane %v7641_v56, 1  ;;  %v4775_v56 = vld [vmem:[%s9206_s0 + $0x120] sm:$0xe]  ;;  %v2298_v20 = vrot.slane %v7714_v50, 1 }
 0x136   :  { %v7625_v52 = vpop.permute.xlu1 %1073 }
 0x137   :  { %v3375_v36 = vpop.permute.xlu0 %3374  ;;  %v916_v16 = vsel %vm664_vm1, %v911_v59, %v915_v27  ;;  %v1275_v14 = vsel %vm1209_vm0, %v1273_v13, %v1274_v46  ;;  %v4826_v59 = vld [vmem:[%s9206_s0 + $0x120] sm:$0xf]  ;;  %v7788_v46 = vld [vmem:[%s9206_s0 + $0x128] ss:$0 sps:$4 sm:$0x11]  }
 0x138   :  { %v3895_v8 = vsel %vm3873_vm9, %v3830_v55, %v3375_v36  ;;  %2368 = vrot.lane.b32.xlu1 %v2293_v3, %s5731_s13  ;;  %v2941_v3 = vsel %vm664_vm1, %v2936_v26, %v2940_v12 }
 0x139   :  { %2366 = vrot.lane.b32.xlu0 %v2290_v45, %s5731_s13  ;;  %5326 = vmatprep.mubr.msk.bf16.mxu0 %vm3938_vm10, %v3895_v8  ;;  %v138_v45 = vld [vmem:[%s9206_s0 + $0x108] sm:$0xe] }
 0x13a   :  { %v7650_v5 = vpop.permute.xlu1 %1075  ;;  %v4998_v11 = vcombine.low %v138_v45, %v7565_v18  ;;  %v1940_v45 = vrot.slane %v1938_v22, 1 }
 0x13b   :  { %v3377_v33 = vpop.permute.xlu0 %3376 }
 0x13c   :  { %v3897_v63 = vsel %vm3873_vm9, %v3832_v60, %v3377_v33  ;;  %2592 = vrot.lane.b32.xlu1 %v7546_v43, %s5732_s21  ;;  %v5189_v43 = vcombine.low %v4901_v7, %v7528_v62  ;;  %v4698_v62 = vld [vmem:[%s9206_s0 + $0x114] sm:$0xf]  ;;  %v1270_v6 = vrot.slane %v4998_v11, 1  ;;  %v1950_v60 = vshll.u32 %v7714_v50, 16  ;;  %v7739_v33 = vld [vmem:[%s9206_s0 + $0x130] sm:$0xf] }
 0x13d   :  { %2590 = vrot.lane.b32.xlu0 %v7557_v35, %s5732_s21  ;;  %5327 = vmatmul.mubr.msk.bf16.gmra.mxu0 %vm3938_vm10, %v3897_v63  ;;  %v4700_v35 = vld [vmem:[%s9206_s0 + $0x120] sm:$0xf]  ;;  %v5030_v55 = vcombine.low %v4698_v62, %v7692_v37  ;;  %v7762_v62 = vcombine.low %v4826_v59, %v7751_v57  ;;  %v7770_v37 = vld [vmem:[%s9206_s0 + $0x124] sm:$0xf] }
 0x13e   :  { %v7666_v34 = vpop.permute.xlu1 %1332  ;;  %v5031_v21 = vcombine.low %v4700_v35, %v7679_v48  ;;  %v3315_v39 = vrot.slane %v5189_v43, 1  ;;  %v1272_v7 = vsel %vm1209_vm0, %v1270_v6, %v1271_v23  ;;  %v1952_v41 = vrot.slane %v1950_v60, 1 }
 0x13f   :  { %v7681_v29 = vpop.permute.xlu0 %1330  ;;  %v1933_v1 = vshll.u32 %v5030_v55, 16  ;;  %v1931_v63 = vshrl.u32 %v5030_v55, 16 }
 0x140   :  { %3136 = vrot.lane.b32.xlu1 %v2953_v25, %s5733_s15  ;;  %v1945_v49 = vshll.u32 %v5031_v21, 16  ;;  %v3317_v8 = vsel %vm1209_vm0, %v3315_v39, %v3316_v9  ;;  %v1943_v26 = vshrl.u32 %v5031_v21, 16  ;;  %v5095_v25 = vcombine.low %v4775_v56, %v7679_v48 }
 0x141   :  { %3134 = vrot.lane.b32.xlu0 %v2941_v3, %s5733_s15  ;;  %v1935_v27 = vrot.slane %v1933_v1, 1  ;;  %v7756_v3 = vcombine.low %v4828_v32, %v7739_v33  ;;  %v2294_v39 = vrot.slane %v5094_v38, 1  ;;  %v2295_v9 = vrot.slane %v5602_v24, 1  ;;  %v4902_v38 = vld [vmem:[%s9206_s0 + $0x120] sm:$0xe] }
 0x142   :  { %v7700_v28 = vpop.permute.xlu1 %1556  ;;  %v1947_v12 = vrot.slane %v1945_v49, 1  ;;  %v2974_v1 = vshll.u32 %v7776_v30, 16 }
 0x143   :  { %v7705_v36 = vpop.permute.xlu0 %1554  ;;  %v1936_v48 = vor.u32 %v1935_v27, %v1931_v63  ;;  %v2969_v11 = vshll.u32 %v7756_v3, 16  ;;  %v2967_v24 = vshrl.u32 %v7756_v3, 16  ;;  %v2296_v2 = vsel %vm1209_vm0, %v2294_v39, %v2295_v9 }
 0x144   :  { %1089 = vrot.lane.b32.xlu1 %v916_v16, %s5729_s7  ;;  %v1948_v43 = vor.u32 %v1947_v12, %v1943_v26  ;;  %v2297_v16 = vrot.slane %v5095_v25, 1  ;;  %v3446_v26 = vsel %vm3418_vm2, %v6772_v19, %v7650_v5  ;;  %v2962_v25 = vshll.u32 %v7788_v46, 16 }
 0x145   :  { %3390 = vrot.lane.b32.xlu0 %v3314_v47, %s5734_s18  ;;  %v66_v47 = vld [vmem:[%s9206_s0 + $0x120] sm:$0xf]  ;;  %v2971_v32 = vrot.slane %v2969_v11, 1  ;;  %v2976_v59 = vrot.slane %v2974_v1, 1  ;;  %v5190_v11 = vcombine.low %v4902_v38, %v7751_v57  ;;  %v141_v57 = vld [vmem:[%s9206_s0 + $0x12c] sm:$0xe] }
 0x146   :  { %v7716_v18 = vpop.permute.xlu1 %2100  ;;  %v1953_v13 = vsel %vm664_vm1, %v1948_v43, %v1952_v41  ;;  %v7791_v50 = vcombine.low %v66_v47, %v7770_v37  ;;  %v2964_v9 = vrot.slane %v2962_v25, 1  ;;  %v7887_v1 = vld [vmem:[%s9206_s0 + $0x13c] sm:$0xf] }
 0x147   :  { %v2099_v58 = vpop.permute.xlu0 %2098  ;;  %v2972_v41 = vor.u32 %v2971_v32, %v2967_v24  ;;  %v4704_v24 = vld [vmem:[%s9206_s0 + $0x138] sm:$0xf]  ;;  %v3319_v32 = vrot.slane %v7788_v46, 1  ;;  %v7908_v46 = vld [vmem:[%s9206_s0 + $0x130] sm:$0xf] }
 0x148   :  { %1091 = vrot.lane.b32.xlu1 %v928_v42, %s5729_s7  ;;  %v3444_v42 = vsel %vm3418_vm2, %v6734_v40, %v7625_v52  ;;  %v2957_v40 = vshll.u32 %v7762_v62, 16  ;;  %v68_v52 = vld [vmem:[%s9206_s0 + $0x12c] sm:$0xf]  ;;  %v7914_v25 = vcombine.low %v4704_v24, %v7887_v1 }
 0x149   :  { %3392 = vrot.lane.b32.xlu0 %v3317_v8, %s5734_s18  ;;  %v1941_v8 = vsel %vm664_vm1, %v1936_v48, %v1940_v45 }
 0x14a   :  { %v7741_v4 = vpop.permute.xlu1 %2356  ;;  %v2959_v22 = vrot.slane %v2957_v40, 1 }
 0x14b   :  { %v2355_v61 = vpop.permute.xlu0 %2354 }
 0x14c   :  { %1348 = vrot.lane.b32.xlu1 %v1275_v14, %s5728_s20  ;;  %v2955_v14 = vshrl.u32 %v7762_v62, 16 }
 0x14d   :  { %1346 = vrot.lane.b32.xlu0 %v1272_v7, %s5728_s20  ;;  %v3511_v7 = vsel %vm3483_vm3, %v3446_v26, %v7666_v34 }
 0x14e   :  { %v7759_v35 = vpop.permute.xlu1 %2580  ;;  %v3576_v19 = vsel %vm3548_vm4, %v3511_v7, %v7700_v28  ;;  %v7848_v28 = vld [vmem:[%s9206_s0 + $0x134] ss:$0 sps:$4 sm:$0x11]   ;;  %v2960_v39 = vor.u32 %v2959_v22, %v2955_v14  ;;  %v4702_v7 = vld [vmem:[%s9206_s0 + $0x12c] sm:$0xf]  ;;  %v3322_v22 = vrot.slane %v7776_v30, 1 }
 0x14f   :  { %v2579_v44 = vpop.permute.xlu0 %2578  ;;  %v3641_v34 = vsel %vm3613_vm5, %v3576_v19, %v7716_v18  ;;  %v930_v18 = vshrl.u32 %v7791_v50, 16  ;;  %v949_v40 = vshll.u32 %v7848_v28, 16 }
 0x150   :  { %1572 = vrot.lane.b32.xlu1 %v5031_v21, %s5727_s28  ;;  %v3509_v21 = vsel %vm3483_vm3, %v3444_v42, %v7681_v29  ;;  %v2299_v29 = vsel %vm1209_vm0, %v2297_v16, %v2298_v20  ;;  %v3706_v45 = vsel %vm3678_vm6, %v3641_v34, %v7741_v4  ;;  %v4903_v4 = vld [vmem:[%s9206_s0 + $0x12c] sm:$0xe] }
 0x151   :  { %1570 = vrot.lane.b32.xlu0 %v5030_v55, %s5727_s28  ;;  %v7803_v55 = vld [vmem:[%s9206_s0 + $0x130] sm:$0xf]  ;;  %v3574_v6 = vsel %vm3548_vm4, %v3509_v21, %v7705_v36  ;;  %v7817_v36 = vld [vmem:[%s9206_s0 + $0x128] ss:$0 sps:$4 sm:$0x11]   ;;  %v3771_v16 = vsel %vm3743_vm7, %v3706_v45, %v7759_v35  ;;  %v2977_v35 = vsel %vm664_vm1, %v2972_v41, %v2976_v59  ;;  %v1280_v45 = vrot.slane %v7848_v28, 1 }
 0x152   :  { %v3125_v49 = vpop.permute.xlu1 %3124  ;;  %v3639_v56 = vsel %vm3613_vm5, %v3574_v6, %v2099_v58  ;;  %v932_v58 = vshll.u32 %v7791_v50, 16  ;;  %v7826_v60 = vcombine.low %v68_v52, %v7803_v55  ;;  %v937_v48 = vshll.u32 %v7817_v36, 16  ;;  %v140_v52 = vld [vmem:[%s9206_s0 + $0x120] sm:$0xe] }
 0x153   :  { %v3123_v23 = vpop.permute.xlu0 %3122  ;;  %v3704_v12 = vsel %vm3678_vm6, %v3639_v56, %v2355_v61  ;;  %v3836_v42 = vsel %vm3808_vm8, %v3771_v16, %v3125_v49  ;;  %v7939_v28 = vld [vmem:[%s9206_s0 + $0x140] ss:$0 sps:$4 sm:$0x11]  }
 0x154   :  { %2116 = vrot.lane.b32.xlu1 %v1953_v13, %s5730_s25  ;;  %v3769_v63 = vsel %vm3743_vm7, %v3704_v12, %v2579_v44  ;;  %v934_v47 = vrot.slane %v932_v58, 1  ;;  %v944_v44 = vshll.u32 %v7826_v60, 16  ;;  %v942_v6 = vshrl.u32 %v7826_v60, 16 }
 0x155   :  { %2114 = vrot.lane.b32.xlu0 %v1941_v8, %s5730_s25  ;;  %v3834_v5 = vsel %vm3808_vm8, %v3769_v63, %v3123_v23  ;;  %v939_v8 = vrot.slane %v937_v48, 1  ;;  %v5001_v12 = vcombine.low %v141_v57, %v7803_v55  ;;  %v5000_v58 = vcombine.low %v140_v52, %v7770_v37  ;;  %v4777_v52 = vld [vmem:[%s9206_s0 + $0x138] sm:$0xe] }
 0x156   :  { %v7831_v27 = vpop.permute.xlu1 %1077  ;;  %v946_v23 = vrot.slane %v944_v44, 1 }
 0x157   :  { %v3379_v61 = vpop.permute.xlu0 %3378  ;;  %v1279_v48 = vrot.slane %v5001_v12, 1 }
 0x158   :  { %v3899_v43 = vsel %vm3873_vm9, %v3834_v5, %v3379_v61  ;;  %2372 = vrot.lane.b32.xlu1 %v2299_v29, %s5731_s13  ;;  %v5191_v29 = vcombine.low %v4903_v4, %v7739_v33  ;;  %v7896_v33 = vld [vmem:[%s9208_s2] ss:$0 sm:$0xff]  ;;  %v947_v19 = vor.u32 %v946_v23, %v942_v6  ;;  %v951_v5 = vrot.slane %v949_v40, 1 }
 0x159   :  { %2370 = vrot.lane.b32.xlu0 %v2296_v2, %s5731_s13  ;;  %5330 = vmatprep.mubr.msk.bf16.mxu0 %vm3938_vm10, %v3899_v43  ;;  %v3318_v2 = vrot.slane %v5190_v11, 1  ;;  %v7923_v43 = vcombine.low %v4702_v7, %v7908_v46  ;;  %v1281_v57 = vsel %vm1209_vm0, %v1279_v48, %v1280_v45  ;;  %v7980_v7 = vld [vmem:[%s9206_s0 + $0x13c] sm:$0xf] }
 0x15a   :  { %v7858_v20 = vpop.permute.xlu1 %1079  ;;  %v3321_v61 = vrot.slane %v5191_v29, 1  ;;  %v952_v11 = vsel %vm664_vm1, %v947_v19, %v951_v5 }
 0x15b   :  { %v3381_v13 = vpop.permute.xlu0 %3380  ;;  %v3320_v34 = vsel %vm1209_vm0, %v3318_v2, %v3319_v32  ;;  %v1955_v12 = vshrl.u32 %v7923_v43, 16 }
 0x15c   :  { %v3901_v21 = vsel %vm3873_vm9, %v3836_v42, %v3381_v13  ;;  %2596 = vrot.lane.b32.xlu1 %v7756_v3, %s5732_s21  ;;  %v935_v3 = vor.u32 %v934_v47, %v930_v18  ;;  %v1276_v18 = vrot.slane %v5000_v58, 1  ;;  %v1277_v47 = vrot.slane %v7817_v36, 1  ;;  %v7944_v36 = vld [vmem:[%s9206_s0 + $0x134] ss:$0 sps:$4 sm:$0x11]  }
 0x15d   :  { %v5308_v49 = vpop.f32.mrf.mxu0  ;;  %2594 = vrot.lane.b32.xlu0 %v7762_v62, %s5732_s21  ;;  %5331 = vmatmul.mubr.msk.bf16.gmra.mxu0 %vm3938_vm10, %v3901_v21  ;;  %v2965_v62 = vsel %vm664_vm1, %v2960_v39, %v2964_v9  ;;  %v1969_v9 = vshll.u32 %v7914_v25, 16  ;;  %v3323_v4 = vsel %vm1209_vm0, %v3321_v61, %v3322_v22  ;;  %v4830_v58 = vld [vmem:[%s9206_s0 + $0x138] sm:$0xf] }
 0x15e   :  { %v7889_v56 = vpop.permute.xlu1 %1336  ;;  %v940_v37 = vsel %vm664_vm1, %v935_v3, %v939_v8  ;;  %v4118_v59 = vadd.f32 %v5308_v49, %v7896_v33  ;;  %v1957_v8 = vshll.u32 %v7923_v43, 16  ;;  %v4832_v49 = vld [vmem:[%s9206_s0 + $0x144] sm:$0xf]  ;;  %v7962_v3 = vld [vmem:[%s9206_s0 + $0x148] sm:$0xf]  ;;  %v1278_v32 = vsel %vm1209_vm0, %v1276_v18, %v1277_v47 }
 0x15f   :  { %v4109_v14 = vpop.f32.mrf.mxu0  ;;  %v7898_v26 = vpop.permute.xlu0 %1334  ;;  %v1971_v24 = vrot.slane %v1969_v9, 1  ;;  %v7987_v19 = vcombine.low %v4832_v49, %v7962_v3  ;;  %v7994_v48 = vcombine.low %v4830_v58, %v7980_v7  ;;  %v8010_v9 = vld [vmem:[%s9206_s0 + $0x14c] ss:$0 sps:$4 sm:$0x11]   ;;  %v3448_v49 = vsel %vm3418_vm2, %v6948_v15, %v7831_v27  ;;  %v72_v27 = vld [vmem:[%s9206_s0 + $0x144] sm:$0xf] }
 0x160   :  { %v4110_v63 = vadd.f32 %v7896_v33, %v4109_v14  ;;  %3140 = vrot.lane.b32.xlu1 %v2977_v35, %s5733_s15  ;;  %v4366_v42 = vmax.f32 %v4118_v59, 0.0  ;;  %v1967_v35 = vshrl.u32 %v7914_v25, 16  ;;  %v1974_v14 = vshll.u32 %v7939_v28, 16 }
 0x161   :  { %v5309_v55 = vpop.f32.mrf.mxu0  ;;  %3138 = vrot.lane.b32.xlu0 %v2965_v62, %s5733_s15  ;;  %v4776_v62 = vld [vmem:[%s9206_s0 + $0x12c] sm:$0xe]  ;;  %v5097_v59 = vcombine.low %v4777_v52, %v7887_v1  ;;  %v8005_v1 = vld [vmem:[%s9206_s0 + $0x13c] sm:$0xf]  ;;  %v2998_v15 = vshll.u32 %v8010_v9, 16  ;;  %v2979_v58 = vshrl.u32 %v7994_v48, 16 }
 0x162   :  { %v7919_v38 = vpop.permute.xlu1 %1560  ;;  %v4364_v44 = vmax.f32 %v4110_v63, 0.0  ;;  %v4121_v16 = vadd.f32 %v5309_v55, %v7896_v33  ;;  %v4431_v63 = vsel %vm3873_vm9, %v4366_v42, 0.0  ;;  %v1959_v55 = vrot.slane %v1957_v8, 1 }
 0x163   :  { %v4112_v30 = vpop.f32.mrf.mxu0  ;;  %v7925_v41 = vpop.permute.xlu0 %1558  ;;  %v1972_v45 = vor.u32 %v1971_v24, %v1967_v35  ;;  %v1976_v18 = vrot.slane %v1974_v14, 1  ;;  %v2303_v42 = vrot.slane %v5097_v59, 1  ;;  %v2301_v8 = vrot.slane %v7944_v36, 1  ;;  %v8052_v14 = vld [vmem:[%s9206_s0 + $0x140] ss:$0 sps:$4 sm:$0x11]  }
 0x164   :  { %v4113_v39 = vadd.f32 %v7896_v33, %v4112_v30  ;;  %1093 = vrot.lane.b32.xlu1 %v940_v37, %s5729_s7  ;;  %v4428_v6 = vsel %vm3873_vm9, %v4364_v44, 0.0  ;;  %v4367_v23 = vmax.f32 %v4121_v16, 0.0  ;;  %v1962_v37 = vshll.u32 %v7944_v36, 16  ;;  %v70_v44 = vld [vmem:[%s9206_s0 + $0x138] sm:$0xf] }
 0x165   :  { %3394 = vrot.lane.b32.xlu0 %v3320_v34, %s5734_s18  ;;  %v5096_v34 = vcombine.low %v4776_v62, %v7908_v46  ;;  %v1960_v16 = vor.u32 %v1959_v55, %v1955_v12  ;;  %v8019_v52 = vcombine.low %v70_v44, %v8005_v1  ;;  %v3513_v36 = vsel %vm3483_vm3, %v3448_v49, %v7898_v26  ;;  %v4904_v55 = vld [vmem:[%s9206_s0 + $0x138] sm:$0xe] }
 0x166   :  { %v4365_v13 = vmax.f32 %v4113_v39, 0.0  ;;  %v7946_v21 = vpop.permute.xlu1 %2104  ;;  %v4433_v30 = vsel %vm3873_vm9, %v4367_v23, 0.0  ;;  %v1964_v39 = vrot.slane %v1962_v37, 1  ;;  %v3578_v62 = vsel %vm3548_vm4, %v3513_v36, %v7925_v41 }
 0x167   :  { %v7950_v40 = vpop.permute.xlu0 %2102  ;;  %v2300_v35 = vrot.slane %v5096_v34, 1  ;;  %v956_v41 = vshll.u32 %v8019_v52, 16  ;;  %v3450_v37 = vsel %vm3418_vm2, %v6985_v17, %v7858_v20  ;;  %v3000_v44 = vrot.slane %v2998_v15, 1 }
 0x168   :  { %v4429_v29 = vsel %vm3873_vm9, %v4365_v13, 0.0  ;;  %1095 = vrot.lane.b32.xlu1 %v952_v11, %s5729_s7  ;;  %v2993_v11 = vshll.u32 %v7987_v19, 16  ;;  %v2304_v13 = vrot.slane %v7939_v28, 1  ;;  %v1977_v28 = vsel %vm664_vm1, %v1972_v45, %v1976_v18 }
 0x169   :  { %v4430_v2 = vadd.f32 %v4429_v29, %v4428_v6  ;;  %3396 = vrot.lane.b32.xlu0 %v3323_v4, %s5734_s18  ;;  %v2991_v6 = vshrl.u32 %v7987_v19, 16  ;;  %v1965_v29 = vsel %vm664_vm1, %v1960_v16, %v1964_v39  ;;  %v3643_v12 = vsel %vm3613_vm5, %v3578_v62, %v7950_v40 }
 0x16a   :  { %v7983_v22 = vpop.permute.xlu1 %2360  ;;  %v2995_v24 = vrot.slane %v2993_v11, 1  ;;  %v2305_v26 = vsel %vm1209_vm0, %v2303_v42, %v2304_v13  ;;  %v3515_v34 = vsel %vm3483_vm3, %v3450_v37, %v7889_v56  ;;  %v961_v16 = vshll.u32 %v8052_v14, 16 }
 0x16b   :  { %v4432_v5 = vadd.f32 %v4431_v63, %v4430_v2  ;;  %v2359_v61 = vpop.permute.xlu0 %2358  ;;  %v3580_v17 = vsel %vm3548_vm4, %v3515_v34, %v7919_v38  ;;  %v5192_v39 = vcombine.low %v4904_v55, %v7980_v7  ;;  %v958_v42 = vrot.slane %v956_v41, 1  ;;  %v8093_v7 = vld [vmem:[%s9206_s0 + $0x14c] ss:$0 sps:$4 sm:$0x11]  }
 0x16c   :  { %1352 = vrot.lane.b32.xlu1 %v1281_v57, %s5728_s20  ;;  %v2981_v57 = vshll.u32 %v7994_v48, 16  ;;  %v2996_v18 = vor.u32 %v2995_v24, %v2991_v6  ;;  %v3645_v11 = vsel %vm3613_vm5, %v3580_v17, %v7946_v21  ;;  %v963_v6 = vrot.slane %v961_v16, 1 }
 0x16d   :  { %1350 = vrot.lane.b32.xlu0 %v1278_v32, %s5728_s20  ;;  %v7997_v47 = vadd.f32 %v4433_v30, %v4432_v5  ;;  %v2302_v32 = vsel %vm1209_vm0, %v2300_v35, %v2301_v8  ;;  %v3708_v5 = vsel %vm3678_vm6, %v3643_v12, %v2359_v61  ;;  %v3710_v38 = vsel %vm3678_vm6, %v3645_v11, %v7983_v22  ;;  %v4905_v22 = vld [vmem:[%s9206_s0 + $0x144] sm:$0xe] }
 0x16e   :  { %v2585_v46 = vpop.permute.xlu1 %2584  ;;  %v2983_v63 = vrot.slane %v2981_v57, 1  ;;  %v3324_v36 = vrot.slane %v5192_v39, 1  ;;  %v3328_v11 = vrot.slane %v8010_v9, 1 }
 0x16f   :  { %v2583_v4 = vpop.permute.xlu0 %2582  ;;  %v3775_v13 = vsel %vm3743_vm7, %v3710_v38, %v2585_v46  ;;  %v3001_v46 = vsel %vm664_vm1, %v2996_v18, %v3000_v44 }
 0x170   :  { %1576 = vrot.lane.b32.xlu1 %v7914_v25, %s5727_s28  ;;  %v8031_v25 = vld [vmem:[%s9206_s0 + $0x140] ss:$0 sps:$4 sm:$0x11]   ;;  %v3773_v30 = vsel %vm3743_vm7, %v3708_v5, %v2583_v4  ;;  %v954_v4 = vshrl.u32 %v8019_v52, 16  ;;  %v2984_v8 = vor.u32 %v2983_v63, %v2979_v58  ;;  %v142_v63 = vld [vmem:[%s9206_s0 + $0x138] sm:$0xe] }
 0x171   :  { %1574 = vrot.lane.b32.xlu0 %v7923_v43, %s5727_s28  ;;  %v8043_v43 = vld [vmem:[%s9206_s0 + $0x148] sm:$0xf]  ;;  %v2986_v40 = vshll.u32 %v8031_v25, 16 }
 0x172   :  { %v3129_v23 = vpop.permute.xlu1 %3128  ;;  %v8069_v59 = vcombine.low %v72_v27, %v8043_v43  ;;  %v959_v15 = vor.u32 %v958_v42, %v954_v4  ;;  %v143_v27 = vld [vmem:[%s9206_s0 + $0x144] sm:$0xe]  ;;  %v8143_v5 = vld [vmem:[%s9206_s0 + $0x148] sm:$0xf] }
 0x173   :  { %v3127_v2 = vpop.permute.xlu0 %3126  ;;  %v2988_v57 = vrot.slane %v2986_v40, 1  ;;  %v3840_v49 = vsel %vm3808_vm8, %v3775_v13, %v3129_v23  ;;  %v4708_v23 = vld [vmem:[%s9206_s0 + $0x150] sm:$0xf] }
 0x174   :  { %2120 = vrot.lane.b32.xlu1 %v1977_v28, %s5730_s25  ;;  %v3838_v20 = vsel %vm3808_vm8, %v3773_v30, %v3127_v2  ;;  %v968_v21 = vshll.u32 %v8069_v59, 16  ;;  %v964_v34 = vsel %vm664_vm1, %v959_v15, %v963_v6  ;;  %v8173_v6 = vld [vmem:[%s9206_s0 + $0x158] ss:$0 sps:$4 sm:$0x11]  }
 0x175   :  { %2118 = vrot.lane.b32.xlu0 %v1965_v29, %s5730_s25  ;;  %v3325_v29 = vrot.slane %v8031_v25, 1  ;;  %v8117_v25 = vld [vmem:[%s9206_s0 + $0x154] sm:$0xf]  ;;  %v2989_v58 = vsel %vm664_vm1, %v2984_v8, %v2988_v57  ;;  %v1286_v57 = vrot.slane %v8093_v7, 1 }
 0x176   :  { %v8074_v45 = vpop.permute.xlu1 %1081  ;;  %v970_v2 = vrot.slane %v968_v21, 1  ;;  %v8135_v37 = vcombine.low %v4708_v23, %v8117_v25  ;;  %v4836_v23 = vld [vmem:[%s9206_s0 + $0x15c] sm:$0xf] }
 0x177   :  { %v3383_v61 = vpop.permute.xlu0 %3382 }
 0x178   :  { %v3903_v56 = vsel %vm3873_vm9, %v3838_v20, %v3383_v61  ;;  %2376 = vrot.lane.b32.xlu1 %v2305_v26, %s5731_s13  ;;  %v973_v26 = vshll.u32 %v8093_v7, 16  ;;  %v5002_v20 = vcombine.low %v142_v63, %v8005_v1  ;;  %v1993_v21 = vshll.u32 %v8135_v37, 16 }
 0x179   :  { %2374 = vrot.lane.b32.xlu0 %v2302_v32, %s5731_s13  ;;  %5334 = vmatprep.mubr.msk.bf16.mxu0 %vm3938_vm10, %v3903_v56  ;;  %v5193_v32 = vcombine.low %v4905_v22, %v7962_v3  ;;  %v4706_v3 = vld [vmem:[%s9206_s0 + $0x144] sm:$0xf] }
 0x17a   :  { %v8097_v35 = vpop.permute.xlu1 %1083  ;;  %v975_v44 = vrot.slane %v973_v26, 1  ;;  %v8156_v56 = vcombine.low %v4706_v3, %v8143_v5 }
 0x17b   :  { %v3385_v28 = vpop.permute.xlu0 %3384  ;;  %v3327_v17 = vrot.slane %v5193_v32, 1  ;;  %v4779_v32 = vld [vmem:[%s9206_s0 + $0x150] sm:$0xe] }
 0x17c   :  { %v3905_v24 = vsel %vm3873_vm9, %v3840_v49, %v3385_v28  ;;  %2600 = vrot.lane.b32.xlu1 %v7987_v19, %s5732_s21  ;;  %v966_v19 = vshrl.u32 %v8069_v59, 16  ;;  %v1282_v49 = vrot.slane %v5002_v20, 1  ;;  %v1283_v28 = vrot.slane %v8052_v14, 1 }
 0x17d   :  { %v5312_v62 = vpop.f32.mrf.mxu0  ;;  %2598 = vrot.lane.b32.xlu0 %v7994_v48, %s5732_s21  ;;  %5335 = vmatmul.mubr.msk.bf16.gmra.mxu0 %vm3938_vm10, %v3905_v24  ;;  %v5003_v48 = vcombine.low %v143_v27, %v8043_v43  ;;  %v3326_v43 = vsel %vm1209_vm0, %v3324_v36, %v3325_v29  ;;  %v3329_v7 = vsel %vm1209_vm0, %v3327_v17, %v3328_v11  ;;  %v1991_v14 = vshrl.u32 %v8135_v37, 16 }
 0x17e   :  { %v8125_v12 = vpop.permute.xlu1 %1340  ;;  %v971_v18 = vor.u32 %v970_v2, %v966_v19  ;;  %v4134_v61 = vadd.f32 %v5312_v62, %v7896_v33  ;;  %v1995_v27 = vrot.slane %v1993_v21, 1  ;;  %v8193_v62 = vld [vmem:[%s9206_s0 + $0x160] sm:$0xf]  ;;  %v1979_v3 = vshrl.u32 %v8156_v56, 16 }
 0x17f   :  { %v4125_v41 = vpop.f32.mrf.mxu0  ;;  %v8131_v55 = vpop.permute.xlu0 %1338  ;;  %v1285_v38 = vrot.slane %v5003_v48, 1  ;;  %v1998_v48 = vshll.u32 %v8173_v6, 16  ;;  %v8221_v17 = vcombine.low %v4836_v23, %v8193_v62  ;;  %v3452_v23 = vsel %vm3418_vm2, %v7160_v53, %v8074_v45  ;;  %v76_v45 = vld [vmem:[%s9206_s0 + $0x15c] sm:$0xf] }
 0x180   :  { %v4126_v40 = vadd.f32 %v7896_v33, %v4125_v41  ;;  %3144 = vrot.lane.b32.xlu1 %v3001_v46, %s5733_s15  ;;  %v976_v22 = vsel %vm664_vm1, %v971_v18, %v975_v44  ;;  %v4370_v36 = vmax.f32 %v4134_v61, 0.0  ;;  %v1981_v46 = vshll.u32 %v8156_v56, 16 }
 0x181   :  { %v5313_v30 = vpop.f32.mrf.mxu0  ;;  %3142 = vrot.lane.b32.xlu0 %v2989_v58, %s5733_s15  ;;  %v1287_v26 = vsel %vm1209_vm0, %v1285_v38, %v1286_v57  ;;  %v4778_v58 = vld [vmem:[%s9206_s0 + $0x144] sm:$0xe]  ;;  %v1284_v41 = vsel %vm1209_vm0, %v1282_v49, %v1283_v28  ;;  %v1996_v21 = vor.u32 %v1995_v27, %v1991_v14  ;;  %v3017_v49 = vshll.u32 %v8221_v17, 16 }
 0x182   :  { %v4368_v16 = vmax.f32 %v4126_v40, 0.0  ;;  %v8152_v39 = vpop.permute.xlu1 %1564  ;;  %v4137_v1 = vadd.f32 %v5313_v30, %v7896_v33  ;;  %v4834_v40 = vld [vmem:[%s9206_s0 + $0x150] sm:$0xf]  ;;  %v1983_v18 = vrot.slane %v1981_v46, 1  ;;  %v5098_v11 = vcombine.low %v4778_v58, %v8143_v5 }
 0x183   :  { %v4128_v4 = vpop.f32.mrf.mxu0  ;;  %v8158_v42 = vpop.permute.xlu0 %1562 }
 0x184   :  { %v4435_v13 = vsel %vm3873_vm9, %v4368_v16, 0.0  ;;  %v4129_v8 = vadd.f32 %v7896_v33, %v4128_v4  ;;  %1097 = vrot.lane.b32.xlu1 %v964_v34, %s5729_s7  ;;  %v4371_v19 = vmax.f32 %v4137_v1, 0.0  ;;  %v8214_v34 = vld [vmem:[%s9206_s0 + $0x154] sm:$0xf]  ;;  %v5099_v16 = vcombine.low %v4779_v32, %v8117_v25 }
 0x185   :  { %v4436_v9 = vadd.f32 %v4435_v13, %v7997_v47  ;;  %3398 = vrot.lane.b32.xlu0 %v3326_v43, %s5734_s18  ;;  %v8181_v47 = vld [vmem:[%s9206_s0 + $0x14c] ss:$0 sps:$4 sm:$0x11]   ;;  %v4439_v43 = vsel %vm3873_vm9, %v4370_v36, 0.0  ;;  %v8228_v38 = vcombine.low %v4834_v40, %v8214_v34  ;;  %v2000_v13 = vrot.slane %v1998_v48, 1 }
 0x186   :  { %v4369_v29 = vmax.f32 %v4129_v8, 0.0  ;;  %v8175_v24 = vpop.permute.xlu1 %2108  ;;  %v1986_v44 = vshll.u32 %v8181_v47, 16  ;;  %v4441_v4 = vsel %vm3873_vm9, %v4371_v19, 0.0  ;;  %v74_v8 = vld [vmem:[%s9206_s0 + $0x150] sm:$0xf]  ;;  %v1984_v57 = vor.u32 %v1983_v18, %v1979_v3 }
 0x187   :  { %v8184_v15 = vpop.permute.xlu0 %2106  ;;  %v8239_v25 = vld [vmem:[%s9206_s0 + $0x154] sm:$0xf]  ;;  %v2309_v36 = vrot.slane %v5099_v16, 1  ;;  %v2307_v46 = vrot.slane %v8181_v47, 1  ;;  %v3005_v14 = vshll.u32 %v8228_v38, 16  ;;  %v3015_v19 = vshrl.u32 %v8221_v17, 16 }
 0x188   :  { %v4437_v2 = vsel %vm3873_vm9, %v4369_v29, 0.0  ;;  %1099 = vrot.lane.b32.xlu1 %v976_v22, %s5729_s7  ;;  %v8244_v22 = vld [vmem:[%s9206_s0 + $0x164] ss:$0 sps:$4 sm:$0x11]   ;;  %v2310_v29 = vrot.slane %v8173_v6, 1  ;;  %v8253_v27 = vcombine.low %v74_v8, %v8239_v25  ;;  %v2001_v6 = vsel %vm664_vm1, %v1996_v21, %v2000_v13 }
 0x189   :  { %v4438_v63 = vadd.f32 %v4437_v2, %v4436_v9  ;;  %3400 = vrot.lane.b32.xlu0 %v3329_v7, %s5734_s18  ;;  %v1988_v9 = vrot.slane %v1986_v44, 1  ;;  %v2306_v7 = vrot.slane %v5098_v11, 1  ;;  %v3517_v47 = vsel %vm3483_vm3, %v3452_v23, %v8131_v55  ;;  %v8286_v48 = vld [vmem:[%s9206_s0 + $0x158] ss:$0 sps:$4 sm:$0x11]  }
 0x18a   :  { %v8217_v30 = vpop.permute.xlu1 %2364  ;;  %v3019_v32 = vrot.slane %v3017_v49, 1  ;;  %v3022_v53 = vshll.u32 %v8244_v22, 16  ;;  %v3582_v58 = vsel %vm3548_vm4, %v3517_v47, %v8158_v42  ;;  %v2311_v55 = vsel %vm1209_vm0, %v2309_v36, %v2310_v29  ;;  %v8327_v29 = vld [vmem:[%s9206_s0 + $0x164] ss:$0 sps:$4 sm:$0x11]  }
 0x18b   :  { %v4440_v20 = vadd.f32 %v4439_v43, %v4438_v63  ;;  %v2363_v61 = vpop.permute.xlu0 %2362  ;;  %v3647_v3 = vsel %vm3613_vm5, %v3582_v58, %v8184_v15  ;;  %v3003_v40 = vshrl.u32 %v8228_v38, 16  ;;  %v3007_v43 = vrot.slane %v3005_v14, 1  ;;  %v4906_v15 = vld [vmem:[%s9206_s0 + $0x150] sm:$0xe] }
 0x18c   :  { %1356 = vrot.lane.b32.xlu1 %v1287_v26, %s5728_s20  ;;  %v1989_v26 = vsel %vm664_vm1, %v1984_v57, %v1988_v9  ;;  %v980_v42 = vshll.u32 %v8253_v27, 16  ;;  %v3454_v18 = vsel %vm3418_vm2, %v7198_v51, %v8097_v35  ;;  %v3712_v44 = vsel %vm3678_vm6, %v3647_v3, %v2363_v61 }
 0x18d   :  { %1354 = vrot.lane.b32.xlu0 %v1284_v41, %s5728_s20  ;;  %v8231_v1 = vadd.f32 %v4441_v4, %v4440_v20  ;;  %v2308_v41 = vsel %vm1209_vm0, %v2306_v7, %v2307_v46  ;;  %v3519_v11 = vsel %vm3483_vm3, %v3454_v18, %v8125_v12  ;;  %v3020_v51 = vor.u32 %v3019_v32, %v3015_v19 }
 0x18e   :  { %v2589_v5 = vpop.permute.xlu1 %2588  ;;  %v3024_v35 = vrot.slane %v3022_v53, 1  ;;  %v3584_v61 = vsel %vm3548_vm4, %v3519_v11, %v8152_v39  ;;  %v978_v57 = vshrl.u32 %v8253_v27, 16  ;;  %v985_v9 = vshll.u32 %v8286_v48, 16 }
 0x18f   :  { %v2587_v28 = vpop.permute.xlu0 %2586  ;;  %v3649_v49 = vsel %vm3613_vm5, %v3584_v61, %v8175_v24  ;;  %v5194_v36 = vcombine.low %v4906_v15, %v8214_v34  ;;  %v3008_v14 = vor.u32 %v3007_v43, %v3003_v40  ;;  %v4712_v40 = vld [vmem:[%s9206_s0 + $0x168] sm:$0xf] }
 0x190   :  { %1580 = vrot.lane.b32.xlu1 %v8135_v37, %s5727_s28  ;;  %v8265_v37 = vld [vmem:[%s9206_s0 + $0x158] ss:$0 sps:$4 sm:$0x11]   ;;  %v3777_v4 = vsel %vm3743_vm7, %v3712_v44, %v2587_v28  ;;  %v982_v28 = vrot.slane %v980_v42, 1  ;;  %v3714_v39 = vsel %vm3678_vm6, %v3649_v49, %v8217_v30  ;;  %v4907_v30 = vld [vmem:[%s9206_s0 + $0x15c] sm:$0xe]  ;;  %v3025_v19 = vsel %vm664_vm1, %v3020_v51, %v3024_v35 }
 0x191   :  { %1578 = vrot.lane.b32.xlu0 %v8156_v56, %s5727_s28  ;;  %v8277_v56 = vld [vmem:[%s9206_s0 + $0x160] sm:$0xf]  ;;  %v3010_v20 = vshll.u32 %v8265_v37, 16  ;;  %v3779_v7 = vsel %vm3743_vm7, %v3714_v39, %v2589_v5  ;;  %v987_v47 = vrot.slane %v985_v9, 1  ;;  %v3330_v32 = vrot.slane %v5194_v36, 1 }
 0x192   :  { %v3133_v2 = vpop.permute.xlu1 %3132  ;;  %v8303_v16 = vcombine.low %v76_v45, %v8277_v56  ;;  %v983_v5 = vor.u32 %v982_v28, %v978_v57  ;;  %v3331_v53 = vrot.slane %v8265_v37, 1  ;;  %v145_v45 = vld [vmem:[%s9206_s0 + $0x15c] sm:$0xe]  ;;  %v5195_v37 = vcombine.low %v4907_v30, %v8193_v62 }
 0x193   :  { %v3131_v63 = vpop.permute.xlu0 %3130  ;;  %v3012_v34 = vrot.slane %v3010_v20, 1  ;;  %v3844_v23 = vsel %vm3808_vm8, %v3779_v7, %v3133_v2  ;;  %v144_v2 = vld [vmem:[%s9206_s0 + $0x150] sm:$0xe]  ;;  %v5005_v18 = vcombine.low %v145_v45, %v8277_v56  ;;  %v4710_v44 = vld [vmem:[%s9206_s0 + $0x15c] sm:$0xf]  ;;  %v3334_v9 = vrot.slane %v8244_v22, 1 }
 0x194   :  { %2124 = vrot.lane.b32.xlu1 %v2001_v6, %s5730_s25  ;;  %v3842_v13 = vsel %vm3808_vm8, %v3777_v4, %v3131_v63  ;;  %v992_v24 = vshll.u32 %v8303_v16, 16  ;;  %v5004_v62 = vcombine.low %v144_v2, %v8239_v25  ;;  %v8375_v20 = vld [vmem:[%s9206_s0 + $0x160] sm:$0xf]  ;;  %v988_v11 = vsel %vm664_vm1, %v983_v5, %v987_v47 }
 0x195   :  { %2122 = vrot.lane.b32.xlu0 %v1989_v26, %s5730_s25  ;;  %v3013_v3 = vsel %vm664_vm1, %v3008_v14, %v3012_v34  ;;  %v3332_v4 = vsel %vm1209_vm0, %v3330_v32, %v3331_v53  ;;  %v3333_v35 = vrot.slane %v5195_v37, 1  ;;  %v8390_v49 = vcombine.low %v4710_v44, %v8375_v20  ;;  %v4781_v53 = vld [vmem:[%s9206_s0 + $0x168] sm:$0xe] }
 0x196   :  { %v8308_v21 = vpop.permute.xlu1 %1085  ;;  %v994_v63 = vrot.slane %v992_v24, 1  ;;  %v1291_v36 = vrot.slane %v5005_v18, 1  ;;  %v1292_v39 = vrot.slane %v8327_v29, 1  ;;  %v1288_v24 = vrot.slane %v5004_v62, 1  ;;  %v4780_v18 = vld [vmem:[%s9206_s0 + $0x15c] sm:$0xe] }
 0x197   :  { %v3387_v8 = vpop.permute.xlu0 %3386  ;;  %v1289_v22 = vrot.slane %v8286_v48, 1  ;;  %v3335_v5 = vsel %vm1209_vm0, %v3333_v35, %v3334_v9  ;;  %v2005_v48 = vshll.u32 %v8390_v49, 16 }
 0x198   :  { %v3907_v12 = vsel %vm3873_vm9, %v3842_v13, %v3387_v8  ;;  %2380 = vrot.lane.b32.xlu1 %v2311_v55, %s5731_s13  ;;  %v997_v55 = vshll.u32 %v8327_v29, 16  ;;  %v8406_v29 = vld [vmem:[%s9206_s0 + $0x170] ss:$0 sps:$4 sm:$0x11]  }
 0x199   :  { %2378 = vrot.lane.b32.xlu0 %v2308_v41, %s5731_s13  ;;  %5338 = vmatprep.mubr.msk.bf16.mxu0 %vm3938_vm10, %v3907_v12 }
 0x19a   :  { %v8331_v46 = vpop.permute.xlu1 %1087  ;;  %v999_v51 = vrot.slane %v997_v55, 1  ;;  %v8433_v55 = vld [vmem:[%s9206_s0 + $0x178] sm:$0xf] }
 0x19b   :  { %v3389_v6 = vpop.permute.xlu0 %3388 }
 0x19c   :  { %v3909_v26 = vsel %vm3873_vm9, %v3844_v23, %v3389_v6  ;;  %2604 = vrot.lane.b32.xlu1 %v8221_v17, %s5732_s21  ;;  %v990_v17 = vshrl.u32 %v8303_v16, 16 }
 0x19d   :  { %v5316_v58 = vpop.f32.mrf.mxu0  ;;  %2602 = vrot.lane.b32.xlu0 %v8228_v38, %s5732_s21  ;;  %5339 = vmatmul.mubr.msk.bf16.gmra.mxu0 %vm3938_vm10, %v3909_v26  ;;  %v8363_v38 = vld [vmem:[%s9206_s0 + $0x16c] sm:$0xf] }
 0x19e   :  { %v8354_v41 = vpop.permute.xlu1 %1344  ;;  %v995_v25 = vor.u32 %v994_v63, %v990_v17  ;;  %v8383_v61 = vcombine.low %v4712_v40, %v8363_v38  ;;  %v4150_v13 = vadd.f32 %v5316_v58, %v7896_v33  ;;  %v1293_v58 = vsel %vm1209_vm0, %v1291_v36, %v1292_v39  ;;  %v4840_v63 = vld [vmem:[%s9206_s0 + $0x174] sm:$0xf] }
 0x19f   :  { %v4141_v43 = vpop.f32.mrf.mxu0  ;;  %v8365_v42 = vpop.permute.xlu0 %1342  ;;  %v1290_v17 = vsel %vm1209_vm0, %v1288_v24, %v1289_v22  ;;  %v8448_v35 = vcombine.low %v4840_v63, %v8433_v55  ;;  %v78_v22 = vld [vmem:[%s9206_s0 + $0x168] sm:$0xf]  ;;  %v8510_v63 = vld [vmem:[%s9206_s0 + $0x170] ss:$0 sps:$4 sm:$0x11]  }
 0x1a0   :  { %v4142_v15 = vadd.f32 %v7896_v33, %v4141_v43  ;;  %3148 = vrot.lane.b32.xlu1 %v3025_v19, %s5733_s15  ;;  %v1000_v23 = vsel %vm664_vm1, %v995_v25, %v999_v51  ;;  %v2017_v6 = vshll.u32 %v8383_v61, 16  ;;  %v4374_v19 = vmax.f32 %v4150_v13, 0.0  ;;  %v4838_v13 = vld [vmem:[%s9206_s0 + $0x168] sm:$0xf] }
 0x1a1   :  { %v5317_v56 = vpop.f32.mrf.mxu0  ;;  %3146 = vrot.lane.b32.xlu0 %v3013_v3, %s5733_s15  ;;  %v2015_v3 = vshrl.u32 %v8383_v61, 16  ;;  %v2022_v43 = vshll.u32 %v8406_v29, 16  ;;  %v5101_v51 = vcombine.low %v4781_v53, %v8363_v38  ;;  %v80_v53 = vld [vmem:[%s9206_s0 + $0x174] sm:$0xf] }
 0x1a2   :  { %v4372_v8 = vmax.f32 %v4142_v15, 0.0  ;;  %v8386_v57 = vpop.permute.xlu1 %1568  ;;  %v4153_v14 = vadd.f32 %v5317_v56, %v7896_v33  ;;  %v2019_v40 = vrot.slane %v2017_v6, 1  ;;  %v4447_v62 = vsel %vm3873_vm9, %v4374_v19, 0.0  ;;  %v8481_v19 = vld [vmem:[%s9206_s0 + $0x17c] ss:$0 sps:$4 sm:$0x11]  }
 0x1a3   :  { %v4144_v12 = vpop.f32.mrf.mxu0  ;;  %v8392_v28 = vpop.permute.xlu0 %1566  ;;  %v2003_v15 = vshrl.u32 %v8390_v49, 16  ;;  %v2024_v36 = vrot.slane %v2022_v43, 1  ;;  %v2316_v6 = vrot.slane %v8406_v29, 1  ;;  %v8493_v29 = vld [vmem:[%s9206_s0 + $0x178] sm:$0xf] }
 0x1a4   :  { %v4443_v7 = vsel %vm3873_vm9, %v4372_v8, 0.0  ;;  %v4145_v34 = vadd.f32 %v7896_v33, %v4144_v12  ;;  %1101 = vrot.lane.b32.xlu1 %v988_v11, %s5729_s7  ;;  %v4375_v45 = vmax.f32 %v4153_v14, 0.0  ;;  %v2007_v11 = vrot.slane %v2005_v48, 1  ;;  %v8456_v8 = vld [vmem:[%s9206_s0 + $0x16c] sm:$0xf] }
 0x1a5   :  { %v4444_v30 = vadd.f32 %v4443_v7, %v8231_v1  ;;  %3402 = vrot.lane.b32.xlu0 %v3332_v4, %s5734_s18  ;;  %v8415_v1 = vld [vmem:[%s9206_s0 + $0x164] ss:$0 sps:$4 sm:$0x11]   ;;  %v5100_v12 = vcombine.low %v4780_v18, %v8375_v20  ;;  %v2020_v38 = vor.u32 %v2019_v40, %v2015_v3  ;;  %v8475_v20 = vld [vmem:[%s9206_s0 + $0x16c] sm:$0xf]  ;;  %v8517_v40 = vcombine.low %v80_v53, %v8493_v29 }
 0x1a6   :  { %v4373_v47 = vmax.f32 %v4145_v34, 0.0  ;;  %v8409_v26 = vpop.permute.xlu1 %2112  ;;  %v2010_v4 = vshll.u32 %v8415_v1, 16  ;;  %v4449_v9 = vsel %vm3873_vm9, %v4375_v45, 0.0  ;;  %v2008_v7 = vor.u32 %v2007_v11, %v2003_v15 }
 0x1a7   :  { %v8418_v32 = vpop.permute.xlu0 %2110  ;;  %v8467_v34 = vcombine.low %v4838_v13, %v8456_v8  ;;  %v2313_v48 = vrot.slane %v8415_v1, 1  ;;  %v3456_v45 = vsel %vm3418_vm2, %v7369_v10, %v8308_v21  ;;  %v8502_v1 = vcombine.low %v78_v22, %v8475_v20 }
 0x1a8   :  { %v4445_v2 = vsel %vm3873_vm9, %v4373_v47, 0.0  ;;  %1103 = vrot.lane.b32.xlu1 %v1000_v23, %s5729_s7  ;;  %v2012_v14 = vrot.slane %v2010_v4, 1  ;;  %v2315_v23 = vrot.slane %v5101_v51, 1  ;;  %v3041_v47 = vshll.u32 %v8448_v35, 16 }
 0x1a9   :  { %v4446_v37 = vadd.f32 %v4445_v2, %v4444_v30  ;;  %3404 = vrot.lane.b32.xlu0 %v3335_v5, %s5734_s18  ;;  %v2312_v5 = vrot.slane %v5100_v12, 1  ;;  %v3521_v2 = vsel %vm3483_vm3, %v3456_v45, %v8365_v42  ;;  %v3029_v10 = vshll.u32 %v8467_v34, 16 }
 0x1aa   :  { %v8442_v44 = vpop.permute.xlu1 %2368  ;;  %v3586_v21 = vsel %vm3548_vm4, %v3521_v2, %v8392_v28  ;;  %v3043_v3 = vrot.slane %v3041_v47, 1  ;;  %v2317_v43 = vsel %vm1209_vm0, %v2315_v23, %v2316_v6  ;;  %v8528_v28 = vld [vmem:[%s9206_s0 + $0x170] ss:$0 sps:$4 sm:$0x11]   ;;  %v3458_v15 = vsel %vm3418_vm2, %v7407_v54, %v8331_v46  ;;  %v4908_v54 = vld [vmem:[%s9206_s0 + $0x168] sm:$0xe] }
 0x1ab   :  { %v4448_v56 = vadd.f32 %v4447_v62, %v4446_v37  ;;  %v2367_v25 = vpop.permute.xlu0 %2366  ;;  %v3039_v37 = vshrl.u32 %v8448_v35, 16  ;;  %v3651_v42 = vsel %vm3613_vm5, %v3586_v21, %v8418_v32  ;;  %v2314_v18 = vsel %vm1209_vm0, %v2312_v5, %v2313_v48  ;;  %v4909_v21 = vld [vmem:[%s9206_s0 + $0x174] sm:$0xe] }
 0x1ac   :  { %1360 = vrot.lane.b32.xlu1 %v1293_v58, %s5728_s20  ;;  %v3046_v62 = vshll.u32 %v8481_v19, 16  ;;  %v3716_v11 = vsel %vm3678_vm6, %v3651_v42, %v2367_v25  ;;  %v3027_v32 = vshrl.u32 %v8467_v34, 16  ;;  %v1004_v4 = vshll.u32 %v8502_v1, 16 }
 0x1ad   :  { %1358 = vrot.lane.b32.xlu0 %v1290_v17, %s5728_s20  ;;  %v8462_v39 = vadd.f32 %v4449_v9, %v4448_v56  ;;  %v2013_v17 = vsel %vm664_vm1, %v2008_v7, %v2012_v14  ;;  %v3523_v56 = vsel %vm3483_vm3, %v3458_v15, %v8354_v41  ;;  %v3031_v9 = vrot.slane %v3029_v10, 1  ;;  %v8552_v41 = vld [vmem:[%s9206_s0 + $0x17c] ss:$0 sps:$4 sm:$0x11]  }
 0x1ae   :  { %v8464_v24 = vpop.permute.xlu1 %2592  ;;  %v3034_v12 = vshll.u32 %v8510_v63, 16  ;;  %v3588_v46 = vsel %vm3548_vm4, %v3523_v56, %v8386_v57  ;;  %v1016_v7 = vshll.u32 %v8517_v40, 16  ;;  %v1009_v57 = vshll.u32 %v8528_v28, 16 }
 0x1af   :  { %v2591_v30 = vpop.permute.xlu0 %2590  ;;  %v3653_v14 = vsel %vm3613_vm5, %v3588_v46, %v8409_v26  ;;  %v1002_v6 = vshrl.u32 %v8502_v1, 16  ;;  %v1006_v47 = vrot.slane %v1004_v4, 1  ;;  %v5196_v5 = vcombine.low %v4908_v54, %v8456_v8 }
 0x1b0   :  { %1584 = vrot.lane.b32.xlu1 %v8383_v61, %s5727_s28  ;;  %v2025_v61 = vsel %vm664_vm1, %v2020_v38, %v2024_v36  ;;  %v3781_v51 = vsel %vm3743_vm7, %v3716_v11, %v2591_v30  ;;  %v3044_v36 = vor.u32 %v3043_v3, %v3039_v37  ;;  %v3048_v30 = vrot.slane %v3046_v62, 1  ;;  %v146_v11 = vld [vmem:[%s9206_s0 + $0x168] sm:$0xe] }
 0x1b1   :  { %1582 = vrot.lane.b32.xlu0 %v8390_v49, %s5727_s28  ;;  %v3718_v23 = vsel %vm3678_vm6, %v3653_v14, %v8442_v44  ;;  %v3032_v53 = vor.u32 %v3031_v9, %v3027_v32  ;;  %v3036_v45 = vrot.slane %v3034_v12, 1  ;;  %v1014_v44 = vshrl.u32 %v8517_v40, 16  ;;  %v8608_v32 = vld [vmem:[%s9206_s0 + $0x178] sm:$0xf] }
 0x1b2   :  { %v3137_v58 = vpop.permute.xlu1 %3136  ;;  %v3783_v26 = vsel %vm3743_vm7, %v3718_v23, %v8464_v24  ;;  %v1021_v10 = vshll.u32 %v8552_v41, 16  ;;  %v1011_v24 = vrot.slane %v1009_v57, 1  ;;  %v3049_v37 = vsel %vm664_vm1, %v3044_v36, %v3048_v30 }
 0x1b3   :  { %v3135_v49 = vpop.permute.xlu0 %3134  ;;  %v1007_v3 = vor.u32 %v1006_v47, %v1002_v6  ;;  %v3336_v42 = vrot.slane %v5196_v5, 1  ;;  %v5197_v15 = vcombine.low %v4909_v21, %v8433_v55  ;;  %v5006_v36 = vcombine.low %v146_v11, %v8475_v20 }
 0x1b4   :  { %2128 = vrot.lane.b32.xlu1 %v2025_v61, %s5730_s25  ;;  %v3846_v25 = vsel %vm3808_vm8, %v3781_v51, %v3135_v49  ;;  %v3848_v61 = vsel %vm3808_vm8, %v3783_v26, %v3137_v58  ;;  %v147_v58 = vld [vmem:[%s9206_s0 + $0x174] sm:$0xe]  ;;  %v1023_v9 = vrot.slane %v1021_v10, 1  ;;  %v3340_v57 = vrot.slane %v8481_v19, 1 }
 0x1b5   :  { %2126 = vrot.lane.b32.xlu0 %v2013_v17, %s5730_s25  ;;  %v1018_v17 = vrot.slane %v1016_v7, 1  ;;  %v5007_v55 = vcombine.low %v147_v58, %v8493_v29  ;;  %v3339_v30 = vrot.slane %v5197_v15, 1  ;;  %v1295_v58 = vrot.slane %v8528_v28, 1 }
 0x1b6   :  { %v8540_v13 = vpop.permute.xlu1 %1089 }
 0x1b7   :  { %v3391_v38 = vpop.permute.xlu0 %3390  ;;  %v1019_v51 = vor.u32 %v1018_v17, %v1014_v44  ;;  %v1297_v47 = vrot.slane %v5007_v55, 1  ;;  %v1294_v44 = vrot.slane %v5006_v36, 1  ;;  %v8695_v36 = vld [vmem:[%s9206_s0 + $0x184] sm:$0xf] }
 0x1b8   :  { %2384 = vrot.lane.b32.xlu1 %v2317_v43, %s5731_s13  ;;  %v3911_v22 = vsel %vm3873_vm9, %v3846_v25, %v3391_v38  ;;  %v3337_v43 = vrot.slane %v8510_v63, 1  ;;  %v4714_v63 = vld [vmem:[%s9206_s0 + $0x174] sm:$0xf]  ;;  %v1012_v25 = vsel %vm664_vm1, %v1007_v3, %v1011_v24  ;;  %v3341_v24 = vsel %vm1209_vm0, %v3339_v30, %v3340_v57 }
 0x1b9   :  { %2382 = vrot.lane.b32.xlu0 %v2314_v18, %s5731_s13  ;;  %5342 = vmatprep.mubr.msk.bf16.mxu1 %vm3938_vm10, %v3911_v22  ;;  %v8593_v18 = vld [vmem:[%s9206_s0 + $0x184] sm:$0xf]  ;;  %v8623_v7 = vcombine.low %v4714_v63, %v8608_v32  ;;  %v1024_v20 = vsel %vm664_vm1, %v1019_v51, %v1023_v9  ;;  %v8681_v51 = vld [vmem:[%s9206_s0 + $0x190] sm:$0xf] }
 0x1ba   :  { %v8568_v48 = vpop.permute.xlu1 %1091  ;;  %v3338_v38 = vsel %vm1209_vm0, %v3336_v42, %v3337_v43 }
 0x1bb   :  { %v3393_v2 = vpop.permute.xlu0 %3392  ;;  %v2029_v17 = vshll.u32 %v8623_v7, 16  ;;  %v2027_v11 = vshrl.u32 %v8623_v7, 16 }
 0x1bc   :  { %v3913_v8 = vsel %vm3873_vm9, %v3848_v61, %v3393_v2  ;;  %2608 = vrot.lane.b32.xlu1 %v8448_v35, %s5732_s21  ;;  %v4716_v35 = vld [vmem:[%s9206_s0 + $0x180] sm:$0xf]  ;;  %v1298_v2 = vrot.slane %v8552_v41, 1 }
 0x1bd   :  { %v5320_v49 = vpop.f32.mrf.mxu0  ;;  %2606 = vrot.lane.b32.xlu0 %v8467_v34, %s5732_s21  ;;  %5343 = vmatmul.mubr.msk.bf16.vlgmr.msra.gmra.mxu1 %vm3938_vm10, %v3913_v8  ;;  %v3037_v34 = vsel %vm664_vm1, %v3032_v53, %v3036_v45  ;;  %v8616_v54 = vcombine.low %v4716_v35, %v8593_v18  ;;  %v8644_v45 = vld [vmem:[%s9206_s0 + $0x188] ss:$0 sps:$4 sm:$0x11]   ;;  %v4782_v35 = vld [vmem:[%s9206_s0 + $0x174] sm:$0xe]  ;;  %v2031_v63 = vrot.slane %v2029_v17, 1 }
 0x1be   :  { %v8595_v62 = vpop.permute.xlu1 %1348  ;;  %v2046_v28 = vshll.u32 %v8644_v45, 16  ;;  %v1299_v15 = vsel %vm1209_vm0, %v1297_v47, %v1298_v2  ;;  %v5102_v30 = vcombine.low %v4782_v35, %v8608_v32 }
 0x1bf   :  { %v4157_v4 = vpop.f32.mrf.mxu0  ;;  %v8610_v56 = vpop.permute.xlu0 %1346  ;;  %v2041_v19 = vshll.u32 %v8616_v54, 16  ;;  %v2039_v41 = vshrl.u32 %v8616_v54, 16 }
 0x1c0   :  { %v4158_v12 = vadd.f32 %v7896_v33, %v4157_v4  ;;  %3152 = vrot.lane.b32.xlu1 %v3049_v37, %s5733_s15  ;;  %v8628_v33 = vld [vmem:[%s9208_s2] ss:$0 sm:$0xff]  ;;  %v4783_v37 = vld [vmem:[%s9206_s0 + $0x180] sm:$0xe]  ;;  %v4844_v4 = vld [vmem:[%s9206_s0 + $0x18c] sm:$0xf] }
 0x1c1   :  { %v5321_v46 = vpop.f32.mrf.mxu0  ;;  %3150 = vrot.lane.b32.xlu0 %v3037_v34, %s5733_s15  ;;  %v4166_v29 = vadd.f32 %v8628_v33, %v5320_v49  ;;  %v8658_v49 = vld [vmem:[%s9206_s0 + $0x17c] ss:$0 sps:$4 sm:$0x11]   ;;  %v2043_v43 = vrot.slane %v2041_v19, 1  ;;  %v2048_v32 = vrot.slane %v2046_v28, 1  ;;  %v2032_v19 = vor.u32 %v2031_v63, %v2027_v11 }
 0x1c2   :  { %v4376_v14 = vmax.f32 %v4158_v12, 0.0  ;;  %v8631_v22 = vpop.permute.xlu1 %1572  ;;  %v4169_v26 = vadd.f32 %v8628_v33, %v5321_v46  ;;  %v1296_v12 = vsel %vm1209_vm0, %v1294_v44, %v1295_v58  ;;  %v2034_v46 = vshll.u32 %v8658_v49, 16  ;;  %v8727_v58 = vld [vmem:[%s9206_s0 + $0x194] ss:$0 sps:$4 sm:$0x11]  }
 0x1c3   :  { %v4160_v23 = vpop.f32.mrf.mxu0  ;;  %v8634_v6 = vpop.permute.xlu0 %1570  ;;  %v4378_v10 = vmax.f32 %v4166_v29, 0.0  ;;  %v2044_v47 = vor.u32 %v2043_v43, %v2039_v41  ;;  %v2322_v44 = vrot.slane %v8644_v45, 1  ;;  %v3460_v45 = vsel %vm3418_vm2, %v7582_v31, %v8540_v13  ;;  %v84_v13 = vld [vmem:[%s9206_s0 + $0x18c] sm:$0xf] }
 0x1c4   :  { %v4451_v5 = vsel %vm3873_vm9, %v4376_v14, 0.0  ;;  %v4161_v53 = vadd.f32 %v8628_v33, %v4160_v23  ;;  %1105 = vrot.lane.b32.xlu1 %v1012_v25, %s5729_s7  ;;  %v4379_v3 = vmax.f32 %v4169_v26, 0.0  ;;  %v5103_v25 = vcombine.low %v4783_v37, %v8593_v18  ;;  %v82_v18 = vld [vmem:[%s9206_s0 + $0x180] sm:$0xf] }
 0x1c5   :  { %v4452_v61 = vadd.f32 %v4451_v5, %v8462_v39  ;;  %3406 = vrot.lane.b32.xlu0 %v3338_v38, %s5734_s18  ;;  %v4455_v9 = vsel %vm3873_vm9, %v4378_v10, 0.0  ;;  %v4842_v38 = vld [vmem:[%s9206_s0 + $0x180] sm:$0xf]  ;;  %v8701_v23 = vcombine.low %v4844_v4, %v8681_v51  ;;  %v2318_v10 = vrot.slane %v5102_v30, 1 }
 0x1c6   :  { %v4377_v21 = vmax.f32 %v4161_v53, 0.0  ;;  %v8651_v8 = vpop.permute.xlu1 %2116  ;;  %v4457_v57 = vsel %vm3873_vm9, %v4379_v3, 0.0  ;;  %v8713_v5 = vcombine.low %v4842_v38, %v8695_v36  ;;  %v2321_v2 = vrot.slane %v5103_v25, 1 }
 0x1c7   :  { %v8660_v39 = vpop.permute.xlu0 %2114  ;;  %v3065_v41 = vshll.u32 %v8701_v23, 16  ;;  %v3525_v3 = vsel %vm3483_vm3, %v3460_v45, %v8610_v56 }
 0x1c8   :  { %v4453_v42 = vsel %vm3873_vm9, %v4377_v21, 0.0  ;;  %1107 = vrot.lane.b32.xlu1 %v1024_v20, %s5729_s7  ;;  %v8709_v20 = vld [vmem:[%s9206_s0 + $0x184] sm:$0xf]  ;;  %v2319_v21 = vrot.slane %v8658_v49, 1  ;;  %v2049_v49 = vsel %vm664_vm1, %v2044_v47, %v2048_v32  ;;  %v3053_v37 = vshll.u32 %v8713_v5, 16 }
 0x1c9   :  { %v4454_v34 = vadd.f32 %v4453_v42, %v4452_v61  ;;  %3408 = vrot.lane.b32.xlu0 %v3341_v24, %s5734_s18  ;;  %v2036_v61 = vrot.slane %v2034_v46, 1  ;;  %v8720_v24 = vcombine.low %v82_v18, %v8709_v20  ;;  %v2323_v31 = vsel %vm1209_vm0, %v2321_v2, %v2322_v44  ;;  %v8799_v44 = vld [vmem:[%s9206_s0 + $0x194] ss:$0 sps:$4 sm:$0x11]  }
 0x1ca   :  { %v8684_v55 = vpop.permute.xlu1 %2372  ;;  %v3590_v28 = vsel %vm3548_vm4, %v3525_v3, %v8634_v6  ;;  %v2320_v56 = vsel %vm1209_vm0, %v2318_v10, %v2319_v21  ;;  %v3067_v4 = vrot.slane %v3065_v41, 1  ;;  %v3070_v6 = vshll.u32 %v8727_v58, 16 }
 0x1cb   :  { %v4456_v29 = vadd.f32 %v4455_v9, %v4454_v34  ;;  %v2371_v14 = vpop.permute.xlu0 %2370  ;;  %v2037_v43 = vsel %vm664_vm1, %v2032_v19, %v2036_v61  ;;  %v3063_v34 = vshrl.u32 %v8701_v23, 16  ;;  %v1028_v11 = vshll.u32 %v8720_v24, 16 }
 0x1cc   :  { %1364 = vrot.lane.b32.xlu1 %v1299_v15, %s5728_s20  ;;  %v8761_v15 = vld [vmem:[%s9206_s0 + $0x188] ss:$0 sps:$4 sm:$0x11]   ;;  %v3655_v63 = vsel %vm3613_vm5, %v3590_v28, %v8660_v39  ;;  %v3051_v9 = vshrl.u32 %v8713_v5, 16  ;;  %v3055_v25 = vrot.slane %v3053_v37, 1  ;;  %v1045_v28 = vshll.u32 %v8799_v44, 16 }
 0x1cd   :  { %1362 = vrot.lane.b32.xlu0 %v1296_v12, %s5728_s20  ;;  %v8715_v26 = vadd.f32 %v4457_v57, %v4456_v29  ;;  %v3462_v12 = vsel %vm3418_vm2, %v7620_v0, %v8568_v48  ;;  %v3720_v46 = vsel %vm3678_vm6, %v3655_v63, %v2371_v14  ;;  %v4910_v39 = vld [vmem:[%s9206_s0 + $0x180] sm:$0xe]  ;;  %v1026_v48 = vshrl.u32 %v8720_v24, 16 }
 0x1ce   :  { %v2597_v53 = vpop.permute.xlu1 %2596  ;;  %v3527_v29 = vsel %vm3483_vm3, %v3462_v12, %v8595_v62  ;;  %v1030_v32 = vrot.slane %v1028_v11, 1  ;;  %v1033_v19 = vshll.u32 %v8761_v15, 16  ;;  %v5198_v2 = vcombine.low %v4910_v39, %v8695_v36 }
 0x1cf   :  { %v2595_v17 = vpop.permute.xlu0 %2594  ;;  %v3592_v14 = vsel %vm3548_vm4, %v3527_v29, %v8631_v22  ;;  %v3056_v36 = vor.u32 %v3055_v25, %v3051_v9  ;;  %v4718_v25 = vld [vmem:[%s9206_s0 + $0x18c] sm:$0xf] }
 0x1d0   :  { %1588 = vrot.lane.b32.xlu1 %v8616_v54, %s5727_s28  ;;  %v8739_v54 = vld [vmem:[%s9206_s0 + $0x188] ss:$0 sps:$4 sm:$0x11]   ;;  %v3785_v30 = vsel %vm3743_vm7, %v3720_v46, %v2595_v17  ;;  %v3657_v62 = vsel %vm3613_vm5, %v3592_v14, %v8651_v8  ;;  %v3068_v17 = vor.u32 %v3067_v4, %v3063_v34  ;;  %v3072_v8 = vrot.slane %v3070_v6, 1  ;;  %v149_v4 = vld [vmem:[%s9206_s0 + $0x18c] sm:$0xe] }
 0x1d1   :  { %1586 = vrot.lane.b32.xlu0 %v8623_v7, %s5727_s28  ;;  %v8752_v7 = vld [vmem:[%s9206_s0 + $0x190] sm:$0xf]  ;;  %v3058_v0 = vshll.u32 %v8739_v54, 16  ;;  %v3722_v22 = vsel %vm3678_vm6, %v3657_v62, %v8684_v55  ;;  %v1031_v3 = vor.u32 %v1030_v32, %v1026_v48  ;;  %v4911_v55 = vld [vmem:[%s9206_s0 + $0x18c] sm:$0xe] }
 0x1d2   :  { %v3141_v42 = vpop.permute.xlu1 %3140  ;;  %v8778_v38 = vcombine.low %v84_v13, %v8752_v7  ;;  %v3787_v21 = vsel %vm3743_vm7, %v3722_v22, %v2597_v53  ;;  %v3342_v13 = vrot.slane %v5198_v2, 1  ;;  %v3343_v53 = vrot.slane %v8739_v54, 1  ;;  %v8829_v54 = vld [vmem:[%s9206_s0 + $0x19c] sm:$0xf]  ;;  %v148_v6 = vld [vmem:[%s9206_s0 + $0x180] sm:$0xe] }
 0x1d3   :  { %v3139_v35 = vpop.permute.xlu0 %3138  ;;  %v3060_v45 = vrot.slane %v3058_v0, 1  ;;  %v5199_v63 = vcombine.low %v4911_v55, %v8681_v51  ;;  %v8850_v51 = vld [vmem:[%s9206_s0 + $0x190] sm:$0xf]  ;;  %v5008_v32 = vcombine.low %v148_v6, %v8709_v20  ;;  %v4784_v6 = vld [vmem:[%s9206_s0 + $0x18c] sm:$0xe] }
 0x1d4   :  { %2132 = vrot.lane.b32.xlu1 %v2049_v49, %s5730_s25  ;;  %v3850_v18 = vsel %vm3808_vm8, %v3785_v30, %v3139_v35  ;;  %v1040_v10 = vshll.u32 %v8778_v38, 16  ;;  %v3852_v49 = vsel %vm3808_vm8, %v3787_v21, %v3141_v42  ;;  %v3073_v42 = vsel %vm664_vm1, %v3068_v17, %v3072_v8 }
 0x1d5   :  { %2130 = vrot.lane.b32.xlu0 %v2037_v43, %s5730_s25  ;;  %v1035_v43 = vrot.slane %v1033_v19, 1  ;;  %v3344_v29 = vsel %vm1209_vm0, %v3342_v13, %v3343_v53  ;;  %v3346_v30 = vrot.slane %v8727_v58, 1  ;;  %v3345_v2 = vrot.slane %v5199_v63, 1  ;;  %v5692_v13 = vld [vmem:[%s9206_s0 + $0x194] ss:$0 sps:$4 sm:$0x11]  }
 0x1d6   :  { %v8783_v57 = vpop.permute.xlu1 %1093  ;;  %v1042_v34 = vrot.slane %v1040_v10, 1  ;;  %v8866_v58 = vcombine.low %v4718_v25, %v8850_v51  ;;  %v1304_v8 = vrot.slane %v8799_v44, 1  ;;  %v1301_v10 = vrot.slane %v8761_v15, 1 }
 0x1d7   :  { %v3395_v47 = vpop.permute.xlu0 %3394  ;;  %v1036_v46 = vsel %vm664_vm1, %v1031_v3, %v1035_v43 }
 0x1d8   :  { %v3915_v61 = vsel %vm3873_vm9, %v3850_v18, %v3395_v47  ;;  %2388 = vrot.lane.b32.xlu1 %v2323_v31, %s5731_s13  ;;  %v1047_v18 = vrot.slane %v1045_v28, 1  ;;  %v5009_v47 = vcombine.low %v149_v4, %v8752_v7  ;;  %v2053_v53 = vshll.u32 %v8866_v58, 16 }
 0x1d9   :  { %2386 = vrot.lane.b32.xlu0 %v2320_v56, %s5731_s13  ;;  %5346 = vmatprep.mubr.msk.bf16.mxu1 %vm3938_vm10, %v3915_v61  ;;  %v1038_v56 = vshrl.u32 %v8778_v38, 16 }
 0x1da   :  { %v8807_v41 = vpop.permute.xlu1 %1095  ;;  %v1303_v44 = vrot.slane %v5009_v47, 1 }
 0x1db   :  { %v3397_v37 = vpop.permute.xlu0 %3396  ;;  %v1043_v14 = vor.u32 %v1042_v34, %v1038_v56 }
 0x1dc   :  { %v3917_v31 = vsel %vm3873_vm9, %v3852_v49, %v3397_v37  ;;  %2612 = vrot.lane.b32.xlu1 %v8701_v23, %s5732_s21  ;;  %v4720_v23 = vld [vmem:[%s9206_s0 + $0x198] sm:$0xf]  ;;  %v1300_v37 = vrot.slane %v5008_v32, 1  ;;  %v1305_v63 = vsel %vm1209_vm0, %v1303_v44, %v1304_v8 }
 0x1dd   :  { %v5324_v35 = vpop.f32.mrf.mxu0  ;;  %2610 = vrot.lane.b32.xlu0 %v8713_v5, %s5732_s21  ;;  %5347 = vmatmul.mubr.msk.bf16.gmra.mxu1 %vm3938_vm10, %v3917_v31  ;;  %v3061_v5 = vsel %vm664_vm1, %v3056_v36, %v3060_v45  ;;  %v8857_v0 = vcombine.low %v4720_v23, %v8829_v54  ;;  %v8879_v36 = vld [vmem:[%s9206_s0 + $0x1a0] ss:$0 sps:$4 sm:$0x11]   ;;  %v1048_v15 = vsel %vm664_vm1, %v1043_v14, %v1047_v18  ;;  %v4785_v23 = vld [vmem:[%s9206_s0 + $0x198] sm:$0xe] }
 0x1de   :  { %v8831_v11 = vpop.permute.xlu1 %1352  ;;  %v4182_v19 = vadd.f32 %v8628_v33, %v5324_v35  ;;  %v3347_v31 = vsel %vm1209_vm0, %v3345_v2, %v3346_v30  ;;  %v2070_v34 = vshll.u32 %v8879_v36, 16  ;;  %v1302_v4 = vsel %vm1209_vm0, %v1300_v37, %v1301_v10  ;;  %v4846_v32 = vld [vmem:[%s9206_s0 + $0x198] sm:$0xf] }
 0x1df   :  { %v4173_v9 = vpop.f32.mrf.mxu0  ;;  %v8841_v12 = vpop.permute.xlu0 %1350  ;;  %v2065_v45 = vshll.u32 %v8857_v0, 16  ;;  %v2055_v30 = vrot.slane %v2053_v53, 1  ;;  %v5105_v47 = vcombine.low %v4785_v23, %v8829_v54  ;;  %v5104_v2 = vcombine.low %v4784_v6, %v8850_v51 }
 0x1e0   :  { %v4174_v39 = vadd.f32 %v8628_v33, %v4173_v9  ;;  %3156 = vrot.lane.b32.xlu1 %v3073_v42, %s5733_s15  ;;  %v4382_v3 = vmax.f32 %v4182_v19, 0.0  ;;  %v4848_v9 = vld [vmem:[%s9206_s0 + $0x1a4] sm:$0xf]  ;;  %v8924_v19 = vld [vmem:[%s9206_s0 + $0x19c] sm:$0xf]  ;;  %v2072_v8 = vrot.slane %v2070_v34, 1  ;;  %v3466_v23 = vsel %vm3418_vm2, %v7826_v60, %v8807_v41 }
 0x1e1   :  { %v5325_v48 = vpop.f32.mrf.mxu0  ;;  %3154 = vrot.lane.b32.xlu0 %v3061_v5, %s5733_s15  ;;  %v2067_v56 = vrot.slane %v2065_v45, 1  ;;  %v5136_v45 = vcombine.low %v4846_v32, %v8924_v19  ;;  %v2328_v44 = vrot.slane %v8879_v36, 1  ;;  %v2324_v51 = vrot.slane %v5104_v2, 1  ;;  %v8949_v36 = vld [vmem:[%s9206_s0 + $0x1ac] ss:$0 sps:$4 sm:$0x11]  }
 0x1e2   :  { %v4380_v62 = vmax.f32 %v4174_v39, 0.0  ;;  %v8863_v61 = vpop.permute.xlu1 %1576  ;;  %v4185_v20 = vadd.f32 %v8628_v33, %v5325_v48  ;;  %v4463_v25 = vsel %vm3873_vm9, %v4382_v3, 0.0  ;;  %v2058_v48 = vshll.u32 %v5692_v13, 16  ;;  %v4913_v60 = vld [vmem:[%s9206_s0 + $0x1a4] sm:$0xe] }
 0x1e3   :  { %v4176_v22 = vpop.f32.mrf.mxu0  ;;  %v8868_v17 = vpop.permute.xlu0 %1574  ;;  %v2325_v37 = vrot.slane %v5692_v13, 1 }
 0x1e4   :  { %v4459_v7 = vsel %vm3873_vm9, %v4380_v62, 0.0  ;;  %v4177_v21 = vadd.f32 %v8628_v33, %v4176_v22  ;;  %1109 = vrot.lane.b32.xlu1 %v1036_v46, %s5729_s7  ;;  %v4383_v35 = vmax.f32 %v4185_v20, 0.0  ;;  %v8911_v46 = vld [vmem:[%s9206_s0 + $0x1a8] sm:$0xf] }
 0x1e5   :  { %v4460_v49 = vadd.f32 %v4459_v7, %v8715_v26  ;;  %3410 = vrot.lane.b32.xlu0 %v3344_v29, %s5734_s18  ;;  %v2063_v26 = vshrl.u32 %v8857_v0, 16  ;;  %v2051_v29 = vshrl.u32 %v8866_v58, 16  ;;  %v8930_v22 = vcombine.low %v4848_v9, %v8911_v46 }
 0x1e6   :  { %v4381_v43 = vmax.f32 %v4177_v21, 0.0  ;;  %v8885_v55 = vpop.permute.xlu1 %2120  ;;  %v4465_v62 = vsel %vm3873_vm9, %v4383_v35, 0.0  ;;  %v2060_v21 = vrot.slane %v2058_v48, 1  ;;  %v5201_v32 = vcombine.low %v4913_v60, %v8911_v46 }
 0x1e7   :  { %v2119_v28 = vpop.permute.xlu0 %2118  ;;  %v2068_v54 = vor.u32 %v2067_v56, %v2063_v26  ;;  %v2056_v20 = vor.u32 %v2055_v30, %v2051_v29  ;;  %v3089_v3 = vshll.u32 %v8930_v22, 16  ;;  %v3087_v56 = vshrl.u32 %v8930_v22, 16 }
 0x1e8   :  { %v4461_v42 = vsel %vm3873_vm9, %v4381_v43, 0.0  ;;  %1111 = vrot.lane.b32.xlu1 %v1048_v15, %s5729_s7  ;;  %v2327_v15 = vrot.slane %v5105_v47, 1  ;;  %v3464_v43 = vsel %vm3418_vm2, %v7791_v50, %v8783_v57  ;;  %v8957_v50 = vld [vmem:[%s9206_s0 + $0x1a0] ss:$0 sps:$4 sm:$0x11]   ;;  %v3077_v57 = vshll.u32 %v5136_v45, 16 }
 0x1e9   :  { %v4462_v5 = vadd.f32 %v4461_v42, %v4460_v49  ;;  %3412 = vrot.lane.b32.xlu0 %v3347_v31, %s5734_s18  ;;  %v2073_v31 = vsel %vm664_vm1, %v2068_v54, %v2072_v8  ;;  %v2061_v53 = vsel %vm664_vm1, %v2056_v20, %v2060_v21  ;;  %v3091_v34 = vrot.slane %v3089_v3, 1 }
 0x1ea   :  { %v8914_v39 = vpop.permute.xlu1 %2376  ;;  %v2329_v35 = vsel %vm1209_vm0, %v2327_v15, %v2328_v44  ;;  %v3079_v9 = vrot.slane %v3077_v57, 1  ;;  %v3352_v15 = vrot.slane %v8949_v36, 1 }
 0x1eb   :  { %v4464_v14 = vadd.f32 %v4463_v25, %v4462_v5  ;;  %v2375_v18 = vpop.permute.xlu0 %2374  ;;  %v3082_v25 = vshll.u32 %v8957_v50, 16 }
 0x1ec   :  { %1368 = vrot.lane.b32.xlu1 %v1305_v63, %s5728_s20  ;;  %v3075_v63 = vshrl.u32 %v5136_v45, 16 }
 0x1ed   :  { %1366 = vrot.lane.b32.xlu0 %v1302_v4, %s5728_s20  ;;  %v8933_v10 = vadd.f32 %v4465_v62, %v4464_v14 }
 0x1ee   :  { %v2601_v7 = vpop.permute.xlu1 %2600  ;;  %v3080_v54 = vor.u32 %v3079_v9, %v3075_v63 }
 0x1ef   :  { %v2599_v49 = vpop.permute.xlu0 %2598 }
 0x1f0   :  { %1592 = vrot.lane.b32.xlu1 %v8857_v0, %s5727_s28  ;;  %v3529_v0 = vsel %vm3483_vm3, %v3464_v43, %v8841_v12  ;;  %v2326_v12 = vsel %vm1209_vm0, %v2324_v51, %v2325_v37  ;;  %v3349_v37 = vrot.slane %v8957_v50, 1 }
 0x1f1   :  { %1590 = vrot.lane.b32.xlu0 %v8866_v58, %s5727_s28  ;;  %v3594_v58 = vsel %vm3548_vm4, %v3529_v0, %v8868_v17  ;;  %v3094_v17 = vshll.u32 %v8949_v36, 16 }
 0x1f2   :  { %v3145_v13 = vpop.permute.xlu1 %3144  ;;  %v3659_v42 = vsel %vm3613_vm5, %v3594_v58, %v2119_v28  ;;  %v3531_v28 = vsel %vm3483_vm3, %v3466_v23, %v8831_v11  ;;  %v4912_v11 = vld [vmem:[%s9206_s0 + $0x198] sm:$0xe] }
 0x1f3   :  { %v3143_v26 = vpop.permute.xlu0 %3142  ;;  %v3724_v5 = vsel %vm3678_vm6, %v3659_v42, %v2375_v18  ;;  %v3596_v41 = vsel %vm3548_vm4, %v3531_v28, %v8863_v61  ;;  %v3092_v61 = vor.u32 %v3091_v34, %v3087_v56  ;;  %v3096_v47 = vrot.slane %v3094_v17, 1 }
 0x1f4   :  { %2136 = vrot.lane.b32.xlu1 %v2073_v31, %s5730_s25  ;;  %v3789_v4 = vsel %vm3743_vm7, %v3724_v5, %v2599_v49  ;;  %v3661_v48 = vsel %vm3613_vm5, %v3596_v41, %v8885_v55  ;;  %v3084_v55 = vrot.slane %v3082_v25, 1  ;;  %v5200_v8 = vcombine.low %v4912_v11, %v8924_v19 }
 0x1f5   :  { %2134 = vrot.lane.b32.xlu0 %v2061_v53, %s5730_s25  ;;  %v3854_v29 = vsel %vm3808_vm8, %v3789_v4, %v3143_v26  ;;  %v3726_v18 = vsel %vm3678_vm6, %v3661_v48, %v8914_v39  ;;  %v3097_v46 = vsel %vm664_vm1, %v3092_v61, %v3096_v47 }
 0x1f6   :  { %v8975_v6 = vpop.permute.xlu1 %1097  ;;  %v3791_v62 = vsel %vm3743_vm7, %v3726_v18, %v2601_v7  ;;  %v3351_v7 = vrot.slane %v5201_v32, 1  ;;  %v3085_v19 = vsel %vm664_vm1, %v3080_v54, %v3084_v55  ;;  %v3348_v51 = vrot.slane %v5200_v8, 1 }
 0x1f7   :  { %v3399_v30 = vpop.permute.xlu0 %3398  ;;  %v3856_v20 = vsel %vm3808_vm8, %v3791_v62, %v3145_v13 }
 0x1f8   :  { %v3919_v14 = vsel %vm3873_vm9, %v3854_v29, %v3399_v30  ;;  %2392 = vrot.lane.b32.xlu1 %v2329_v35, %s5731_s13  ;;  %v3353_v31 = vsel %vm1209_vm0, %v3351_v7, %v3352_v15  ;;  %v3350_v53 = vsel %vm1209_vm0, %v3348_v51, %v3349_v37  ;;  %v3468_v30 = vsel %vm3418_vm2, %v8019_v52, %v8975_v6 }
 0x1f9   :  { %2390 = vrot.lane.b32.xlu0 %v2326_v12, %s5731_s13  ;;  %5350 = vmatprep.mubr.msk.bf16.mxu1 %vm3938_vm10, %v3919_v14 }
 0x1fa   :  { %v1100_v2 = vpop.permute.xlu1 %1099 }
 0x1fb   :  { %v3401_v21 = vpop.permute.xlu0 %3400  ;;  %v3470_v47 = vsel %vm3418_vm2, %v8069_v59, %v1100_v2 }
 0x1fc   :  { %v3921_v39 = vsel %vm3873_vm9, %v3856_v20, %v3401_v21  ;;  %2616 = vrot.lane.b32.xlu1 %v8930_v22, %s5732_s21 }
 0x1fd   :  { %v5328_v49 = vpop.f32.mrf.mxu0  ;;  %2614 = vrot.lane.b32.xlu0 %v5136_v45, %s5732_s21  ;;  %5351 = vmatmul.mubr.msk.bf16.gmra.mxu1 %vm3938_vm10, %v3921_v39 }
 0x1fe   :  { %v1357_v44 = vpop.permute.xlu1 %1356  ;;  %v4198_v0 = vadd.f32 %v8628_v33, %v5328_v49 }
 0x1ff   :  { %v4189_v3 = vpop.f32.mrf.mxu0  ;;  %v1355_v43 = vpop.permute.xlu0 %1354  ;;  %v3535_v62 = vsel %vm3483_vm3, %v3470_v47, %v1357_v44 }
 0x200   :  { %v4190_v22 = vadd.f32 %v8628_v33, %v4189_v3  ;;  %3160 = vrot.lane.b32.xlu1 %v3097_v46, %s5733_s15  ;;  %v4386_v12 = vmax.f32 %v4198_v0, 0.0  ;;  %v3533_v11 = vsel %vm3483_vm3, %v3468_v30, %v1355_v43 }
 0x201   :  { %v5329_v45 = vpop.f32.mrf.mxu0  ;;  %3158 = vrot.lane.b32.xlu0 %v3085_v19, %s5733_s15 }
 0x202   :  { %v4384_v36 = vmax.f32 %v4190_v22, 0.0  ;;  %v1581_v13 = vpop.permute.xlu1 %1580  ;;  %v4201_v26 = vadd.f32 %v8628_v33, %v5329_v45  ;;  %v4471_v28 = vsel %vm3873_vm9, %v4386_v12, 0.0 }
 0x203   :  { %v4192_v57 = vpop.f32.mrf.mxu0  ;;  %v1579_v58 = vpop.permute.xlu0 %1578  ;;  %v3600_v52 = vsel %vm3548_vm4, %v3535_v62, %v1581_v13 }
 0x204   :  { %v4467_v50 = vsel %vm3873_vm9, %v4384_v36, 0.0  ;;  %v4193_v35 = vadd.f32 %v8628_v33, %v4192_v57  ;;  %3416 = vrot.lane.b32.xlu1 %v3353_v31, %s5734_s18  ;;  %v4387_v5 = vmax.f32 %v4201_v26, 0.0  ;;  %v3598_v14 = vsel %vm3548_vm4, %v3533_v11, %v1579_v58 }
 0x205   :  { %v4468_v42 = vadd.f32 %v4467_v50, %v8933_v10  ;;  %3414 = vrot.lane.b32.xlu0 %v3350_v53, %s5734_s18 }
 0x206   :  { %v4385_v56 = vmax.f32 %v4193_v35, 0.0  ;;  %v2125_v34 = vpop.permute.xlu1 %2124  ;;  %v4473_v60 = vsel %vm3873_vm9, %v4387_v5, 0.0 }
 0x207   :  { %v2123_v23 = vpop.permute.xlu0 %2122  ;;  %v3665_v20 = vsel %vm3613_vm5, %v3600_v52, %v2125_v34 }
 0x208   :  { %v4469_v17 = vsel %vm3873_vm9, %v4385_v56, 0.0  ;;  %v3663_v61 = vsel %vm3613_vm5, %v3598_v14, %v2123_v23 }
 0x209   :  { %v4470_v63 = vadd.f32 %v4469_v17, %v4468_v42 }
 0x20a   :  { %v2381_v4 = vpop.permute.xlu1 %2380 }
 0x20b   :  { %v4472_v9 = vadd.f32 %v4471_v28, %v4470_v63  ;;  %v2379_v25 = vpop.permute.xlu0 %2378  ;;  %v3730_v39 = vsel %vm3678_vm6, %v3665_v20, %v2381_v4 }
 0x20c   :  { %v3728_v32 = vsel %vm3678_vm6, %v3663_v61, %v2379_v25 }
 0x20d   :  { %v4474_v41 = vadd.f32 %v4473_v60, %v4472_v9 }
 0x20e   :  { %v2605_v29 = vpop.permute.xlu1 %2604 }
 0x20f   :  { %v2603_v10 = vpop.permute.xlu0 %2602  ;;  %v3795_v59 = vsel %vm3743_vm7, %v3730_v39, %v2605_v29 }
 0x210   :  { %v3793_v54 = vsel %vm3743_vm7, %v3728_v32, %v2603_v10 }
 0x212   :  { %v3149_v48 = vpop.permute.xlu1 %3148 }
 0x213   :  { %v3147_v18 = vpop.permute.xlu0 %3146  ;;  %v3860_v49 = vsel %vm3808_vm8, %v3795_v59, %v3149_v48 }
 0x214   :  { %v3858_v6 = vsel %vm3808_vm8, %v3793_v54, %v3147_v18 }
 0x216   :  { %v1102_v55 = vpop.permute.xlu1 %1101 }
 0x217   :  { %v3403_v8 = vpop.permute.xlu0 %3402  ;;  %v3472_v25 = vsel %vm3418_vm2, %v8253_v27, %v1102_v55 }
 0x218   :  { %v3923_v21 = vsel %vm3873_vm9, %v3858_v6, %v3403_v8 }
 0x219   :  { %5354 = vmatprep.mubr.msk.bf16.mxu1 %vm3938_vm10, %v3923_v21 }
 0x21a   :  { %v1104_v2 = vpop.permute.xlu1 %1103 }
 0x21b   :  { %v3405_v46 = vpop.permute.xlu0 %3404  ;;  %v3474_v11 = vsel %vm3418_vm2, %v8303_v16, %v1104_v2 }
 0x21c   :  { %v3925_v7 = vsel %vm3873_vm9, %v3860_v49, %v3405_v46 }
 0x21d   :  { %v5332_v15 = vpop.f32.mrf.mxu0  ;;  %5355 = vmatmul.mubr.msk.bf16.gmra.mxu1 %vm3938_vm10, %v3925_v7 }
 0x21e   :  { %v1361_v44 = vpop.permute.xlu1 %1360  ;;  %v4214_v43 = vadd.f32 %v8628_v33, %v5332_v15 }
 0x21f   :  { %v4205_v19 = vpop.f32.mrf.mxu0  ;;  %v1359_v51 = vpop.permute.xlu0 %1358  ;;  %v3539_v14 = vsel %vm3483_vm3, %v3474_v11, %v1361_v44 }
 0x220   :  { %v4206_v37 = vadd.f32 %v8628_v33, %v4205_v19  ;;  %v4390_v58 = vmax.f32 %v4214_v43, 0.0  ;;  %v3537_v60 = vsel %vm3483_vm3, %v3472_v25, %v1359_v51 }
 0x221   :  { %v5333_v3 = vpop.f32.mrf.mxu0 }
 0x222   :  { %v4388_v22 = vmax.f32 %v4206_v37, 0.0  ;;  %v1585_v45 = vpop.permute.xlu1 %1584  ;;  %v4217_v13 = vadd.f32 %v8628_v33, %v5333_v3  ;;  %v4479_v34 = vsel %vm3873_vm9, %v4390_v58, 0.0 }
 0x223   :  { %v4208_v31 = vpop.f32.mrf.mxu0  ;;  %v1583_v0 = vpop.permute.xlu0 %1582  ;;  %v3604_v27 = vsel %vm3548_vm4, %v3539_v14, %v1585_v45 }
 0x224   :  { %v4475_v36 = vsel %vm3873_vm9, %v4388_v22, 0.0  ;;  %v4209_v53 = vadd.f32 %v8628_v33, %v4208_v31  ;;  %v4391_v42 = vmax.f32 %v4217_v13, 0.0  ;;  %v3602_v29 = vsel %vm3548_vm4, %v3537_v60, %v1583_v0 }
 0x225   :  { %v4476_v57 = vadd.f32 %v4475_v36, %v4474_v41 }
 0x226   :  { %v4389_v50 = vmax.f32 %v4209_v53, 0.0  ;;  %v2129_v26 = vpop.permute.xlu1 %2128  ;;  %v4481_v63 = vsel %vm3873_vm9, %v4391_v42, 0.0 }
 0x227   :  { %v2127_v35 = vpop.permute.xlu0 %2126  ;;  %v3669_v62 = vsel %vm3613_vm5, %v3604_v27, %v2129_v26 }
 0x228   :  { %v4477_v12 = vsel %vm3873_vm9, %v4389_v50, 0.0  ;;  %v3667_v30 = vsel %vm3613_vm5, %v3602_v29, %v2127_v35 }
 0x229   :  { %v4478_v56 = vadd.f32 %v4477_v12, %v4476_v57 }
 0x22a   :  { %v2385_v23 = vpop.permute.xlu1 %2384 }
 0x22b   :  { %v4480_v5 = vadd.f32 %v4479_v34, %v4478_v56  ;;  %v2383_v17 = vpop.permute.xlu0 %2382  ;;  %v3734_v55 = vsel %vm3678_vm6, %v3669_v62, %v2385_v23 }
 0x22c   :  { %v3732_v48 = vsel %vm3678_vm6, %v3667_v30, %v2383_v17 }
 0x22d   :  { %v4482_v28 = vadd.f32 %v4481_v63, %v4480_v5 }
 0x22e   :  { %v2609_v4 = vpop.permute.xlu1 %2608 }
 0x22f   :  { %v2607_v9 = vpop.permute.xlu0 %2606  ;;  %v3799_v16 = vsel %vm3743_vm7, %v3734_v55, %v2609_v4 }
 0x230   :  { %v3797_v18 = vsel %vm3743_vm7, %v3732_v48, %v2607_v9 }
 0x232   :  { %v3153_v41 = vpop.permute.xlu1 %3152 }
 0x233   :  { %v3151_v10 = vpop.permute.xlu0 %3150  ;;  %v3864_v6 = vsel %vm3808_vm8, %v3799_v16, %v3153_v41 }
 0x234   :  { %v3862_v47 = vsel %vm3808_vm8, %v3797_v18, %v3151_v10 }
 0x236   :  { %v1106_v61 = vpop.permute.xlu1 %1105 }
 0x237   :  { %v3407_v32 = vpop.permute.xlu0 %3406  ;;  %v3476_v23 = vsel %vm3418_vm2, %v8502_v1, %v1106_v61 }
 0x238   :  { %v3927_v54 = vsel %vm3873_vm9, %v3862_v47, %v3407_v32 }
 0x239   :  { %5358 = vmatprep.mubr.msk.bf16.mxu1 %vm3938_vm10, %v3927_v54 }
 0x23a   :  { %v1108_v52 = vpop.permute.xlu1 %1107 }
 0x23b   :  { %v3409_v8 = vpop.permute.xlu0 %3408  ;;  %v3478_v9 = vsel %vm3418_vm2, %v8517_v40, %v1108_v52 }
 0x23c   :  { %v3929_v20 = vsel %vm3873_vm9, %v3864_v6, %v3409_v8 }
 0x23d   :  { %v5336_v21 = vpop.f32.mrf.mxu0  ;;  %5359 = vmatmul.mubr.msk.bf16.gmra.mxu1 %vm3938_vm10, %v3929_v20 }
 0x23e   :  { %v1365_v39 = vpop.permute.xlu1 %1364  ;;  %v4230_v7 = vadd.f32 %v8628_v33, %v5336_v21 }
 0x23f   :  { %v4221_v59 = vpop.f32.mrf.mxu0  ;;  %v1363_v2 = vpop.permute.xlu0 %1362  ;;  %v3543_v60 = vsel %vm3483_vm3, %v3478_v9, %v1365_v39 }
 0x240   :  { %v4222_v49 = vadd.f32 %v8628_v33, %v4221_v59  ;;  %v4394_v45 = vmax.f32 %v4230_v7, 0.0  ;;  %v3541_v5 = vsel %vm3483_vm3, %v3476_v23, %v1363_v2 }
 0x241   :  { %v5337_v46 = vpop.f32.mrf.mxu0 }
 0x242   :  { %v4392_v15 = vmax.f32 %v4222_v49, 0.0  ;;  %v1589_v44 = vpop.permute.xlu1 %1588  ;;  %v4233_v3 = vadd.f32 %v8628_v33, %v5337_v46  ;;  %v4487_v58 = vsel %vm3873_vm9, %v4394_v45, 0.0 }
 0x243   :  { %v4224_v19 = vpop.f32.mrf.mxu0  ;;  %v1587_v51 = vpop.permute.xlu0 %1586  ;;  %v3608_v1 = vsel %vm3548_vm4, %v3543_v60, %v1589_v44 }
 0x244   :  { %v4483_v37 = vsel %vm3873_vm9, %v4392_v15, 0.0  ;;  %v4225_v43 = vadd.f32 %v8628_v33, %v4224_v19  ;;  %v4395_v13 = vmax.f32 %v4233_v3, 0.0  ;;  %v3606_v63 = vsel %vm3548_vm4, %v3541_v5, %v1587_v51 }
 0x245   :  { %v4484_v22 = vadd.f32 %v4483_v37, %v4482_v28 }
 0x246   :  { %v4393_v31 = vmax.f32 %v4225_v43, 0.0  ;;  %v2133_v0 = vpop.permute.xlu1 %2132  ;;  %v4489_v42 = vsel %vm3873_vm9, %v4395_v13, 0.0  ;;  %v5701_v13 = vld [vmem:[%s9209_s3 + $0x8] sm:$0xff]  }
 0x247   :  { %v2131_v36 = vpop.permute.xlu0 %2130  ;;  %v3673_v11 = vsel %vm3613_vm5, %v3608_v1, %v2133_v0 }
 0x248   :  { %v4485_v53 = vsel %vm3873_vm9, %v4393_v31, 0.0  ;;  %v3671_v4 = vsel %vm3613_vm5, %v3606_v63, %v2131_v36  ;;  %v9132_v63 = vld [vmem:[%s9208_s2] ss:$0 sm:$0xff] }
 0x249   :  { %v4486_v57 = vadd.f32 %v4485_v53, %v4484_v22  ;;  %v5735_v53 = vmov 0.0  }
 0x24a   :  { %v2389_v50 = vpop.permute.xlu1 %2388  ;;  %5370 = vmatprep.subr.bf16.mxu1 %v5735_v53 }
 0x24b   :  { %v4488_v26 = vadd.f32 %v4487_v58, %v4486_v57  ;;  %v2387_v35 = vpop.permute.xlu0 %2386  ;;  %v3738_v14 = vsel %vm3678_vm6, %v3673_v11, %v2389_v50  ;;  %5371 = vmatpush3.bf16.msra.mxu1 %v5701_v13 }
 0x24c   :  { %v3736_v25 = vsel %vm3678_vm6, %v3671_v4, %v2387_v35  ;;  %5372 = vmatprep.subr.bf16.mxu1 %v5735_v53 }
 0x24d   :  { %v9080_v12 = vadd.f32 %v4489_v42, %v4488_v26  ;;  %v5702_v26 = vld [vmem:[%s9209_s3] sm:$0xff]  }
 0x24e   :  { %v2613_v56 = vpop.permute.xlu1 %2612 }
 0x24f   :  { %v2611_v34 = vpop.permute.xlu0 %2610  ;;  %v3803_v40 = vsel %vm3743_vm7, %v3738_v14, %v2613_v56  ;;  %5373 = vmatpush3.bf16.msra.mxu1 %v5702_v26 }
 0x250   :  { %v3801_v41 = vsel %vm3743_vm7, %v3736_v25, %v2611_v34 }
 0x252   :  { %v3157_v17 = vpop.permute.xlu1 %3156 }
 0x253   :  { %v3155_v28 = vpop.permute.xlu0 %3154  ;;  %v3868_v61 = vsel %vm3808_vm8, %v3803_v40, %v3157_v17 }
 0x254   :  { %v3866_v10 = vsel %vm3808_vm8, %v3801_v41, %v3155_v28 }
 0x256   :  { %v1110_v29 = vpop.permute.xlu1 %1109 }
 0x257   :  { %v3411_v30 = vpop.permute.xlu0 %3410  ;;  %v3480_v59 = vsel %vm3418_vm2, %v8720_v24, %v1110_v29 }
 0x258   :  { %v3931_v48 = vsel %vm3873_vm9, %v3866_v10, %v3411_v30 }
 0x259   :  { %5362 = vmatprep.mubr.msk.bf16.mxu1 %vm3938_vm10, %v3931_v48 }
 0x25a   :  { %v1112_v18 = vpop.permute.xlu1 %1111 }
 0x25b   :  { %v3413_v27 = vpop.permute.xlu0 %3412  ;;  %v3482_v39 = vsel %vm3418_vm2, %v8778_v38, %v1112_v18 }
 0x25c   :  { %v3933_v47 = vsel %vm3873_vm9, %v3868_v61, %v3413_v27 }
 0x25d   :  { %5363 = vmatmul.mubr.msk.bf16.gmra.mxu1 %vm3938_vm10, %v3933_v47  ;;  %v5340_v57 = vpop.f32.mrf.mxu0 }
 0x25e   :  { %v1369_v32 = vpop.permute.xlu1 %1368  ;;  %v4246_v25 = vadd.f32 %v9132_v63, %v5340_v57 }
 0x25f   :  { %v1367_v62 = vpop.permute.xlu0 %1366  ;;  %v3547_v2 = vsel %vm3483_vm3, %v3482_v39, %v1369_v32  ;;  %v4237_v50 = vpop.f32.mrf.mxu0 }
 0x260   :  { %v3545_v49 = vsel %vm3483_vm3, %v3480_v59, %v1367_v62  ;;  %v4238_v28 = vadd.f32 %v9132_v63, %v4237_v50  ;;  %v4398_v1 = vmax.f32 %v4246_v25, 0.0 }
 0x261   :  { %v5341_v42 = vpop.f32.mrf.mxu0 }
 0x262   :  { %v1593_v54 = vpop.permute.xlu1 %1592  ;;  %v4396_v60 = vmax.f32 %v4238_v28, 0.0  ;;  %v4500_v40 = vsel %vm3873_vm9, %v4398_v1, 0.0 }
 0x263   :  { %v1591_v55 = vpop.permute.xlu0 %1590  ;;  %v3612_v46 = vsel %vm3548_vm4, %v3547_v2, %v1593_v54  ;;  %v4240_v34 = vpop.f32.mrf.mxu0 }
 0x264   :  { %v3610_v15 = vsel %vm3548_vm4, %v3545_v49, %v1591_v55  ;;  %v4241_v5 = vadd.f32 %v8628_v33, %v4240_v34  ;;  %v4497_v10 = vsel %vm3873_vm9, %v4396_v60, 0.0  ;;  %v4249_v33 = vadd.f32 %v9132_v63, %v5341_v42 }
 0x266   :  { %v2137_v16 = vpop.permute.xlu1 %2136  ;;  %v4397_v4 = vmax.f32 %v4241_v5, 0.0  ;;  %v4399_v18 = vmax.f32 %v4249_v33, 0.0 }
 0x267   :  { %v2135_v52 = vpop.permute.xlu0 %2134  ;;  %v3677_v44 = vsel %vm3613_vm5, %v3612_v46, %v2137_v16 }
 0x268   :  { %v3675_v51 = vsel %vm3613_vm5, %v3610_v15, %v2135_v52  ;;  %v4498_v41 = vsel %vm3873_vm9, %v4397_v4, 0.0  ;;  %v4502_v62 = vsel %vm3873_vm9, %v4399_v18, 0.0 }
 0x269   :  { %v4499_v11 = vadd.f32 %v4498_v41, %v4497_v10 }
 0x26a   :  { %v2393_v6 = vpop.permute.xlu1 %2392 }
 0x26b   :  { %v2391_v8 = vpop.permute.xlu0 %2390  ;;  %v3742_v37 = vsel %vm3678_vm6, %v3677_v44, %v2393_v6  ;;  %v4501_v27 = vadd.f32 %v4500_v40, %v4499_v11 }
 0x26c   :  { %v3740_v38 = vsel %vm3678_vm6, %v3675_v51, %v2391_v8 }
 0x26d   :  { %v4503_v16 = vadd.f32 %v4502_v62, %v4501_v27 }
 0x26e   :  { %v2617_v20 = vpop.permute.xlu1 %2616 }
 0x26f   :  { %v2615_v21 = vpop.permute.xlu0 %2614  ;;  %v3807_v24 = vsel %vm3743_vm7, %v3742_v37, %v2617_v20 }
 0x270   :  { %v3805_v3 = vsel %vm3743_vm7, %v3740_v38, %v2615_v21 }
 0x272   :  { %v3161_v7 = vpop.permute.xlu1 %3160 }
 0x273   :  { %v3159_v19 = vpop.permute.xlu0 %3158  ;;  %v3872_v43 = vsel %vm3808_vm8, %v3807_v24, %v3161_v7 }
 0x274   :  { %v3870_v45 = vsel %vm3808_vm8, %v3805_v3, %v3159_v19 }
 0x276   :  { %v3417_v22 = vpop.permute.xlu1 %3416 }
 0x277   :  { %v3937_v31 = vsel %vm3873_vm9, %v3872_v43, %v3417_v22  ;;  %v3415_v0 = vpop.permute.xlu0 %3414 }
 0x278   :  { %v3935_v36 = vsel %vm3873_vm9, %v3870_v45, %v3415_v0 }
 0x279   :  { %5366 = vmatprep.mubr.msk.bf16.mxu1 %vm3938_vm10, %v3935_v36 }
 0x27a   :  { %5367 = vmatmul.mubr.msk.bf16.gmra.mxu1 %vm3938_vm10, %v3937_v31 }
 0x27b   :  { %5374 = vmatprep.mubr.msk.bf16.mxu1 %vm5736_vm11, %v5735_v53 }
 0x27d   :  { %v5344_v58 = vpop.f32.mrf.mxu1 }
 0x27e   :  { %v4262_v54 = vadd.f32 %v9132_v63, %v5344_v58 }
 0x27f   :  { %v4253_v35 = vpop.f32.mrf.mxu1 }
 0x280   :  { %v4254_v30 = vadd.f32 %v9132_v63, %v4253_v35  ;;  %v4402_v20 = vmax.f32 %v4262_v54, 0.0 }
 0x281   :  { %v5345_v56 = vpop.f32.mrf.mxu1 }
 0x282   :  { %v4400_v61 = vmax.f32 %v4254_v30, 0.0  ;;  %v4265_v21 = vadd.f32 %v9132_v63, %v5345_v56  ;;  %v4508_v46 = vsel %vm3873_vm9, %v4402_v20, 0.0 }
 0x283   :  { %v4256_v23 = vpop.f32.mrf.mxu1 }
 0x284   :  { %v4257_v48 = vadd.f32 %v9132_v63, %v4256_v23  ;;  %v4504_v55 = vsel %vm3873_vm9, %v4400_v61, 0.0  ;;  %v4403_v7 = vmax.f32 %v4265_v21, 0.0 }
 0x285   :  { %v4505_v8 = vadd.f32 %v4504_v55, %v4503_v16 }
 0x286   :  { %v4401_v32 = vmax.f32 %v4257_v48, 0.0  ;;  %v4510_v38 = vsel %vm3873_vm9, %v4403_v7, 0.0 }
 0x288   :  { %v4506_v6 = vsel %vm3873_vm9, %v4401_v32, 0.0 }
 0x289   :  { %v4507_v59 = vadd.f32 %v4506_v6, %v4505_v8 }
 0x28b   :  { %v4509_v44 = vadd.f32 %v4508_v46, %v4507_v59 }
 0x28d   :  { %v4511_v43 = vadd.f32 %v4510_v38, %v4509_v44 }
 0x29d   :  { %v5348_v17 = vpop.f32.mrf.mxu1 }
 0x29e   :  { %v4278_v24 = vadd.f32 %v9132_v63, %v5348_v17 }
 0x29f   :  { %v4269_v9 = vpop.f32.mrf.mxu1 }
 0x2a0   :  { %v4270_v39 = vadd.f32 %v9132_v63, %v4269_v9  ;;  %v4406_v0 = vmax.f32 %v4278_v24, 0.0 }
 0x2a1   :  { %v5349_v29 = vpop.f32.mrf.mxu1 }
 0x2a2   :  { %v4404_v15 = vmax.f32 %v4270_v39, 0.0  ;;  %v4281_v36 = vadd.f32 %v9132_v63, %v5349_v29  ;;  %v4516_v50 = vsel %vm3873_vm9, %v4406_v0, 0.0 }
 0x2a3   :  { %v4272_v14 = vpop.f32.mrf.mxu1 }
 0x2a4   :  { %v4273_v49 = vadd.f32 %v9132_v63, %v4272_v14  ;;  %v4512_v3 = vsel %vm3873_vm9, %v4404_v15, 0.0  ;;  %v4407_v26 = vmax.f32 %v4281_v36, 0.0 }
 0x2a5   :  { %v4513_v45 = vadd.f32 %v4512_v3, %v4511_v43 }
 0x2a6   :  { %v4405_v51 = vmax.f32 %v4273_v49, 0.0  ;;  %v4518_v23 = vsel %vm3873_vm9, %v4407_v26, 0.0 }
 0x2a8   :  { %v4514_v22 = vsel %vm3873_vm9, %v4405_v51, 0.0 }
 0x2a9   :  { %v4515_v53 = vadd.f32 %v4514_v22, %v4513_v45 }
 0x2ab   :  { %v4517_v42 = vadd.f32 %v4516_v50, %v4515_v53 }
 0x2ad   :  { %v4519_v28 = vadd.f32 %v4518_v23, %v4517_v42 }
 0x2bd   :  { %v5352_v47 = vpop.f32.mrf.mxu1 }
 0x2be   :  { %v4294_v5 = vadd.f32 %v9132_v63, %v5352_v47 }
 0x2bf   :  { %v4285_v52 = vpop.f32.mrf.mxu1 }
 0x2c0   :  { %v4286_v13 = vadd.f32 %v9132_v63, %v4285_v52  ;;  %v4410_v60 = vmax.f32 %v4294_v5, 0.0 }
 0x2c1   :  { %v5353_v2 = vpop.f32.mrf.mxu1 }
 0x2c2   :  { %v4408_v35 = vmax.f32 %v4286_v13, 0.0  ;;  %v4297_v41 = vadd.f32 %v9132_v63, %v5353_v2  ;;  %v4524_v30 = vsel %vm3873_vm9, %v4410_v60, 0.0 }
 0x2c3   :  { %v4288_v19 = vpop.f32.mrf.mxu1 }
 0x2c4   :  { %v4289_v57 = vadd.f32 %v9132_v63, %v4288_v19  ;;  %v4520_v17 = vsel %vm3873_vm9, %v4408_v35, 0.0  ;;  %v4411_v11 = vmax.f32 %v4297_v41, 0.0 }
 0x2c5   :  { %v4521_v25 = vadd.f32 %v4520_v17, %v4519_v28 }
 0x2c6   :  { %v4409_v56 = vmax.f32 %v4289_v57, 0.0  ;;  %v4526_v61 = vsel %vm3873_vm9, %v4411_v11, 0.0 }
 0x2c8   :  { %v4522_v9 = vsel %vm3873_vm9, %v4409_v56, 0.0 }
 0x2c9   :  { %v4523_v1 = vadd.f32 %v4522_v9, %v4521_v25 }
 0x2cb   :  { %v4525_v14 = vadd.f32 %v4524_v30, %v4523_v1 }
 0x2cd   :  { %v4527_v32 = vadd.f32 %v4526_v61, %v4525_v14 }
 0x2dd   :  { %v5356_v37 = vpop.f32.mrf.mxu1 }
 0x2de   :  { %v4310_v27 = vadd.f32 %v9132_v63, %v5356_v37 }
 0x2df   :  { %v4301_v31 = vpop.f32.mrf.mxu1 }
 0x2e0   :  { %v4302_v29 = vadd.f32 %v9132_v63, %v4301_v31  ;;  %v4414_v52 = vmax.f32 %v4310_v27, 0.0 }
 0x2e1   :  { %v5357_v58 = vpop.f32.mrf.mxu1 }
 0x2e2   :  { %v4412_v48 = vmax.f32 %v4302_v29, 0.0  ;;  %v4313_v6 = vadd.f32 %v9132_v63, %v5357_v58  ;;  %v4532_v59 = vsel %vm3873_vm9, %v4414_v52, 0.0 }
 0x2e3   :  { %v4304_v34 = vpop.f32.mrf.mxu1 }
 0x2e4   :  { %v4305_v33 = vadd.f32 %v9132_v63, %v4304_v34  ;;  %v4528_v47 = vsel %vm3873_vm9, %v4412_v48, 0.0  ;;  %v4415_v2 = vmax.f32 %v4313_v6, 0.0 }
 0x2e5   :  { %v4529_v55 = vadd.f32 %v4528_v47, %v4527_v32 }
 0x2e6   :  { %v4413_v18 = vmax.f32 %v4305_v33, 0.0  ;;  %v4534_v44 = vsel %vm3873_vm9, %v4415_v2, 0.0 }
 0x2e8   :  { %v4530_v54 = vsel %vm3873_vm9, %v4413_v18, 0.0 }
 0x2e9   :  { %v4531_v20 = vadd.f32 %v4530_v54, %v4529_v55 }
 0x2eb   :  { %v4533_v46 = vadd.f32 %v4532_v59, %v4531_v20 }
 0x2ed   :  { %v4535_v37 = vadd.f32 %v4534_v44, %v4533_v46 }
 0x2fd   :  { %v5360_v4 = vpop.f32.mrf.mxu1 }
 0x2fe   :  { %v4326_v19 = vadd.f32 %v9132_v63, %v5360_v4  ;;  %v4491_v4 = vrot.slane %v9080_v12, 4 }
 0x2ff   :  { %v4317_v10 = vpop.f32.mrf.mxu1 }
 0x300   :  { %v4318_v8 = vadd.f32 %v9132_v63, %v4317_v10  ;;  %v4418_v43 = vmax.f32 %v4326_v19, 0.0  ;;  %v4492_v30 = vadd.f32 %v4491_v4, %v9080_v12 }
 0x301   :  { %v5361_v40 = vpop.f32.mrf.mxu1 }
 0x302   :  { %v4416_v49 = vmax.f32 %v4318_v8, 0.0  ;;  %v4329_v22 = vadd.f32 %v9132_v63, %v5361_v40  ;;  %v4540_v36 = vsel %vm3873_vm9, %v4418_v43, 0.0  ;;  %v4493_v32 = vrot.slane %v4492_v30, 2  ;;  %v5243_v43 = vld [vmem:[%s9210_s4] ss:$0 sm:$0xff] }
 0x303   :  { %v4320_v62 = vpop.f32.mrf.mxu1 }
 0x304   :  { %v4321_v21 = vadd.f32 %v9132_v63, %v4320_v62  ;;  %v4536_v51 = vsel %vm3873_vm9, %v4416_v49, 0.0  ;;  %v4419_v13 = vmax.f32 %v4329_v22, 0.0  ;;  %v4494_v52 = vadd.f32 %v4493_v32, %v4492_v30 }
 0x305   :  { %v4537_v24 = vadd.f32 %v4536_v51, %v4535_v37 }
 0x306   :  { %v4417_v7 = vmax.f32 %v4321_v21, 0.0  ;;  %v4542_v50 = vsel %vm3873_vm9, %v4419_v13, 0.0  ;;  %v4495_v21 = vrot.slane %v4494_v52, 1 }
 0x308   :  { %v4538_v38 = vsel %vm3873_vm9, %v4417_v7, 0.0 }
 0x309   :  { %v4539_v31 = vadd.f32 %v4538_v38, %v4537_v24 }
 0x30b   :  { %v4541_v57 = vadd.f32 %v4540_v36, %v4539_v31 }
 0x30d   :  { %v4543_v42 = vadd.f32 %v4542_v50, %v4541_v57 }
 0x31d   :  { %v5364_v16 = vpop.f32.mrf.mxu1 }
 0x31e   :  { %v4342_v26 = vadd.f32 %v9132_v63, %v5364_v16 }
 0x31f   :  { %v4333_v39 = vpop.f32.mrf.mxu1 }
 0x320   :  { %v4334_v45 = vadd.f32 %v9132_v63, %v4333_v39  ;;  %v4422_v23 = vmax.f32 %v4342_v26, 0.0 }
 0x321   :  { %v5365_v15 = vpop.f32.mrf.mxu1 }
 0x322   :  { %v4420_v53 = vmax.f32 %v4334_v45, 0.0  ;;  %v4345_v5 = vadd.f32 %v9132_v63, %v5365_v15  ;;  %v4548_v25 = vsel %vm3873_vm9, %v4422_v23, 0.0 }
 0x323   :  { %v4336_v3 = vpop.f32.mrf.mxu1 }
 0x324   :  { %v4337_v0 = vadd.f32 %v9132_v63, %v4336_v3  ;;  %v4544_v35 = vsel %vm3873_vm9, %v4420_v53, 0.0  ;;  %v4423_v60 = vmax.f32 %v4345_v5, 0.0 }
 0x325   :  { %v4545_v34 = vadd.f32 %v4544_v35, %v4543_v42 }
 0x326   :  { %v4421_v58 = vmax.f32 %v4337_v0, 0.0  ;;  %v4550_v48 = vsel %vm3873_vm9, %v4423_v60, 0.0 }
 0x328   :  { %v4546_v56 = vsel %vm3873_vm9, %v4421_v58, 0.0 }
 0x329   :  { %v4547_v17 = vadd.f32 %v4546_v56, %v4545_v34 }
 0x32b   :  { %v4549_v29 = vadd.f32 %v4548_v25, %v4547_v17 }
 0x32d   :  { %v4551_v61 = vadd.f32 %v4550_v48, %v4549_v29 }
 0x33a   :  { %v5368_v28 = vpop.f32.mrf.mxu1 }
 0x33b   :  { %v4358_v10 = vadd.f32 %v9132_v63, %v5368_v28 }
 0x33c   :  { %v4349_v9 = vpop.f32.mrf.mxu1 }
 0x33d   :  { %v4350_v41 = vadd.f32 %v9132_v63, %v4349_v9  ;;  %v4426_v27 = vmax.f32 %v4358_v10, 0.0 }
 0x33e   :  { %v5369_v1 = vpop.f32.mrf.mxu1 }
 0x33f   :  { %v4424_v33 = vmax.f32 %v4350_v41, 0.0  ;;  %v4361_v40 = vadd.f32 %v9132_v63, %v5369_v1  ;;  %v4556_v12 = vsel %vm3873_vm9, %v4426_v27, 0.0 }
 0x340   :  { %v4352_v11 = vpop.f32.mrf.mxu1 }
 0x341   :  { %v4552_v14 = vsel %vm3873_vm9, %v4424_v33, 0.0  ;;  %v4353_v18 = vadd.f32 %v9132_v63, %v4352_v11  ;;  %v4427_v54 = vmax.f32 %v4361_v40, 0.0  ;;  %v4496_v63 = vadd.f32 %v4495_v21, %v4494_v52 }
 0x342   :  { %v4553_v62 = vadd.f32 %v4552_v14, %v4551_v61 }
 0x343   :  { %v4425_v47 = vmax.f32 %v4353_v18, 0.0  ;;  %v4558_v8 = vsel %vm3873_vm9, %v4427_v54, 0.0  ;;  %v4566_v46 = vmul.f32 0.00390625, %v4496_v63 }
 0x345   :  { %v4554_v55 = vsel %vm3873_vm9, %v4425_v47, 0.0  ;;  %v4568_v44 = vpack.c.bf16 %v4566_v46, %v4566_v46 }
 0x346   :  { %v4555_v16 = vadd.f32 %v4554_v55, %v4553_v62 }
 0x347   :  { %v4583_v37 = vunpack.c.l.b16 %v4568_v44 }
 0x348   :  { %v4557_v6 = vadd.f32 %v4556_v12, %v4555_v16 }
 0x34a   :  { %v4559_v20 = vadd.f32 %v4558_v8, %v4557_v6 }
 0x34c   :  { %v4560_v39 = vrot.slane %v4559_v20, 4 }
 0x34e   :  { %v4561_v59 = vadd.f32 %v4560_v39, %v4559_v20 }
 0x350   :  { %v4562_v2 = vrot.slane %v4561_v59, 2 }
 0x352   :  { %v4563_v49 = vadd.f32 %v4562_v2, %v4561_v59 }
 0x354   :  { %v4564_v7 = vrot.slane %v4563_v49, 1 }
 0x356   :  { %v4565_v15 = vadd.f32 %v4564_v7, %v4563_v49 }
 0x358   :  { %v4567_v19 = vmul.f32 0.00390625, %v4565_v15 }
 0x35a   :  { %v4569_v51 = vpack.c.bf16 %v4567_v19, %v4567_v19 }
 0x35c   :  { %v4584_v38 = vunpack.c.l.b16 %v4569_v51 }
 0x35e   :  { %v4586_v24 = vsel %vm4585_vm12, %v4584_v38, %v4583_v37 }
 0x35f   :  { %v4587_v3 = vpack.c.b16 %v4586_v24, %v4586_v24 }
 0x361   :  { %5375 = vmatmul.mubr.msk.bf16.vlgmr.msra.gmra.mxu1 %vm3873_vm9, %v4587_v3 }
 0x421   :  { %v4637_v22 = vpop.f32.mrf.mxu1 }
 0x422   :  { %v4638_v45 = vadd.f32 %v5243_v43, %v4637_v22 }
 0x423   :  { %v5376_v31 = vpop.f32.mrf.mxu1 }
 0x424   :  { %4643 = vst [vmem:[#allocation2] sm:$0x3] %v4638_v45 }
 0x425   :  { %v4640_v0 = vpop.f32.mrf.mxu1 }
 0x426   :  { %5716 = shalt.err (!%p5713_p4)
}
 0x427   :  { %4653 = dma.vmem_to_hbm [thread:$0]  %s4651_s22, 32, %s9211_s5, [#allocation3]   ;;  %v5377_v36 = vpop.f32.mrf.mxu1 }
 0x428   :  { %5725 = dma.done.wait [#allocation3], 32  }
 0x429   :  { %5726 = vsyncadd [#allocation3], 4294967264 }
 0x42a   :  { %4657 = vsyncpa [#allocation3], 1 }

</bundles_post_ra>
